<compile_context>
chip_gen: v7x
topology: tpu7x:2x2x1
jax: 0.10.0
libtpu: 0.0.40
codegen_flags: <defaults>
</compile_context>

<pallas_src>
import math
import numpy as np
import jax
import jax.numpy as jnp
from jax.experimental import pallas as pl
from jax.experimental.pallas import tpu as pltpu


# ----------------------------- model config ---------------------------------
alpha = 1
c_input_dim = 13
c_layers_dim = [11, 9]
f_input_dim = 190
f_layers_dim = [180, 170, 160, 150, 140, 130, 120, 110, 100,
                90, 80, 70, 60, 50, 40, 32]
latent_space_dim = 6

F_DIMS = [f_input_dim] + f_layers_dim + [latent_space_dim]          # 190 ... 32 -> 6
CE_DIMS = [c_input_dim] + c_layers_dim + [latent_space_dim]         # 13 -> 11 -> 9 -> 6
CD_DIMS = [latent_space_dim] + c_layers_dim[::-1] + [c_input_dim]   # 6 -> 9 -> 11 -> 13

NF = len(F_DIMS) - 1     # 17 layers
NCE = len(CE_DIMS) - 1   # 3 layers
NCD = len(CD_DIMS) - 1   # 3 layers

WIDE_PAD = 256           # lane pad for f layers with out-dim > 128
NARROW_PAD = 128         # lane pad for everything <= 128 wide

# Split the f_encoder layer list by real width (dims are monotone decreasing).
_F_IN, _F_OUT = F_DIMS[:-1], F_DIMS[1:]
N_WIDE = sum(1 for o in _F_OUT if o > NARROW_PAD)                                 # 6
N_CROSS = sum(1 for i, o in zip(_F_IN, _F_OUT) if i > NARROW_PAD and o <= NARROW_PAD)  # 1
N_NARROW = NF - N_WIDE - N_CROSS                                                  # 10
assert N_CROSS == 1 and N_WIDE + 1 + N_NARROW == NF
assert all(o > NARROW_PAD for o in _F_OUT[:N_WIDE])
assert all(i <= NARROW_PAD and o <= NARROW_PAD
           for i, o in zip(_F_IN[N_WIDE + 1:], _F_OUT[N_WIDE + 1:]))


# ----------------------------- Pallas kernel --------------------------------
def _chain(h, w_ref, b_ref, num_layers):
    """Linear (+ReLU on all but last) chain over stacked VMEM (L,P,P)/(L,1,P) slabs."""
    for l in range(num_layers):                       # fully unrolled, static idx
        h = jnp.dot(h, w_ref[l], preferred_element_type=jnp.float32) + b_ref[l]
        if l < num_layers - 1:
            h = jnp.maximum(h, 0.0)                   # ReLU (Dropout = identity)
    return h


def fused_mme_kernel(x_ref, y_ref,
                     fww_hbm, fbw_ref, fwc_ref, fbc_ref, fwn_hbm, fbn_ref,
                     cew_ref, ceb_ref, cdw_ref, cdb_ref,
                     f_out_ref, g_out_ref, h_out_ref,
                     wbuf_w, wbuf_n, sem_w, sem_n):
    # Manual double-buffered DMA of the two big f_encoder weight slabs (HBM -> VMEM).
    def wide_cp(layer, slot):
        return pltpu.make_async_copy(fww_hbm.at[layer], wbuf_w.at[slot], sem_w.at[slot])

    def narrow_cp(layer, slot):
        return pltpu.make_async_copy(fwn_hbm.at[layer], wbuf_n.at[slot], sem_n.at[slot])

    # Prime slot 0 of both buffers immediately.
    wide_cp(0, 0).start()
    narrow_cp(0, 0).start()

    # c_encoder / c_decoder first: their weights are VMEM-resident, so these 6
    # tiny matmuls overlap the in-flight wide-layer-0 weight DMA.  g_beta is
    # consumed by the decoder straight from vregs (no HBM round-trip).
    g = _chain(y_ref[...], cew_ref, ceb_ref, NCE)       # (N,128), valid cols 0:6
    g_out_ref[...] = g
    h_out_ref[...] = _chain(g, cdw_ref, cdb_ref, NCD)   # (N,128), valid cols 0:13

    # f_encoder -- wide section (6 layers, 256-lane activations).
    h = x_ref[...]                                       # (N,256), valid cols 0:190
    for l in range(N_WIDE):                              # unrolled, static indices
        slot = l & 1
        wide_cp(l, slot).wait()
        if l + 1 < N_WIDE:
            wide_cp(l + 1, 1 - slot).start()             # prefetch next layer
        h = jnp.maximum(
            jnp.dot(h, wbuf_w[slot], preferred_element_type=jnp.float32)
            + fbw_ref[l], 0.0)

    # Crossover layer 130 -> 120: (256, 128) weight, VMEM-resident.
    h = jnp.maximum(
        jnp.dot(h, fwc_ref[...], preferred_element_type=jnp.float32)
        + fbc_ref[...], 0.0)                              # now (N,128)

    # f_encoder -- narrow section (10 layers, 128-lane activations; last has no ReLU).
    for l in range(N_NARROW):
        slot = l & 1
        narrow_cp(l, slot).wait()
        if l + 1 < N_NARROW:
            narrow_cp(l + 1, 1 - slot).start()
        h = jnp.dot(h, wbuf_n[slot], preferred_element_type=jnp.float32) + fbn_ref[l]
        if l < N_NARROW - 1:
            h = jnp.maximum(h, 0.0)

    f_out_ref[...] = h                                    # (N,128), valid cols 0:6


def mme_forward(x_pad, y_pad, fww, fbw, fwc, fbc, fwn, fbn, cew, ceb, cdw, cdb):
    """Single fused pallas_call, no grid (whole arrays resident / manual DMA)."""
    n_pad = x_pad.shape[0]

    def vmem():
        return pl.BlockSpec(memory_space=pltpu.MemorySpace.VMEM)

    def hbm():
        return pl.BlockSpec(memory_space=pl.ANY)

    return pl.pallas_call(
        fused_mme_kernel,
        out_shape=(
            jax.ShapeDtypeStruct((n_pad, NARROW_PAD), jnp.float32),   # f_gamma slab
            jax.ShapeDtypeStruct((n_pad, NARROW_PAD), jnp.float32),   # g_beta slab
            jax.ShapeDtypeStruct((n_pad, NARROW_PAD), jnp.float32),   # h_eta  slab
        ),
        in_specs=[
            vmem(),   # x_pad
            vmem(),   # y_pad
            hbm(),    # fww  (6,256,256)  -> manual double-buffered DMA
            vmem(),   # fbw  (6,1,256)
            vmem(),   # fwc  (256,128)
            vmem(),   # fbc  (1,128)
            hbm(),    # fwn  (10,128,128) -> manual double-buffered DMA
            vmem(),   # fbn  (10,1,128)
            vmem(),   # cew  (3,128,128)
            vmem(),   # ceb
            vmem(),   # cdw  (3,128,128)
            vmem(),   # cdb
        ],
        out_specs=(vmem(), vmem(), vmem()),
        scratch_shapes=[
            pltpu.VMEM((2, WIDE_PAD, WIDE_PAD), jnp.float32),      # wide layer dbl-buf
            pltpu.VMEM((2, NARROW_PAD, NARROW_PAD), jnp.float32),  # narrow layer dbl-buf
            pltpu.SemaphoreType.DMA((2,)),
            pltpu.SemaphoreType.DMA((2,)),
        ],
    )(x_pad, y_pad, fww, fbw, fwc, fbc, fwn, fbn, cew, ceb, cdw, cdb)


# -------------------- jitted end-to-end forward (pad + kernel + slice) -------
@jax.jit
def _forward_jit(x, y, fww, fbw, fwc, fbc, fwn, fbn, cew, ceb, cdw, cdb):
    n = x.shape[0]
    n_pad = ((n + 7) // 8) * 8                     # sublane-align the batch
    x_pad = jnp.zeros((n_pad, WIDE_PAD), jnp.float32).at[:n, :f_input_dim].set(x)
    y_pad = jnp.zeros((n_pad, NARROW_PAD), jnp.float32).at[:n, :c_input_dim].set(y)
    f_slab, g_slab, h_slab = mme_forward(
        x_pad, y_pad, fww, fbw, fwc, fbc, fwn, fbn, cew, ceb, cdw, cdb)
    return (f_slab[:n, :latent_space_dim],
            g_slab[:n, :latent_space_dim],
            h_slab[:n, :c_input_dim])


# ------------------------- parameter initialization -------------------------
def _init_linear(key, fan_in, fan_out):
    """torch.nn.Linear default init: U(-1/sqrt(fan_in), 1/sqrt(fan_in))."""
    k_w, k_b = jax.random.split(key)
    bound = 1.0 / math.sqrt(fan_in)
    # Stored pre-transposed: (in, out) so the kernel computes h @ W + b.
    w = jax.random.uniform(k_w, (fan_in, fan_out), jnp.float32, -bound, bound)
    b = jax.random.uniform(k_b, (1, fan_out), jnp.float32, -bound, bound)
    return w, b


def _init_mlp(key, dims):
    weights, biases = [], []
    keys = jax.random.split(key, len(dims) - 1)
    for i in range(len(dims) - 1):
        w, b = _init_linear(keys[i], dims[i], dims[i + 1])
        weights.append(w)
        biases.append(b)
    return weights, biases


def _pack_slab(weights, biases, kpad, npad):
    """Zero-pad each (in,out)/(1,out) into stacked (L,kpad,npad)/(L,1,npad)."""
    L = len(weights)
    w_slab = np.zeros((L, kpad, npad), np.float32)
    b_slab = np.zeros((L, 1, npad), np.float32)
    for l, (w, b) in enumerate(zip(weights, biases)):
        fi, fo = w.shape
        w_slab[l, :fi, :fo] = np.asarray(w)
        b_slab[l, :, :fo] = np.asarray(b)
    return jnp.asarray(w_slab), jnp.asarray(b_slab)


def _pack_single(w, b, kpad, npad):
    fi, fo = w.shape
    w_p = np.zeros((kpad, npad), np.float32)
    b_p = np.zeros((1, npad), np.float32)
    w_p[:fi, :fo] = np.asarray(w)
    b_p[:, :fo] = np.asarray(b)
    return jnp.asarray(w_p), jnp.asarray(b_p)


class MultiModalEmbeddingPallas:
    def __init__(self, key):
        kf, kc, kd = jax.random.split(key, 3)
        # Unpadded parameter lists (kept for the pure-JAX reference).
        self.f_w, self.f_b = _init_mlp(kf, F_DIMS)
        self.ce_w, self.ce_b = _init_mlp(kc, CE_DIMS)
        self.cd_w, self.cd_b = _init_mlp(kd, CD_DIMS)

        # f_encoder split by width: wide (256x256), crossover (256x128), narrow (128x128).
        self.fww, self.fbw = _pack_slab(self.f_w[:N_WIDE], self.f_b[:N_WIDE],
                                        WIDE_PAD, WIDE_PAD)
        self.fwc, self.fbc = _pack_single(self.f_w[N_WIDE], self.f_b[N_WIDE],
                                          WIDE_PAD, NARROW_PAD)
        self.fwn, self.fbn = _pack_slab(self.f_w[N_WIDE + 1:], self.f_b[N_WIDE + 1:],
                                        NARROW_PAD, NARROW_PAD)
        # c_encoder / c_decoder slabs (all dims <= 13 -> 128 pad).
        self.cew, self.ceb = _pack_slab(self.ce_w, self.ce_b, NARROW_PAD, NARROW_PAD)
        self.cdw, self.cdb = _pack_slab(self.cd_w, self.cd_b, NARROW_PAD, NARROW_PAD)

    def forward(self, x, y):
        return _forward_jit(x, y,
                            self.fww, self.fbw, self.fwc, self.fbc,
                            self.fwn, self.fbn,
                            self.cew, self.ceb, self.cdw, self.cdb)

    # ----------------------- pure-JAX reference ------------------------------
    @staticmethod
    def _ref_mlp(x, ws, bs):
        h = x
        for i, (w, b) in enumerate(zip(ws, bs)):
            h = h @ w + b
            if i < len(ws) - 1:
                h = jnp.maximum(h, 0.0)
        return h

    def forward_ref(self, x, y):
        f_gamma = self._ref_mlp(x, self.f_w, self.f_b)
        g_beta = self._ref_mlp(y, self.ce_w, self.ce_b)
        h_eta = self._ref_mlp(g_beta, self.cd_w, self.cd_b)
        return f_gamma, g_beta, h_eta


# --------------------------------- main --------------------------------------
if __name__ == "__main__":
    key = jax.random.PRNGKey(0)
    k_model, k_x, k_y = jax.random.split(key, 3)

    model = MultiModalEmbeddingPallas(k_model)

    batch = 8
    x = jax.random.normal(k_x, (batch, f_input_dim), jnp.float32)  # (8, 190)
    y = jax.random.normal(k_y, (batch, c_input_dim), jnp.float32)  # (8, 13)

    f_gamma, g_beta, h_eta = model.forward(x, y)
    jax.block_until_ready((f_gamma, g_beta, h_eta))

    # validate against pure-JAX reference
    f_ref, g_ref, h_ref = model.forward_ref(x, y)
    assert f_gamma.shape == (batch, latent_space_dim)
    assert g_beta.shape == (batch, latent_space_dim)
    assert h_eta.shape == (batch, c_input_dim)
    np.testing.assert_allclose(np.asarray(f_gamma), np.asarray(f_ref),
                               rtol=1e-4, atol=1e-4)
    np.testing.assert_allclose(np.asarray(g_beta), np.asarray(g_ref),
                               rtol=1e-4, atol=1e-4)
    np.testing.assert_allclose(np.asarray(h_eta), np.asarray(h_ref),
                               rtol=1e-4, atol=1e-4)

    print("KERNEL_OK")
</pallas_src>

<mosaic_0001>
module attributes {stable_mosaic.version = 11 : i64} {
  func.func @fused_mme_kernel(%arg0: memref<8x256xf32, #tpu.memory_space<vmem>>, %arg1: memref<8x128xf32, #tpu.memory_space<vmem>>, %arg2: memref<6x256x256xf32, #tpu.memory_space<any>>, %arg3: memref<6x1x256xf32, #tpu.memory_space<vmem>>, %arg4: memref<256x128xf32, #tpu.memory_space<vmem>>, %arg5: memref<1x128xf32, #tpu.memory_space<vmem>>, %arg6: memref<10x128x128xf32, #tpu.memory_space<any>>, %arg7: memref<10x1x128xf32, #tpu.memory_space<vmem>>, %arg8: memref<3x128x128xf32, #tpu.memory_space<vmem>>, %arg9: memref<3x1x128xf32, #tpu.memory_space<vmem>>, %arg10: memref<3x128x128xf32, #tpu.memory_space<vmem>>, %arg11: memref<3x1x128xf32, #tpu.memory_space<vmem>>, %arg12: memref<8x128xf32, #tpu.memory_space<vmem>>, %arg13: memref<8x128xf32, #tpu.memory_space<vmem>>, %arg14: memref<8x128xf32, #tpu.memory_space<vmem>>, %arg15: memref<2x256x256xf32, #tpu.memory_space<vmem>>, %arg16: memref<2x128x128xf32, #tpu.memory_space<vmem>>, %arg17: memref<2x!tpu.dma_semaphore, #tpu.memory_space<semaphore_mem>>, %arg18: memref<2x!tpu.dma_semaphore, #tpu.memory_space<semaphore_mem>>) attributes {dimension_semantics = [], scalar_prefetch = 0 : i64, scratch_operands = 4 : i64, tpu.core_type = #tpu.core_type<tc>} {
    %c0_i32 = arith.constant 0 : i32
    %c0_i32_0 = arith.constant 0 : i32
    %c0_i32_1 = arith.constant 0 : i32
    %c0_i32_2 = arith.constant 0 : i32
    %c0_i32_3 = arith.constant 0 : i32
    %0 = tpu.memref_slice %arg2[%c0_i32, %c0_i32_2, %c0_i32_3] : memref<6x256x256xf32, #tpu.memory_space<any>> -> memref<1x256x256xf32, #tpu.memory_space<any>>
    %1 = tpu.memref_squeeze %0 : memref<1x256x256xf32, #tpu.memory_space<any>> -> memref<256x256xf32, #tpu.memory_space<any>>
    %c0_i32_4 = arith.constant 0 : i32
    %c0_i32_5 = arith.constant 0 : i32
    %2 = tpu.memref_slice %arg15[%c0_i32_0, %c0_i32_4, %c0_i32_5] : memref<2x256x256xf32, #tpu.memory_space<vmem>> -> memref<1x256x256xf32, #tpu.memory_space<vmem>>
    %3 = tpu.memref_squeeze %2 : memref<1x256x256xf32, #tpu.memory_space<vmem>> -> memref<256x256xf32, #tpu.memory_space<vmem>>
    %4 = tpu.memref_slice %arg17[%c0_i32_1] : memref<2x!tpu.dma_semaphore, #tpu.memory_space<semaphore_mem>> -> memref<1x!tpu.dma_semaphore, #tpu.memory_space<semaphore_mem>>
    %5 = tpu.memref_squeeze %4 : memref<1x!tpu.dma_semaphore, #tpu.memory_space<semaphore_mem>> -> memref<!tpu.dma_semaphore, #tpu.memory_space<semaphore_mem>>
    tpu.enqueue_dma source(%1 : memref<256x256xf32, #tpu.memory_space<any>>) target(%3 : memref<256x256xf32, #tpu.memory_space<vmem>>) target_semaphore(%5 : memref<!tpu.dma_semaphore, #tpu.memory_space<semaphore_mem>>)
    %c0_i32_6 = arith.constant 0 : i32
    %c0_i32_7 = arith.constant 0 : i32
    %c0_i32_8 = arith.constant 0 : i32
    %c0_i32_9 = arith.constant 0 : i32
    %c0_i32_10 = arith.constant 0 : i32
    %6 = tpu.memref_slice %arg6[%c0_i32_6, %c0_i32_9, %c0_i32_10] : memref<10x128x128xf32, #tpu.memory_space<any>> -> memref<1x128x128xf32, #tpu.memory_space<any>>
    %7 = tpu.memref_squeeze %6 : memref<1x128x128xf32, #tpu.memory_space<any>> -> memref<128x128xf32, #tpu.memory_space<any>>
    %c0_i32_11 = arith.constant 0 : i32
    %c0_i32_12 = arith.constant 0 : i32
    %8 = tpu.memref_slice %arg16[%c0_i32_7, %c0_i32_11, %c0_i32_12] : memref<2x128x128xf32, #tpu.memory_space<vmem>> -> memref<1x128x128xf32, #tpu.memory_space<vmem>>
    %9 = tpu.memref_squeeze %8 : memref<1x128x128xf32, #tpu.memory_space<vmem>> -> memref<128x128xf32, #tpu.memory_space<vmem>>
    %10 = tpu.memref_slice %arg18[%c0_i32_8] : memref<2x!tpu.dma_semaphore, #tpu.memory_space<semaphore_mem>> -> memref<1x!tpu.dma_semaphore, #tpu.memory_space<semaphore_mem>>
    %11 = tpu.memref_squeeze %10 : memref<1x!tpu.dma_semaphore, #tpu.memory_space<semaphore_mem>> -> memref<!tpu.dma_semaphore, #tpu.memory_space<semaphore_mem>>
    tpu.enqueue_dma source(%7 : memref<128x128xf32, #tpu.memory_space<any>>) target(%9 : memref<128x128xf32, #tpu.memory_space<vmem>>) target_semaphore(%11 : memref<!tpu.dma_semaphore, #tpu.memory_space<semaphore_mem>>)
    %c0 = arith.constant 0 : index
    %c0_13 = arith.constant 0 : index
    %12 = vector.load %arg1[%c0, %c0_13] : memref<8x128xf32, #tpu.memory_space<vmem>>, vector<8x128xf32>
    %c0_14 = arith.constant 0 : index
    %c0_15 = arith.constant 0 : index
    %c0_16 = arith.constant 0 : index
    %13 = vector.load %arg8[%c0_14, %c0_15, %c0_16] : memref<3x128x128xf32, #tpu.memory_space<vmem>>, vector<1x128x128xf32>
    %14 = vector.shape_cast %13 : vector<1x128x128xf32> to vector<128x128xf32>
    %cst = arith.constant dense<0.000000e+00> : vector<8x128xf32>
    %15 = tpu.matmul %12, %14, %cst {dimension_numbers = #tpu.dot_dimension_numbers<[1], [0], [0], [1], [0, 0, 1, 1], [], []>} : vector<8x128xf32>, vector<128x128xf32>, vector<8x128xf32> -> vector<8x128xf32>
    %c0_17 = arith.constant 0 : index
    %c0_18 = arith.constant 0 : index
    %c0_19 = arith.constant 0 : index
    %16 = vector.load %arg9[%c0_17, %c0_18, %c0_19] : memref<3x1x128xf32, #tpu.memory_space<vmem>>, vector<1x1x128xf32>
    %17 = vector.shape_cast %16 : vector<1x1x128xf32> to vector<1x128xf32>
    %18 = vector.broadcast %17 : vector<1x128xf32> to vector<8x128xf32>
    %19 = arith.addf %15, %18 : vector<8x128xf32>
    %cst_20 = arith.constant 0.000000e+00 : f32
    %20 = vector.broadcast %cst_20 : f32 to vector<8x128xf32>
    %21 = arith.maximumf %19, %20 : vector<8x128xf32>
    %c1 = arith.constant 1 : index
    %c0_21 = arith.constant 0 : index
    %c0_22 = arith.constant 0 : index
    %22 = vector.load %arg8[%c1, %c0_21, %c0_22] : memref<3x128x128xf32, #tpu.memory_space<vmem>>, vector<1x128x128xf32>
    %23 = vector.shape_cast %22 : vector<1x128x128xf32> to vector<128x128xf32>
    %cst_23 = arith.constant dense<0.000000e+00> : vector<8x128xf32>
    %24 = tpu.matmul %21, %23, %cst_23 {dimension_numbers = #tpu.dot_dimension_numbers<[1], [0], [0], [1], [0, 0, 1, 1], [], []>} : vector<8x128xf32>, vector<128x128xf32>, vector<8x128xf32> -> vector<8x128xf32>
    %c1_24 = arith.constant 1 : index
    %c0_25 = arith.constant 0 : index
    %c0_26 = arith.constant 0 : index
    %25 = vector.load %arg9[%c1_24, %c0_25, %c0_26] : memref<3x1x128xf32, #tpu.memory_space<vmem>>, vector<1x1x128xf32>
    %26 = vector.shape_cast %25 : vector<1x1x128xf32> to vector<1x128xf32>
    %27 = vector.broadcast %26 : vector<1x128xf32> to vector<8x128xf32>
    %28 = arith.addf %24, %27 : vector<8x128xf32>
    %cst_27 = arith.constant 0.000000e+00 : f32
    %29 = vector.broadcast %cst_27 : f32 to vector<8x128xf32>
    %30 = arith.maximumf %28, %29 : vector<8x128xf32>
    %c2 = arith.constant 2 : index
    %c0_28 = arith.constant 0 : index
    %c0_29 = arith.constant 0 : index
    %31 = vector.load %arg8[%c2, %c0_28, %c0_29] : memref<3x128x128xf32, #tpu.memory_space<vmem>>, vector<1x128x128xf32>
    %32 = vector.shape_cast %31 : vector<1x128x128xf32> to vector<128x128xf32>
    %cst_30 = arith.constant dense<0.000000e+00> : vector<8x128xf32>
    %33 = tpu.matmul %30, %32, %cst_30 {dimension_numbers = #tpu.dot_dimension_numbers<[1], [0], [0], [1], [0, 0, 1, 1], [], []>} : vector<8x128xf32>, vector<128x128xf32>, vector<8x128xf32> -> vector<8x128xf32>
    %c2_31 = arith.constant 2 : index
    %c0_32 = arith.constant 0 : index
    %c0_33 = arith.constant 0 : index
    %34 = vector.load %arg9[%c2_31, %c0_32, %c0_33] : memref<3x1x128xf32, #tpu.memory_space<vmem>>, vector<1x1x128xf32>
    %35 = vector.shape_cast %34 : vector<1x1x128xf32> to vector<1x128xf32>
    %36 = vector.broadcast %35 : vector<1x128xf32> to vector<8x128xf32>
    %37 = arith.addf %33, %36 : vector<8x128xf32>
    %c0_34 = arith.constant 0 : index
    %c0_35 = arith.constant 0 : index
    %38 = vector.load %arg13[%c0_34, %c0_35] : memref<8x128xf32, #tpu.memory_space<vmem>>, vector<8x128xf32>
    tpu.vector_store %arg13[%c0_34, %c0_35], %37 {strides = array<i32>} : memref<8x128xf32, #tpu.memory_space<vmem>>, vector<8x128xf32>,
    %c0_36 = arith.constant 0 : index
    %c0_37 = arith.constant 0 : index
    %c0_38 = arith.constant 0 : index
    %39 = vector.load %arg10[%c0_36, %c0_37, %c0_38] : memref<3x128x128xf32, #tpu.memory_space<vmem>>, vector<1x128x128xf32>
    %40 = vector.shape_cast %39 : vector<1x128x128xf32> to vector<128x128xf32>
    %cst_39 = arith.constant dense<0.000000e+00> : vector<8x128xf32>
    %41 = tpu.matmul %37, %40, %cst_39 {dimension_numbers = #tpu.dot_dimension_numbers<[1], [0], [0], [1], [0, 0, 1, 1], [], []>} : vector<8x128xf32>, vector<128x128xf32>, vector<8x128xf32> -> vector<8x128xf32>
    %c0_40 = arith.constant 0 : index
    %c0_41 = arith.constant 0 : index
    %c0_42 = arith.constant 0 : index
    %42 = vector.load %arg11[%c0_40, %c0_41, %c0_42] : memref<3x1x128xf32, #tpu.memory_space<vmem>>, vector<1x1x128xf32>
    %43 = vector.shape_cast %42 : vector<1x1x128xf32> to vector<1x128xf32>
    %44 = vector.broadcast %43 : vector<1x128xf32> to vector<8x128xf32>
    %45 = arith.addf %41, %44 : vector<8x128xf32>
    %cst_43 = arith.constant 0.000000e+00 : f32
    %46 = vector.broadcast %cst_43 : f32 to vector<8x128xf32>
    %47 = arith.maximumf %45, %46 : vector<8x128xf32>
    %c1_44 = arith.constant 1 : index
    %c0_45 = arith.constant 0 : index
    %c0_46 = arith.constant 0 : index
    %48 = vector.load %arg10[%c1_44, %c0_45, %c0_46] : memref<3x128x128xf32, #tpu.memory_space<vmem>>, vector<1x128x128xf32>
    %49 = vector.shape_cast %48 : vector<1x128x128xf32> to vector<128x128xf32>
    %cst_47 = arith.constant dense<0.000000e+00> : vector<8x128xf32>
    %50 = tpu.matmul %47, %49, %cst_47 {dimension_numbers = #tpu.dot_dimension_numbers<[1], [0], [0], [1], [0, 0, 1, 1], [], []>} : vector<8x128xf32>, vector<128x128xf32>, vector<8x128xf32> -> vector<8x128xf32>
    %c1_48 = arith.constant 1 : index
    %c0_49 = arith.constant 0 : index
    %c0_50 = arith.constant 0 : index
    %51 = vector.load %arg11[%c1_48, %c0_49, %c0_50] : memref<3x1x128xf32, #tpu.memory_space<vmem>>, vector<1x1x128xf32>
    %52 = vector.shape_cast %51 : vector<1x1x128xf32> to vector<1x128xf32>
    %53 = vector.broadcast %52 : vector<1x128xf32> to vector<8x128xf32>
    %54 = arith.addf %50, %53 : vector<8x128xf32>
    %cst_51 = arith.constant 0.000000e+00 : f32
    %55 = vector.broadcast %cst_51 : f32 to vector<8x128xf32>
    %56 = arith.maximumf %54, %55 : vector<8x128xf32>
    %c2_52 = arith.constant 2 : index
    %c0_53 = arith.constant 0 : index
    %c0_54 = arith.constant 0 : index
    %57 = vector.load %arg10[%c2_52, %c0_53, %c0_54] : memref<3x128x128xf32, #tpu.memory_space<vmem>>, vector<1x128x128xf32>
    %58 = vector.shape_cast %57 : vector<1x128x128xf32> to vector<128x128xf32>
    %cst_55 = arith.constant dense<0.000000e+00> : vector<8x128xf32>
    %59 = tpu.matmul %56, %58, %cst_55 {dimension_numbers = #tpu.dot_dimension_numbers<[1], [0], [0], [1], [0, 0, 1, 1], [], []>} : vector<8x128xf32>, vector<128x128xf32>, vector<8x128xf32> -> vector<8x128xf32>
    %c2_56 = arith.constant 2 : index
    %c0_57 = arith.constant 0 : index
    %c0_58 = arith.constant 0 : index
    %60 = vector.load %arg11[%c2_56, %c0_57, %c0_58] : memref<3x1x128xf32, #tpu.memory_space<vmem>>, vector<1x1x128xf32>
    %61 = vector.shape_cast %60 : vector<1x1x128xf32> to vector<1x128xf32>
    %62 = vector.broadcast %61 : vector<1x128xf32> to vector<8x128xf32>
    %63 = arith.addf %59, %62 : vector<8x128xf32>
    %c0_59 = arith.constant 0 : index
    %c0_60 = arith.constant 0 : index
    %64 = vector.load %arg14[%c0_59, %c0_60] : memref<8x128xf32, #tpu.memory_space<vmem>>, vector<8x128xf32>
    tpu.vector_store %arg14[%c0_59, %c0_60], %63 {strides = array<i32>} : memref<8x128xf32, #tpu.memory_space<vmem>>, vector<8x128xf32>,
    %c0_61 = arith.constant 0 : index
    %c0_62 = arith.constant 0 : index
    %65 = vector.load %arg0[%c0_61, %c0_62] : memref<8x256xf32, #tpu.memory_space<vmem>>, vector<8x256xf32>
    %c0_i32_63 = arith.constant 0 : i32
    %c0_i32_64 = arith.constant 0 : i32
    %c0_i32_65 = arith.constant 0 : i32
    %c0_i32_66 = arith.constant 0 : i32
    %c0_i32_67 = arith.constant 0 : i32
    %66 = tpu.memref_slice %arg2[%c0_i32_63, %c0_i32_66, %c0_i32_67] : memref<6x256x256xf32, #tpu.memory_space<any>> -> memref<1x256x256xf32, #tpu.memory_space<any>>
    %67 = tpu.memref_squeeze %66 : memref<1x256x256xf32, #tpu.memory_space<any>> -> memref<256x256xf32, #tpu.memory_space<any>>
    %c0_i32_68 = arith.constant 0 : i32
    %c0_i32_69 = arith.constant 0 : i32
    %68 = tpu.memref_slice %arg15[%c0_i32_64, %c0_i32_68, %c0_i32_69] : memref<2x256x256xf32, #tpu.memory_space<vmem>> -> memref<1x256x256xf32, #tpu.memory_space<vmem>>
    %69 = tpu.memref_squeeze %68 : memref<1x256x256xf32, #tpu.memory_space<vmem>> -> memref<256x256xf32, #tpu.memory_space<vmem>>
    %70 = tpu.memref_slice %arg17[%c0_i32_65] : memref<2x!tpu.dma_semaphore, #tpu.memory_space<semaphore_mem>> -> memref<1x!tpu.dma_semaphore, #tpu.memory_space<semaphore_mem>>
    %71 = tpu.memref_squeeze %70 : memref<1x!tpu.dma_semaphore, #tpu.memory_space<semaphore_mem>> -> memref<!tpu.dma_semaphore, #tpu.memory_space<semaphore_mem>>
    tpu.wait_dma2 semaphore(%71 : memref<!tpu.dma_semaphore, #tpu.memory_space<semaphore_mem>>) src(%67 : memref<256x256xf32, #tpu.memory_space<any>>) dst(%69 : memref<256x256xf32, #tpu.memory_space<vmem>>)
    %c1_i32 = arith.constant 1 : i32
    %c1_i32_70 = arith.constant 1 : i32
    %c1_i32_71 = arith.constant 1 : i32
    %c0_i32_72 = arith.constant 0 : i32
    %c0_i32_73 = arith.constant 0 : i32
    %72 = tpu.memref_slice %arg2[%c1_i32, %c0_i32_72, %c0_i32_73] : memref<6x256x256xf32, #tpu.memory_space<any>> -> memref<1x256x256xf32, #tpu.memory_space<any>>
    %73 = tpu.memref_squeeze %72 : memref<1x256x256xf32, #tpu.memory_space<any>> -> memref<256x256xf32, #tpu.memory_space<any>>
    %c0_i32_74 = arith.constant 0 : i32
    %c0_i32_75 = arith.constant 0 : i32
    %74 = tpu.memref_slice %arg15[%c1_i32_70, %c0_i32_74, %c0_i32_75] : memref<2x256x256xf32, #tpu.memory_space<vmem>> -> memref<1x256x256xf32, #tpu.memory_space<vmem>>
    %75 = tpu.memref_squeeze %74 : memref<1x256x256xf32, #tpu.memory_space<vmem>> -> memref<256x256xf32, #tpu.memory_space<vmem>>
    %76 = tpu.memref_slice %arg17[%c1_i32_71] : memref<2x!tpu.dma_semaphore, #tpu.memory_space<semaphore_mem>> -> memref<1x!tpu.dma_semaphore, #tpu.memory_space<semaphore_mem>>
    %77 = tpu.memref_squeeze %76 : memref<1x!tpu.dma_semaphore, #tpu.memory_space<semaphore_mem>> -> memref<!tpu.dma_semaphore, #tpu.memory_space<semaphore_mem>>
    tpu.enqueue_dma source(%73 : memref<256x256xf32, #tpu.memory_space<any>>) target(%75 : memref<256x256xf32, #tpu.memory_space<vmem>>) target_semaphore(%77 : memref<!tpu.dma_semaphore, #tpu.memory_space<semaphore_mem>>)
    %c0_76 = arith.constant 0 : index
    %c0_77 = arith.constant 0 : index
    %c0_78 = arith.constant 0 : index
    %78 = vector.load %arg15[%c0_76, %c0_77, %c0_78] : memref<2x256x256xf32, #tpu.memory_space<vmem>>, vector<1x256x256xf32>
    %79 = vector.shape_cast %78 : vector<1x256x256xf32> to vector<256x256xf32>
    %cst_79 = arith.constant dense<0.000000e+00> : vector<8x256xf32>
    %80 = tpu.matmul %65, %79, %cst_79 {dimension_numbers = #tpu.dot_dimension_numbers<[1], [0], [0], [1], [0, 0, 1, 1], [], []>} : vector<8x256xf32>, vector<256x256xf32>, vector<8x256xf32> -> vector<8x256xf32>
    %c0_80 = arith.constant 0 : index
    %c0_81 = arith.constant 0 : index
    %c0_82 = arith.constant 0 : index
    %81 = vector.load %arg3[%c0_80, %c0_81, %c0_82] : memref<6x1x256xf32, #tpu.memory_space<vmem>>, vector<1x1x256xf32>
    %82 = vector.shape_cast %81 : vector<1x1x256xf32> to vector<1x256xf32>
    %83 = vector.broadcast %82 : vector<1x256xf32> to vector<8x256xf32>
    %84 = arith.addf %80, %83 : vector<8x256xf32>
    %cst_83 = arith.constant 0.000000e+00 : f32
    %85 = vector.broadcast %cst_83 : f32 to vector<8x256xf32>
    %86 = arith.maximumf %84, %85 : vector<8x256xf32>
    %c1_i32_84 = arith.constant 1 : i32
    %c1_i32_85 = arith.constant 1 : i32
    %c1_i32_86 = arith.constant 1 : i32
    %c0_i32_87 = arith.constant 0 : i32
    %c0_i32_88 = arith.constant 0 : i32
    %87 = tpu.memref_slice %arg2[%c1_i32_84, %c0_i32_87, %c0_i32_88] : memref<6x256x256xf32, #tpu.memory_space<any>> -> memref<1x256x256xf32, #tpu.memory_space<any>>
    %88 = tpu.memref_squeeze %87 : memref<1x256x256xf32, #tpu.memory_space<any>> -> memref<256x256xf32, #tpu.memory_space<any>>
    %c0_i32_89 = arith.constant 0 : i32
    %c0_i32_90 = arith.constant 0 : i32
    %89 = tpu.memref_slice %arg15[%c1_i32_85, %c0_i32_89, %c0_i32_90] : memref<2x256x256xf32, #tpu.memory_space<vmem>> -> memref<1x256x256xf32, #tpu.memory_space<vmem>>
    %90 = tpu.memref_squeeze %89 : memref<1x256x256xf32, #tpu.memory_space<vmem>> -> memref<256x256xf32, #tpu.memory_space<vmem>>
    %91 = tpu.memref_slice %arg17[%c1_i32_86] : memref<2x!tpu.dma_semaphore, #tpu.memory_space<semaphore_mem>> -> memref<1x!tpu.dma_semaphore, #tpu.memory_space<semaphore_mem>>
    %92 = tpu.memref_squeeze %91 : memref<1x!tpu.dma_semaphore, #tpu.memory_space<semaphore_mem>> -> memref<!tpu.dma_semaphore, #tpu.memory_space<semaphore_mem>>
    tpu.wait_dma2 semaphore(%92 : memref<!tpu.dma_semaphore, #tpu.memory_space<semaphore_mem>>) src(%88 : memref<256x256xf32, #tpu.memory_space<any>>) dst(%90 : memref<256x256xf32, #tpu.memory_space<vmem>>)
    %c2_i32 = arith.constant 2 : i32
    %c0_i32_91 = arith.constant 0 : i32
    %c0_i32_92 = arith.constant 0 : i32
    %c0_i32_93 = arith.constant 0 : i32
    %c0_i32_94 = arith.constant 0 : i32
    %93 = tpu.memref_slice %arg2[%c2_i32, %c0_i32_93, %c0_i32_94] : memref<6x256x256xf32, #tpu.memory_space<any>> -> memref<1x256x256xf32, #tpu.memory_space<any>>
    %94 = tpu.memref_squeeze %93 : memref<1x256x256xf32, #tpu.memory_space<any>> -> memref<256x256xf32, #tpu.memory_space<any>>
    %c0_i32_95 = arith.constant 0 : i32
    %c0_i32_96 = arith.constant 0 : i32
    %95 = tpu.memref_slice %arg15[%c0_i32_91, %c0_i32_95, %c0_i32_96] : memref<2x256x256xf32, #tpu.memory_space<vmem>> -> memref<1x256x256xf32, #tpu.memory_space<vmem>>
    %96 = tpu.memref_squeeze %95 : memref<1x256x256xf32, #tpu.memory_space<vmem>> -> memref<256x256xf32, #tpu.memory_space<vmem>>
    %97 = tpu.memref_slice %arg17[%c0_i32_92] : memref<2x!tpu.dma_semaphore, #tpu.memory_space<semaphore_mem>> -> memref<1x!tpu.dma_semaphore, #tpu.memory_space<semaphore_mem>>
    %98 = tpu.memref_squeeze %97 : memref<1x!tpu.dma_semaphore, #tpu.memory_space<semaphore_mem>> -> memref<!tpu.dma_semaphore, #tpu.memory_space<semaphore_mem>>
    tpu.enqueue_dma source(%94 : memref<256x256xf32, #tpu.memory_space<any>>) target(%96 : memref<256x256xf32, #tpu.memory_space<vmem>>) target_semaphore(%98 : memref<!tpu.dma_semaphore, #tpu.memory_space<semaphore_mem>>)
    %c1_97 = arith.constant 1 : index
    %c0_98 = arith.constant 0 : index
    %c0_99 = arith.constant 0 : index
    %99 = vector.load %arg15[%c1_97, %c0_98, %c0_99] : memref<2x256x256xf32, #tpu.memory_space<vmem>>, vector<1x256x256xf32>
    %100 = vector.shape_cast %99 : vector<1x256x256xf32> to vector<256x256xf32>
    %cst_100 = arith.constant dense<0.000000e+00> : vector<8x256xf32>
    %101 = tpu.matmul %86, %100, %cst_100 {dimension_numbers = #tpu.dot_dimension_numbers<[1], [0], [0], [1], [0, 0, 1, 1], [], []>} : vector<8x256xf32>, vector<256x256xf32>, vector<8x256xf32> -> vector<8x256xf32>
    %c1_101 = arith.constant 1 : index
    %c0_102 = arith.constant 0 : index
    %c0_103 = arith.constant 0 : index
    %102 = vector.load %arg3[%c1_101, %c0_102, %c0_103] : memref<6x1x256xf32, #tpu.memory_space<vmem>>, vector<1x1x256xf32>
    %103 = vector.shape_cast %102 : vector<1x1x256xf32> to vector<1x256xf32>
    %104 = vector.broadcast %103 : vector<1x256xf32> to vector<8x256xf32>
    %105 = arith.addf %101, %104 : vector<8x256xf32>
    %cst_104 = arith.constant 0.000000e+00 : f32
    %106 = vector.broadcast %cst_104 : f32 to vector<8x256xf32>
    %107 = arith.maximumf %105, %106 : vector<8x256xf32>
    %c2_i32_105 = arith.constant 2 : i32
    %c0_i32_106 = arith.constant 0 : i32
    %c0_i32_107 = arith.constant 0 : i32
    %c0_i32_108 = arith.constant 0 : i32
    %c0_i32_109 = arith.constant 0 : i32
    %108 = tpu.memref_slice %arg2[%c2_i32_105, %c0_i32_108, %c0_i32_109] : memref<6x256x256xf32, #tpu.memory_space<any>> -> memref<1x256x256xf32, #tpu.memory_space<any>>
    %109 = tpu.memref_squeeze %108 : memref<1x256x256xf32, #tpu.memory_space<any>> -> memref<256x256xf32, #tpu.memory_space<any>>
    %c0_i32_110 = arith.constant 0 : i32
    %c0_i32_111 = arith.constant 0 : i32
    %110 = tpu.memref_slice %arg15[%c0_i32_106, %c0_i32_110, %c0_i32_111] : memref<2x256x256xf32, #tpu.memory_space<vmem>> -> memref<1x256x256xf32, #tpu.memory_space<vmem>>
    %111 = tpu.memref_squeeze %110 : memref<1x256x256xf32, #tpu.memory_space<vmem>> -> memref<256x256xf32, #tpu.memory_space<vmem>>
    %112 = tpu.memref_slice %arg17[%c0_i32_107] : memref<2x!tpu.dma_semaphore, #tpu.memory_space<semaphore_mem>> -> memref<1x!tpu.dma_semaphore, #tpu.memory_space<semaphore_mem>>
    %113 = tpu.memref_squeeze %112 : memref<1x!tpu.dma_semaphore, #tpu.memory_space<semaphore_mem>> -> memref<!tpu.dma_semaphore, #tpu.memory_space<semaphore_mem>>
    tpu.wait_dma2 semaphore(%113 : memref<!tpu.dma_semaphore, #tpu.memory_space<semaphore_mem>>) src(%109 : memref<256x256xf32, #tpu.memory_space<any>>) dst(%111 : memref<256x256xf32, #tpu.memory_space<vmem>>)
    %c3_i32 = arith.constant 3 : i32
    %c1_i32_112 = arith.constant 1 : i32
    %c1_i32_113 = arith.constant 1 : i32
    %c0_i32_114 = arith.constant 0 : i32
    %c0_i32_115 = arith.constant 0 : i32
    %114 = tpu.memref_slice %arg2[%c3_i32, %c0_i32_114, %c0_i32_115] : memref<6x256x256xf32, #tpu.memory_space<any>> -> memref<1x256x256xf32, #tpu.memory_space<any>>
    %115 = tpu.memref_squeeze %114 : memref<1x256x256xf32, #tpu.memory_space<any>> -> memref<256x256xf32, #tpu.memory_space<any>>
    %c0_i32_116 = arith.constant 0 : i32
    %c0_i32_117 = arith.constant 0 : i32
    %116 = tpu.memref_slice %arg15[%c1_i32_112, %c0_i32_116, %c0_i32_117] : memref<2x256x256xf32, #tpu.memory_space<vmem>> -> memref<1x256x256xf32, #tpu.memory_space<vmem>>
    %117 = tpu.memref_squeeze %116 : memref<1x256x256xf32, #tpu.memory_space<vmem>> -> memref<256x256xf32, #tpu.memory_space<vmem>>
    %118 = tpu.memref_slice %arg17[%c1_i32_113] : memref<2x!tpu.dma_semaphore, #tpu.memory_space<semaphore_mem>> -> memref<1x!tpu.dma_semaphore, #tpu.memory_space<semaphore_mem>>
    %119 = tpu.memref_squeeze %118 : memref<1x!tpu.dma_semaphore, #tpu.memory_space<semaphore_mem>> -> memref<!tpu.dma_semaphore, #tpu.memory_space<semaphore_mem>>
    tpu.enqueue_dma source(%115 : memref<256x256xf32, #tpu.memory_space<any>>) target(%117 : memref<256x256xf32, #tpu.memory_space<vmem>>) target_semaphore(%119 : memref<!tpu.dma_semaphore, #tpu.memory_space<semaphore_mem>>)
    %c0_118 = arith.constant 0 : index
    %c0_119 = arith.constant 0 : index
    %c0_120 = arith.constant 0 : index
    %120 = vector.load %arg15[%c0_118, %c0_119, %c0_120] : memref<2x256x256xf32, #tpu.memory_space<vmem>>, vector<1x256x256xf32>
    %121 = vector.shape_cast %120 : vector<1x256x256xf32> to vector<256x256xf32>
    %cst_121 = arith.constant dense<0.000000e+00> : vector<8x256xf32>
    %122 = tpu.matmul %107, %121, %cst_121 {dimension_numbers = #tpu.dot_dimension_numbers<[1], [0], [0], [1], [0, 0, 1, 1], [], []>} : vector<8x256xf32>, vector<256x256xf32>, vector<8x256xf32> -> vector<8x256xf32>
    %c2_122 = arith.constant 2 : index
    %c0_123 = arith.constant 0 : index
    %c0_124 = arith.constant 0 : index
    %123 = vector.load %arg3[%c2_122, %c0_123, %c0_124] : memref<6x1x256xf32, #tpu.memory_space<vmem>>, vector<1x1x256xf32>
    %124 = vector.shape_cast %123 : vector<1x1x256xf32> to vector<1x256xf32>
    %125 = vector.broadcast %124 : vector<1x256xf32> to vector<8x256xf32>
    %126 = arith.addf %122, %125 : vector<8x256xf32>
    %cst_125 = arith.constant 0.000000e+00 : f32
    %127 = vector.broadcast %cst_125 : f32 to vector<8x256xf32>
    %128 = arith.maximumf %126, %127 : vector<8x256xf32>
    %c3_i32_126 = arith.constant 3 : i32
    %c1_i32_127 = arith.constant 1 : i32
    %c1_i32_128 = arith.constant 1 : i32
    %c0_i32_129 = arith.constant 0 : i32
    %c0_i32_130 = arith.constant 0 : i32
    %129 = tpu.memref_slice %arg2[%c3_i32_126, %c0_i32_129, %c0_i32_130] : memref<6x256x256xf32, #tpu.memory_space<any>> -> memref<1x256x256xf32, #tpu.memory_space<any>>
    %130 = tpu.memref_squeeze %129 : memref<1x256x256xf32, #tpu.memory_space<any>> -> memref<256x256xf32, #tpu.memory_space<any>>
    %c0_i32_131 = arith.constant 0 : i32
    %c0_i32_132 = arith.constant 0 : i32
    %131 = tpu.memref_slice %arg15[%c1_i32_127, %c0_i32_131, %c0_i32_132] : memref<2x256x256xf32, #tpu.memory_space<vmem>> -> memref<1x256x256xf32, #tpu.memory_space<vmem>>
    %132 = tpu.memref_squeeze %131 : memref<1x256x256xf32, #tpu.memory_space<vmem>> -> memref<256x256xf32, #tpu.memory_space<vmem>>
    %133 = tpu.memref_slice %arg17[%c1_i32_128] : memref<2x!tpu.dma_semaphore, #tpu.memory_space<semaphore_mem>> -> memref<1x!tpu.dma_semaphore, #tpu.memory_space<semaphore_mem>>
    %134 = tpu.memref_squeeze %133 : memref<1x!tpu.dma_semaphore, #tpu.memory_space<semaphore_mem>> -> memref<!tpu.dma_semaphore, #tpu.memory_space<semaphore_mem>>
    tpu.wait_dma2 semaphore(%134 : memref<!tpu.dma_semaphore, #tpu.memory_space<semaphore_mem>>) src(%130 : memref<256x256xf32, #tpu.memory_space<any>>) dst(%132 : memref<256x256xf32, #tpu.memory_space<vmem>>)
    %c4_i32 = arith.constant 4 : i32
    %c0_i32_133 = arith.constant 0 : i32
    %c0_i32_134 = arith.constant 0 : i32
    %c0_i32_135 = arith.constant 0 : i32
    %c0_i32_136 = arith.constant 0 : i32
    %135 = tpu.memref_slice %arg2[%c4_i32, %c0_i32_135, %c0_i32_136] : memref<6x256x256xf32, #tpu.memory_space<any>> -> memref<1x256x256xf32, #tpu.memory_space<any>>
    %136 = tpu.memref_squeeze %135 : memref<1x256x256xf32, #tpu.memory_space<any>> -> memref<256x256xf32, #tpu.memory_space<any>>
    %c0_i32_137 = arith.constant 0 : i32
    %c0_i32_138 = arith.constant 0 : i32
    %137 = tpu.memref_slice %arg15[%c0_i32_133, %c0_i32_137, %c0_i32_138] : memref<2x256x256xf32, #tpu.memory_space<vmem>> -> memref<1x256x256xf32, #tpu.memory_space<vmem>>
    %138 = tpu.memref_squeeze %137 : memref<1x256x256xf32, #tpu.memory_space<vmem>> -> memref<256x256xf32, #tpu.memory_space<vmem>>
    %139 = tpu.memref_slice %arg17[%c0_i32_134] : memref<2x!tpu.dma_semaphore, #tpu.memory_space<semaphore_mem>> -> memref<1x!tpu.dma_semaphore, #tpu.memory_space<semaphore_mem>>
    %140 = tpu.memref_squeeze %139 : memref<1x!tpu.dma_semaphore, #tpu.memory_space<semaphore_mem>> -> memref<!tpu.dma_semaphore, #tpu.memory_space<semaphore_mem>>
    tpu.enqueue_dma source(%136 : memref<256x256xf32, #tpu.memory_space<any>>) target(%138 : memref<256x256xf32, #tpu.memory_space<vmem>>) target_semaphore(%140 : memref<!tpu.dma_semaphore, #tpu.memory_space<semaphore_mem>>)
    %c1_139 = arith.constant 1 : index
    %c0_140 = arith.constant 0 : index
    %c0_141 = arith.constant 0 : index
    %141 = vector.load %arg15[%c1_139, %c0_140, %c0_141] : memref<2x256x256xf32, #tpu.memory_space<vmem>>, vector<1x256x256xf32>
    %142 = vector.shape_cast %141 : vector<1x256x256xf32> to vector<256x256xf32>
    %cst_142 = arith.constant dense<0.000000e+00> : vector<8x256xf32>
    %143 = tpu.matmul %128, %142, %cst_142 {dimension_numbers = #tpu.dot_dimension_numbers<[1], [0], [0], [1], [0, 0, 1, 1], [], []>} : vector<8x256xf32>, vector<256x256xf32>, vector<8x256xf32> -> vector<8x256xf32>
    %c3 = arith.constant 3 : index
    %c0_143 = arith.constant 0 : index
    %c0_144 = arith.constant 0 : index
    %144 = vector.load %arg3[%c3, %c0_143, %c0_144] : memref<6x1x256xf32, #tpu.memory_space<vmem>>, vector<1x1x256xf32>
    %145 = vector.shape_cast %144 : vector<1x1x256xf32> to vector<1x256xf32>
    %146 = vector.broadcast %145 : vector<1x256xf32> to vector<8x256xf32>
    %147 = arith.addf %143, %146 : vector<8x256xf32>
    %cst_145 = arith.constant 0.000000e+00 : f32
    %148 = vector.broadcast %cst_145 : f32 to vector<8x256xf32>
    %149 = arith.maximumf %147, %148 : vector<8x256xf32>
    %c4_i32_146 = arith.constant 4 : i32
    %c0_i32_147 = arith.constant 0 : i32
    %c0_i32_148 = arith.constant 0 : i32
    %c0_i32_149 = arith.constant 0 : i32
    %c0_i32_150 = arith.constant 0 : i32
    %150 = tpu.memref_slice %arg2[%c4_i32_146, %c0_i32_149, %c0_i32_150] : memref<6x256x256xf32, #tpu.memory_space<any>> -> memref<1x256x256xf32, #tpu.memory_space<any>>
    %151 = tpu.memref_squeeze %150 : memref<1x256x256xf32, #tpu.memory_space<any>> -> memref<256x256xf32, #tpu.memory_space<any>>
    %c0_i32_151 = arith.constant 0 : i32
    %c0_i32_152 = arith.constant 0 : i32
    %152 = tpu.memref_slice %arg15[%c0_i32_147, %c0_i32_151, %c0_i32_152] : memref<2x256x256xf32, #tpu.memory_space<vmem>> -> memref<1x256x256xf32, #tpu.memory_space<vmem>>
    %153 = tpu.memref_squeeze %152 : memref<1x256x256xf32, #tpu.memory_space<vmem>> -> memref<256x256xf32, #tpu.memory_space<vmem>>
    %154 = tpu.memref_slice %arg17[%c0_i32_148] : memref<2x!tpu.dma_semaphore, #tpu.memory_space<semaphore_mem>> -> memref<1x!tpu.dma_semaphore, #tpu.memory_space<semaphore_mem>>
    %155 = tpu.memref_squeeze %154 : memref<1x!tpu.dma_semaphore, #tpu.memory_space<semaphore_mem>> -> memref<!tpu.dma_semaphore, #tpu.memory_space<semaphore_mem>>
    tpu.wait_dma2 semaphore(%155 : memref<!tpu.dma_semaphore, #tpu.memory_space<semaphore_mem>>) src(%151 : memref<256x256xf32, #tpu.memory_space<any>>) dst(%153 : memref<256x256xf32, #tpu.memory_space<vmem>>)
    %c5_i32 = arith.constant 5 : i32
    %c1_i32_153 = arith.constant 1 : i32
    %c1_i32_154 = arith.constant 1 : i32
    %c0_i32_155 = arith.constant 0 : i32
    %c0_i32_156 = arith.constant 0 : i32
    %156 = tpu.memref_slice %arg2[%c5_i32, %c0_i32_155, %c0_i32_156] : memref<6x256x256xf32, #tpu.memory_space<any>> -> memref<1x256x256xf32, #tpu.memory_space<any>>
    %157 = tpu.memref_squeeze %156 : memref<1x256x256xf32, #tpu.memory_space<any>> -> memref<256x256xf32, #tpu.memory_space<any>>
    %c0_i32_157 = arith.constant 0 : i32
    %c0_i32_158 = arith.constant 0 : i32
    %158 = tpu.memref_slice %arg15[%c1_i32_153, %c0_i32_157, %c0_i32_158] : memref<2x256x256xf32, #tpu.memory_space<vmem>> -> memref<1x256x256xf32, #tpu.memory_space<vmem>>
    %159 = tpu.memref_squeeze %158 : memref<1x256x256xf32, #tpu.memory_space<vmem>> -> memref<256x256xf32, #tpu.memory_space<vmem>>
    %160 = tpu.memref_slice %arg17[%c1_i32_154] : memref<2x!tpu.dma_semaphore, #tpu.memory_space<semaphore_mem>> -> memref<1x!tpu.dma_semaphore, #tpu.memory_space<semaphore_mem>>
    %161 = tpu.memref_squeeze %160 : memref<1x!tpu.dma_semaphore, #tpu.memory_space<semaphore_mem>> -> memref<!tpu.dma_semaphore, #tpu.memory_space<semaphore_mem>>
    tpu.enqueue_dma source(%157 : memref<256x256xf32, #tpu.memory_space<any>>) target(%159 : memref<256x256xf32, #tpu.memory_space<vmem>>) target_semaphore(%161 : memref<!tpu.dma_semaphore, #tpu.memory_space<semaphore_mem>>)
    %c0_159 = arith.constant 0 : index
    %c0_160 = arith.constant 0 : index
    %c0_161 = arith.constant 0 : index
    %162 = vector.load %arg15[%c0_159, %c0_160, %c0_161] : memref<2x256x256xf32, #tpu.memory_space<vmem>>, vector<1x256x256xf32>
    %163 = vector.shape_cast %162 : vector<1x256x256xf32> to vector<256x256xf32>
    %cst_162 = arith.constant dense<0.000000e+00> : vector<8x256xf32>
    %164 = tpu.matmul %149, %163, %cst_162 {dimension_numbers = #tpu.dot_dimension_numbers<[1], [0], [0], [1], [0, 0, 1, 1], [], []>} : vector<8x256xf32>, vector<256x256xf32>, vector<8x256xf32> -> vector<8x256xf32>
    %c4 = arith.constant 4 : index
    %c0_163 = arith.constant 0 : index
    %c0_164 = arith.constant 0 : index
    %165 = vector.load %arg3[%c4, %c0_163, %c0_164] : memref<6x1x256xf32, #tpu.memory_space<vmem>>, vector<1x1x256xf32>
    %166 = vector.shape_cast %165 : vector<1x1x256xf32> to vector<1x256xf32>
    %167 = vector.broadcast %166 : vector<1x256xf32> to vector<8x256xf32>
    %168 = arith.addf %164, %167 : vector<8x256xf32>
    %cst_165 = arith.constant 0.000000e+00 : f32
    %169 = vector.broadcast %cst_165 : f32 to vector<8x256xf32>
    %170 = arith.maximumf %168, %169 : vector<8x256xf32>
    %c5_i32_166 = arith.constant 5 : i32
    %c1_i32_167 = arith.constant 1 : i32
    %c1_i32_168 = arith.constant 1 : i32
    %c0_i32_169 = arith.constant 0 : i32
    %c0_i32_170 = arith.constant 0 : i32
    %171 = tpu.memref_slice %arg2[%c5_i32_166, %c0_i32_169, %c0_i32_170] : memref<6x256x256xf32, #tpu.memory_space<any>> -> memref<1x256x256xf32, #tpu.memory_space<any>>
    %172 = tpu.memref_squeeze %171 : memref<1x256x256xf32, #tpu.memory_space<any>> -> memref<256x256xf32, #tpu.memory_space<any>>
    %c0_i32_171 = arith.constant 0 : i32
    %c0_i32_172 = arith.constant 0 : i32
    %173 = tpu.memref_slice %arg15[%c1_i32_167, %c0_i32_171, %c0_i32_172] : memref<2x256x256xf32, #tpu.memory_space<vmem>> -> memref<1x256x256xf32, #tpu.memory_space<vmem>>
    %174 = tpu.memref_squeeze %173 : memref<1x256x256xf32, #tpu.memory_space<vmem>> -> memref<256x256xf32, #tpu.memory_space<vmem>>
    %175 = tpu.memref_slice %arg17[%c1_i32_168] : memref<2x!tpu.dma_semaphore, #tpu.memory_space<semaphore_mem>> -> memref<1x!tpu.dma_semaphore, #tpu.memory_space<semaphore_mem>>
    %176 = tpu.memref_squeeze %175 : memref<1x!tpu.dma_semaphore, #tpu.memory_space<semaphore_mem>> -> memref<!tpu.dma_semaphore, #tpu.memory_space<semaphore_mem>>
    tpu.wait_dma2 semaphore(%176 : memref<!tpu.dma_semaphore, #tpu.memory_space<semaphore_mem>>) src(%172 : memref<256x256xf32, #tpu.memory_space<any>>) dst(%174 : memref<256x256xf32, #tpu.memory_space<vmem>>)
    %c1_173 = arith.constant 1 : index
    %c0_174 = arith.constant 0 : index
    %c0_175 = arith.constant 0 : index
    %177 = vector.load %arg15[%c1_173, %c0_174, %c0_175] : memref<2x256x256xf32, #tpu.memory_space<vmem>>, vector<1x256x256xf32>
    %178 = vector.shape_cast %177 : vector<1x256x256xf32> to vector<256x256xf32>
    %cst_176 = arith.constant dense<0.000000e+00> : vector<8x256xf32>
    %179 = tpu.matmul %170, %178, %cst_176 {dimension_numbers = #tpu.dot_dimension_numbers<[1], [0], [0], [1], [0, 0, 1, 1], [], []>} : vector<8x256xf32>, vector<256x256xf32>, vector<8x256xf32> -> vector<8x256xf32>
    %c5 = arith.constant 5 : index
    %c0_177 = arith.constant 0 : index
    %c0_178 = arith.constant 0 : index
    %180 = vector.load %arg3[%c5, %c0_177, %c0_178] : memref<6x1x256xf32, #tpu.memory_space<vmem>>, vector<1x1x256xf32>
    %181 = vector.shape_cast %180 : vector<1x1x256xf32> to vector<1x256xf32>
    %182 = vector.broadcast %181 : vector<1x256xf32> to vector<8x256xf32>
    %183 = arith.addf %179, %182 : vector<8x256xf32>
    %cst_179 = arith.constant 0.000000e+00 : f32
    %184 = vector.broadcast %cst_179 : f32 to vector<8x256xf32>
    %185 = arith.maximumf %183, %184 : vector<8x256xf32>
    %c0_180 = arith.constant 0 : index
    %c0_181 = arith.constant 0 : index
    %186 = vector.load %arg4[%c0_180, %c0_181] : memref<256x128xf32, #tpu.memory_space<vmem>>, vector<256x128xf32>
    %cst_182 = arith.constant dense<0.000000e+00> : vector<8x128xf32>
    %187 = tpu.matmul %185, %186, %cst_182 {dimension_numbers = #tpu.dot_dimension_numbers<[1], [0], [0], [1], [0, 0, 1, 1], [], []>} : vector<8x256xf32>, vector<256x128xf32>, vector<8x128xf32> -> vector<8x128xf32>
    %c0_183 = arith.constant 0 : index
    %c0_184 = arith.constant 0 : index
    %188 = vector.load %arg5[%c0_183, %c0_184] : memref<1x128xf32, #tpu.memory_space<vmem>>, vector<1x128xf32>
    %189 = vector.broadcast %188 : vector<1x128xf32> to vector<8x128xf32>
    %190 = arith.addf %187, %189 : vector<8x128xf32>
    %cst_185 = arith.constant 0.000000e+00 : f32
    %191 = vector.broadcast %cst_185 : f32 to vector<8x128xf32>
    %192 = arith.maximumf %190, %191 : vector<8x128xf32>
    %c0_i32_186 = arith.constant 0 : i32
    %c0_i32_187 = arith.constant 0 : i32
    %c0_i32_188 = arith.constant 0 : i32
    %c0_i32_189 = arith.constant 0 : i32
    %c0_i32_190 = arith.constant 0 : i32
    %193 = tpu.memref_slice %arg6[%c0_i32_186, %c0_i32_189, %c0_i32_190] : memref<10x128x128xf32, #tpu.memory_space<any>> -> memref<1x128x128xf32, #tpu.memory_space<any>>
    %194 = tpu.memref_squeeze %193 : memref<1x128x128xf32, #tpu.memory_space<any>> -> memref<128x128xf32, #tpu.memory_space<any>>
    %c0_i32_191 = arith.constant 0 : i32
    %c0_i32_192 = arith.constant 0 : i32
    %195 = tpu.memref_slice %arg16[%c0_i32_187, %c0_i32_191, %c0_i32_192] : memref<2x128x128xf32, #tpu.memory_space<vmem>> -> memref<1x128x128xf32, #tpu.memory_space<vmem>>
    %196 = tpu.memref_squeeze %195 : memref<1x128x128xf32, #tpu.memory_space<vmem>> -> memref<128x128xf32, #tpu.memory_space<vmem>>
    %197 = tpu.memref_slice %arg18[%c0_i32_188] : memref<2x!tpu.dma_semaphore, #tpu.memory_space<semaphore_mem>> -> memref<1x!tpu.dma_semaphore, #tpu.memory_space<semaphore_mem>>
    %198 = tpu.memref_squeeze %197 : memref<1x!tpu.dma_semaphore, #tpu.memory_space<semaphore_mem>> -> memref<!tpu.dma_semaphore, #tpu.memory_space<semaphore_mem>>
    tpu.wait_dma2 semaphore(%198 : memref<!tpu.dma_semaphore, #tpu.memory_space<semaphore_mem>>) src(%194 : memref<128x128xf32, #tpu.memory_space<any>>) dst(%196 : memref<128x128xf32, #tpu.memory_space<vmem>>)
    %c1_i32_193 = arith.constant 1 : i32
    %c1_i32_194 = arith.constant 1 : i32
    %c1_i32_195 = arith.constant 1 : i32
    %c0_i32_196 = arith.constant 0 : i32
    %c0_i32_197 = arith.constant 0 : i32
    %199 = tpu.memref_slice %arg6[%c1_i32_193, %c0_i32_196, %c0_i32_197] : memref<10x128x128xf32, #tpu.memory_space<any>> -> memref<1x128x128xf32, #tpu.memory_space<any>>
    %200 = tpu.memref_squeeze %199 : memref<1x128x128xf32, #tpu.memory_space<any>> -> memref<128x128xf32, #tpu.memory_space<any>>
    %c0_i32_198 = arith.constant 0 : i32
    %c0_i32_199 = arith.constant 0 : i32
    %201 = tpu.memref_slice %arg16[%c1_i32_194, %c0_i32_198, %c0_i32_199] : memref<2x128x128xf32, #tpu.memory_space<vmem>> -> memref<1x128x128xf32, #tpu.memory_space<vmem>>
    %202 = tpu.memref_squeeze %201 : memref<1x128x128xf32, #tpu.memory_space<vmem>> -> memref<128x128xf32, #tpu.memory_space<vmem>>
    %203 = tpu.memref_slice %arg18[%c1_i32_195] : memref<2x!tpu.dma_semaphore, #tpu.memory_space<semaphore_mem>> -> memref<1x!tpu.dma_semaphore, #tpu.memory_space<semaphore_mem>>
    %204 = tpu.memref_squeeze %203 : memref<1x!tpu.dma_semaphore, #tpu.memory_space<semaphore_mem>> -> memref<!tpu.dma_semaphore, #tpu.memory_space<semaphore_mem>>
    tpu.enqueue_dma source(%200 : memref<128x128xf32, #tpu.memory_space<any>>) target(%202 : memref<128x128xf32, #tpu.memory_space<vmem>>) target_semaphore(%204 : memref<!tpu.dma_semaphore, #tpu.memory_space<semaphore_mem>>)
    %c0_200 = arith.constant 0 : index
    %c0_201 = arith.constant 0 : index
    %c0_202 = arith.constant 0 : index
    %205 = vector.load %arg16[%c0_200, %c0_201, %c0_202] : memref<2x128x128xf32, #tpu.memory_space<vmem>>, vector<1x128x128xf32>
    %206 = vector.shape_cast %205 : vector<1x128x128xf32> to vector<128x128xf32>
    %cst_203 = arith.constant dense<0.000000e+00> : vector<8x128xf32>
    %207 = tpu.matmul %192, %206, %cst_203 {dimension_numbers = #tpu.dot_dimension_numbers<[1], [0], [0], [1], [0, 0, 1, 1], [], []>} : vector<8x128xf32>, vector<128x128xf32>, vector<8x128xf32> -> vector<8x128xf32>
    %c0_204 = arith.constant 0 : index
    %c0_205 = arith.constant 0 : index
    %c0_206 = arith.constant 0 : index
    %208 = vector.load %arg7[%c0_204, %c0_205, %c0_206] : memref<10x1x128xf32, #tpu.memory_space<vmem>>, vector<1x1x128xf32>
    %209 = vector.shape_cast %208 : vector<1x1x128xf32> to vector<1x128xf32>
    %210 = vector.broadcast %209 : vector<1x128xf32> to vector<8x128xf32>
    %211 = arith.addf %207, %210 : vector<8x128xf32>
    %cst_207 = arith.constant 0.000000e+00 : f32
    %212 = vector.broadcast %cst_207 : f32 to vector<8x128xf32>
    %213 = arith.maximumf %211, %212 : vector<8x128xf32>
    %c1_i32_208 = arith.constant 1 : i32
    %c1_i32_209 = arith.constant 1 : i32
    %c1_i32_210 = arith.constant 1 : i32
    %c0_i32_211 = arith.constant 0 : i32
    %c0_i32_212 = arith.constant 0 : i32
    %214 = tpu.memref_slice %arg6[%c1_i32_208, %c0_i32_211, %c0_i32_212] : memref<10x128x128xf32, #tpu.memory_space<any>> -> memref<1x128x128xf32, #tpu.memory_space<any>>
    %215 = tpu.memref_squeeze %214 : memref<1x128x128xf32, #tpu.memory_space<any>> -> memref<128x128xf32, #tpu.memory_space<any>>
    %c0_i32_213 = arith.constant 0 : i32
    %c0_i32_214 = arith.constant 0 : i32
    %216 = tpu.memref_slice %arg16[%c1_i32_209, %c0_i32_213, %c0_i32_214] : memref<2x128x128xf32, #tpu.memory_space<vmem>> -> memref<1x128x128xf32, #tpu.memory_space<vmem>>
    %217 = tpu.memref_squeeze %216 : memref<1x128x128xf32, #tpu.memory_space<vmem>> -> memref<128x128xf32, #tpu.memory_space<vmem>>
    %218 = tpu.memref_slice %arg18[%c1_i32_210] : memref<2x!tpu.dma_semaphore, #tpu.memory_space<semaphore_mem>> -> memref<1x!tpu.dma_semaphore, #tpu.memory_space<semaphore_mem>>
    %219 = tpu.memref_squeeze %218 : memref<1x!tpu.dma_semaphore, #tpu.memory_space<semaphore_mem>> -> memref<!tpu.dma_semaphore, #tpu.memory_space<semaphore_mem>>
    tpu.wait_dma2 semaphore(%219 : memref<!tpu.dma_semaphore, #tpu.memory_space<semaphore_mem>>) src(%215 : memref<128x128xf32, #tpu.memory_space<any>>) dst(%217 : memref<128x128xf32, #tpu.memory_space<vmem>>)
    %c2_i32_215 = arith.constant 2 : i32
    %c0_i32_216 = arith.constant 0 : i32
    %c0_i32_217 = arith.constant 0 : i32
    %c0_i32_218 = arith.constant 0 : i32
    %c0_i32_219 = arith.constant 0 : i32
    %220 = tpu.memref_slice %arg6[%c2_i32_215, %c0_i32_218, %c0_i32_219] : memref<10x128x128xf32, #tpu.memory_space<any>> -> memref<1x128x128xf32, #tpu.memory_space<any>>
    %221 = tpu.memref_squeeze %220 : memref<1x128x128xf32, #tpu.memory_space<any>> -> memref<128x128xf32, #tpu.memory_space<any>>
    %c0_i32_220 = arith.constant 0 : i32
    %c0_i32_221 = arith.constant 0 : i32
    %222 = tpu.memref_slice %arg16[%c0_i32_216, %c0_i32_220, %c0_i32_221] : memref<2x128x128xf32, #tpu.memory_space<vmem>> -> memref<1x128x128xf32, #tpu.memory_space<vmem>>
    %223 = tpu.memref_squeeze %222 : memref<1x128x128xf32, #tpu.memory_space<vmem>> -> memref<128x128xf32, #tpu.memory_space<vmem>>
    %224 = tpu.memref_slice %arg18[%c0_i32_217] : memref<2x!tpu.dma_semaphore, #tpu.memory_space<semaphore_mem>> -> memref<1x!tpu.dma_semaphore, #tpu.memory_space<semaphore_mem>>
    %225 = tpu.memref_squeeze %224 : memref<1x!tpu.dma_semaphore, #tpu.memory_space<semaphore_mem>> -> memref<!tpu.dma_semaphore, #tpu.memory_space<semaphore_mem>>
    tpu.enqueue_dma source(%221 : memref<128x128xf32, #tpu.memory_space<any>>) target(%223 : memref<128x128xf32, #tpu.memory_space<vmem>>) target_semaphore(%225 : memref<!tpu.dma_semaphore, #tpu.memory_space<semaphore_mem>>)
    %c1_222 = arith.constant 1 : index
    %c0_223 = arith.constant 0 : index
    %c0_224 = arith.constant 0 : index
    %226 = vector.load %arg16[%c1_222, %c0_223, %c0_224] : memref<2x128x128xf32, #tpu.memory_space<vmem>>, vector<1x128x128xf32>
    %227 = vector.shape_cast %226 : vector<1x128x128xf32> to vector<128x128xf32>
    %cst_225 = arith.constant dense<0.000000e+00> : vector<8x128xf32>
    %228 = tpu.matmul %213, %227, %cst_225 {dimension_numbers = #tpu.dot_dimension_numbers<[1], [0], [0], [1], [0, 0, 1, 1], [], []>} : vector<8x128xf32>, vector<128x128xf32>, vector<8x128xf32> -> vector<8x128xf32>
    %c1_226 = arith.constant 1 : index
    %c0_227 = arith.constant 0 : index
    %c0_228 = arith.constant 0 : index
    %229 = vector.load %arg7[%c1_226, %c0_227, %c0_228] : memref<10x1x128xf32, #tpu.memory_space<vmem>>, vector<1x1x128xf32>
    %230 = vector.shape_cast %229 : vector<1x1x128xf32> to vector<1x128xf32>
    %231 = vector.broadcast %230 : vector<1x128xf32> to vector<8x128xf32>
    %232 = arith.addf %228, %231 : vector<8x128xf32>
    %cst_229 = arith.constant 0.000000e+00 : f32
    %233 = vector.broadcast %cst_229 : f32 to vector<8x128xf32>
    %234 = arith.maximumf %232, %233 : vector<8x128xf32>
    %c2_i32_230 = arith.constant 2 : i32
    %c0_i32_231 = arith.constant 0 : i32
    %c0_i32_232 = arith.constant 0 : i32
    %c0_i32_233 = arith.constant 0 : i32
    %c0_i32_234 = arith.constant 0 : i32
    %235 = tpu.memref_slice %arg6[%c2_i32_230, %c0_i32_233, %c0_i32_234] : memref<10x128x128xf32, #tpu.memory_space<any>> -> memref<1x128x128xf32, #tpu.memory_space<any>>
    %236 = tpu.memref_squeeze %235 : memref<1x128x128xf32, #tpu.memory_space<any>> -> memref<128x128xf32, #tpu.memory_space<any>>
    %c0_i32_235 = arith.constant 0 : i32
    %c0_i32_236 = arith.constant 0 : i32
    %237 = tpu.memref_slice %arg16[%c0_i32_231, %c0_i32_235, %c0_i32_236] : memref<2x128x128xf32, #tpu.memory_space<vmem>> -> memref<1x128x128xf32, #tpu.memory_space<vmem>>
    %238 = tpu.memref_squeeze %237 : memref<1x128x128xf32, #tpu.memory_space<vmem>> -> memref<128x128xf32, #tpu.memory_space<vmem>>
    %239 = tpu.memref_slice %arg18[%c0_i32_232] : memref<2x!tpu.dma_semaphore, #tpu.memory_space<semaphore_mem>> -> memref<1x!tpu.dma_semaphore, #tpu.memory_space<semaphore_mem>>
    %240 = tpu.memref_squeeze %239 : memref<1x!tpu.dma_semaphore, #tpu.memory_space<semaphore_mem>> -> memref<!tpu.dma_semaphore, #tpu.memory_space<semaphore_mem>>
    tpu.wait_dma2 semaphore(%240 : memref<!tpu.dma_semaphore, #tpu.memory_space<semaphore_mem>>) src(%236 : memref<128x128xf32, #tpu.memory_space<any>>) dst(%238 : memref<128x128xf32, #tpu.memory_space<vmem>>)
    %c3_i32_237 = arith.constant 3 : i32
    %c1_i32_238 = arith.constant 1 : i32
    %c1_i32_239 = arith.constant 1 : i32
    %c0_i32_240 = arith.constant 0 : i32
    %c0_i32_241 = arith.constant 0 : i32
    %241 = tpu.memref_slice %arg6[%c3_i32_237, %c0_i32_240, %c0_i32_241] : memref<10x128x128xf32, #tpu.memory_space<any>> -> memref<1x128x128xf32, #tpu.memory_space<any>>
    %242 = tpu.memref_squeeze %241 : memref<1x128x128xf32, #tpu.memory_space<any>> -> memref<128x128xf32, #tpu.memory_space<any>>
    %c0_i32_242 = arith.constant 0 : i32
    %c0_i32_243 = arith.constant 0 : i32
    %243 = tpu.memref_slice %arg16[%c1_i32_238, %c0_i32_242, %c0_i32_243] : memref<2x128x128xf32, #tpu.memory_space<vmem>> -> memref<1x128x128xf32, #tpu.memory_space<vmem>>
    %244 = tpu.memref_squeeze %243 : memref<1x128x128xf32, #tpu.memory_space<vmem>> -> memref<128x128xf32, #tpu.memory_space<vmem>>
    %245 = tpu.memref_slice %arg18[%c1_i32_239] : memref<2x!tpu.dma_semaphore, #tpu.memory_space<semaphore_mem>> -> memref<1x!tpu.dma_semaphore, #tpu.memory_space<semaphore_mem>>
    %246 = tpu.memref_squeeze %245 : memref<1x!tpu.dma_semaphore, #tpu.memory_space<semaphore_mem>> -> memref<!tpu.dma_semaphore, #tpu.memory_space<semaphore_mem>>
    tpu.enqueue_dma source(%242 : memref<128x128xf32, #tpu.memory_space<any>>) target(%244 : memref<128x128xf32, #tpu.memory_space<vmem>>) target_semaphore(%246 : memref<!tpu.dma_semaphore, #tpu.memory_space<semaphore_mem>>)
    %c0_244 = arith.constant 0 : index
    %c0_245 = arith.constant 0 : index
    %c0_246 = arith.constant 0 : index
    %247 = vector.load %arg16[%c0_244, %c0_245, %c0_246] : memref<2x128x128xf32, #tpu.memory_space<vmem>>, vector<1x128x128xf32>
    %248 = vector.shape_cast %247 : vector<1x128x128xf32> to vector<128x128xf32>
    %cst_247 = arith.constant dense<0.000000e+00> : vector<8x128xf32>
    %249 = tpu.matmul %234, %248, %cst_247 {dimension_numbers = #tpu.dot_dimension_numbers<[1], [0], [0], [1], [0, 0, 1, 1], [], []>} : vector<8x128xf32>, vector<128x128xf32>, vector<8x128xf32> -> vector<8x128xf32>
    %c2_248 = arith.constant 2 : index
    %c0_249 = arith.constant 0 : index
    %c0_250 = arith.constant 0 : index
    %250 = vector.load %arg7[%c2_248, %c0_249, %c0_250] : memref<10x1x128xf32, #tpu.memory_space<vmem>>, vector<1x1x128xf32>
    %251 = vector.shape_cast %250 : vector<1x1x128xf32> to vector<1x128xf32>
    %252 = vector.broadcast %251 : vector<1x128xf32> to vector<8x128xf32>
    %253 = arith.addf %249, %252 : vector<8x128xf32>
    %cst_251 = arith.constant 0.000000e+00 : f32
    %254 = vector.broadcast %cst_251 : f32 to vector<8x128xf32>
    %255 = arith.maximumf %253, %254 : vector<8x128xf32>
    %c3_i32_252 = arith.constant 3 : i32
    %c1_i32_253 = arith.constant 1 : i32
    %c1_i32_254 = arith.constant 1 : i32
    %c0_i32_255 = arith.constant 0 : i32
    %c0_i32_256 = arith.constant 0 : i32
    %256 = tpu.memref_slice %arg6[%c3_i32_252, %c0_i32_255, %c0_i32_256] : memref<10x128x128xf32, #tpu.memory_space<any>> -> memref<1x128x128xf32, #tpu.memory_space<any>>
    %257 = tpu.memref_squeeze %256 : memref<1x128x128xf32, #tpu.memory_space<any>> -> memref<128x128xf32, #tpu.memory_space<any>>
    %c0_i32_257 = arith.constant 0 : i32
    %c0_i32_258 = arith.constant 0 : i32
    %258 = tpu.memref_slice %arg16[%c1_i32_253, %c0_i32_257, %c0_i32_258] : memref<2x128x128xf32, #tpu.memory_space<vmem>> -> memref<1x128x128xf32, #tpu.memory_space<vmem>>
    %259 = tpu.memref_squeeze %258 : memref<1x128x128xf32, #tpu.memory_space<vmem>> -> memref<128x128xf32, #tpu.memory_space<vmem>>
    %260 = tpu.memref_slice %arg18[%c1_i32_254] : memref<2x!tpu.dma_semaphore, #tpu.memory_space<semaphore_mem>> -> memref<1x!tpu.dma_semaphore, #tpu.memory_space<semaphore_mem>>
    %261 = tpu.memref_squeeze %260 : memref<1x!tpu.dma_semaphore, #tpu.memory_space<semaphore_mem>> -> memref<!tpu.dma_semaphore, #tpu.memory_space<semaphore_mem>>
    tpu.wait_dma2 semaphore(%261 : memref<!tpu.dma_semaphore, #tpu.memory_space<semaphore_mem>>) src(%257 : memref<128x128xf32, #tpu.memory_space<any>>) dst(%259 : memref<128x128xf32, #tpu.memory_space<vmem>>)
    %c4_i32_259 = arith.constant 4 : i32
    %c0_i32_260 = arith.constant 0 : i32
    %c0_i32_261 = arith.constant 0 : i32
    %c0_i32_262 = arith.constant 0 : i32
    %c0_i32_263 = arith.constant 0 : i32
    %262 = tpu.memref_slice %arg6[%c4_i32_259, %c0_i32_262, %c0_i32_263] : memref<10x128x128xf32, #tpu.memory_space<any>> -> memref<1x128x128xf32, #tpu.memory_space<any>>
    %263 = tpu.memref_squeeze %262 : memref<1x128x128xf32, #tpu.memory_space<any>> -> memref<128x128xf32, #tpu.memory_space<any>>
    %c0_i32_264 = arith.constant 0 : i32
    %c0_i32_265 = arith.constant 0 : i32
    %264 = tpu.memref_slice %arg16[%c0_i32_260, %c0_i32_264, %c0_i32_265] : memref<2x128x128xf32, #tpu.memory_space<vmem>> -> memref<1x128x128xf32, #tpu.memory_space<vmem>>
    %265 = tpu.memref_squeeze %264 : memref<1x128x128xf32, #tpu.memory_space<vmem>> -> memref<128x128xf32, #tpu.memory_space<vmem>>
    %266 = tpu.memref_slice %arg18[%c0_i32_261] : memref<2x!tpu.dma_semaphore, #tpu.memory_space<semaphore_mem>> -> memref<1x!tpu.dma_semaphore, #tpu.memory_space<semaphore_mem>>
    %267 = tpu.memref_squeeze %266 : memref<1x!tpu.dma_semaphore, #tpu.memory_space<semaphore_mem>> -> memref<!tpu.dma_semaphore, #tpu.memory_space<semaphore_mem>>
    tpu.enqueue_dma source(%263 : memref<128x128xf32, #tpu.memory_space<any>>) target(%265 : memref<128x128xf32, #tpu.memory_space<vmem>>) target_semaphore(%267 : memref<!tpu.dma_semaphore, #tpu.memory_space<semaphore_mem>>)
    %c1_266 = arith.constant 1 : index
    %c0_267 = arith.constant 0 : index
    %c0_268 = arith.constant 0 : index
    %268 = vector.load %arg16[%c1_266, %c0_267, %c0_268] : memref<2x128x128xf32, #tpu.memory_space<vmem>>, vector<1x128x128xf32>
    %269 = vector.shape_cast %268 : vector<1x128x128xf32> to vector<128x128xf32>
    %cst_269 = arith.constant dense<0.000000e+00> : vector<8x128xf32>
    %270 = tpu.matmul %255, %269, %cst_269 {dimension_numbers = #tpu.dot_dimension_numbers<[1], [0], [0], [1], [0, 0, 1, 1], [], []>} : vector<8x128xf32>, vector<128x128xf32>, vector<8x128xf32> -> vector<8x128xf32>
    %c3_270 = arith.constant 3 : index
    %c0_271 = arith.constant 0 : index
    %c0_272 = arith.constant 0 : index
    %271 = vector.load %arg7[%c3_270, %c0_271, %c0_272] : memref<10x1x128xf32, #tpu.memory_space<vmem>>, vector<1x1x128xf32>
    %272 = vector.shape_cast %271 : vector<1x1x128xf32> to vector<1x128xf32>
    %273 = vector.broadcast %272 : vector<1x128xf32> to vector<8x128xf32>
    %274 = arith.addf %270, %273 : vector<8x128xf32>
    %cst_273 = arith.constant 0.000000e+00 : f32
    %275 = vector.broadcast %cst_273 : f32 to vector<8x128xf32>
    %276 = arith.maximumf %274, %275 : vector<8x128xf32>
    %c4_i32_274 = arith.constant 4 : i32
    %c0_i32_275 = arith.constant 0 : i32
    %c0_i32_276 = arith.constant 0 : i32
    %c0_i32_277 = arith.constant 0 : i32
    %c0_i32_278 = arith.constant 0 : i32
    %277 = tpu.memref_slice %arg6[%c4_i32_274, %c0_i32_277, %c0_i32_278] : memref<10x128x128xf32, #tpu.memory_space<any>> -> memref<1x128x128xf32, #tpu.memory_space<any>>
    %278 = tpu.memref_squeeze %277 : memref<1x128x128xf32, #tpu.memory_space<any>> -> memref<128x128xf32, #tpu.memory_space<any>>
    %c0_i32_279 = arith.constant 0 : i32
    %c0_i32_280 = arith.constant 0 : i32
    %279 = tpu.memref_slice %arg16[%c0_i32_275, %c0_i32_279, %c0_i32_280] : memref<2x128x128xf32, #tpu.memory_space<vmem>> -> memref<1x128x128xf32, #tpu.memory_space<vmem>>
    %280 = tpu.memref_squeeze %279 : memref<1x128x128xf32, #tpu.memory_space<vmem>> -> memref<128x128xf32, #tpu.memory_space<vmem>>
    %281 = tpu.memref_slice %arg18[%c0_i32_276] : memref<2x!tpu.dma_semaphore, #tpu.memory_space<semaphore_mem>> -> memref<1x!tpu.dma_semaphore, #tpu.memory_space<semaphore_mem>>
    %282 = tpu.memref_squeeze %281 : memref<1x!tpu.dma_semaphore, #tpu.memory_space<semaphore_mem>> -> memref<!tpu.dma_semaphore, #tpu.memory_space<semaphore_mem>>
    tpu.wait_dma2 semaphore(%282 : memref<!tpu.dma_semaphore, #tpu.memory_space<semaphore_mem>>) src(%278 : memref<128x128xf32, #tpu.memory_space<any>>) dst(%280 : memref<128x128xf32, #tpu.memory_space<vmem>>)
    %c5_i32_281 = arith.constant 5 : i32
    %c1_i32_282 = arith.constant 1 : i32
    %c1_i32_283 = arith.constant 1 : i32
    %c0_i32_284 = arith.constant 0 : i32
    %c0_i32_285 = arith.constant 0 : i32
    %283 = tpu.memref_slice %arg6[%c5_i32_281, %c0_i32_284, %c0_i32_285] : memref<10x128x128xf32, #tpu.memory_space<any>> -> memref<1x128x128xf32, #tpu.memory_space<any>>
    %284 = tpu.memref_squeeze %283 : memref<1x128x128xf32, #tpu.memory_space<any>> -> memref<128x128xf32, #tpu.memory_space<any>>
    %c0_i32_286 = arith.constant 0 : i32
    %c0_i32_287 = arith.constant 0 : i32
    %285 = tpu.memref_slice %arg16[%c1_i32_282, %c0_i32_286, %c0_i32_287] : memref<2x128x128xf32, #tpu.memory_space<vmem>> -> memref<1x128x128xf32, #tpu.memory_space<vmem>>
    %286 = tpu.memref_squeeze %285 : memref<1x128x128xf32, #tpu.memory_space<vmem>> -> memref<128x128xf32, #tpu.memory_space<vmem>>
    %287 = tpu.memref_slice %arg18[%c1_i32_283] : memref<2x!tpu.dma_semaphore, #tpu.memory_space<semaphore_mem>> -> memref<1x!tpu.dma_semaphore, #tpu.memory_space<semaphore_mem>>
    %288 = tpu.memref_squeeze %287 : memref<1x!tpu.dma_semaphore, #tpu.memory_space<semaphore_mem>> -> memref<!tpu.dma_semaphore, #tpu.memory_space<semaphore_mem>>
    tpu.enqueue_dma source(%284 : memref<128x128xf32, #tpu.memory_space<any>>) target(%286 : memref<128x128xf32, #tpu.memory_space<vmem>>) target_semaphore(%288 : memref<!tpu.dma_semaphore, #tpu.memory_space<semaphore_mem>>)
    %c0_288 = arith.constant 0 : index
    %c0_289 = arith.constant 0 : index
    %c0_290 = arith.constant 0 : index
    %289 = vector.load %arg16[%c0_288, %c0_289, %c0_290] : memref<2x128x128xf32, #tpu.memory_space<vmem>>, vector<1x128x128xf32>
    %290 = vector.shape_cast %289 : vector<1x128x128xf32> to vector<128x128xf32>
    %cst_291 = arith.constant dense<0.000000e+00> : vector<8x128xf32>
    %291 = tpu.matmul %276, %290, %cst_291 {dimension_numbers = #tpu.dot_dimension_numbers<[1], [0], [0], [1], [0, 0, 1, 1], [], []>} : vector<8x128xf32>, vector<128x128xf32>, vector<8x128xf32> -> vector<8x128xf32>
    %c4_292 = arith.constant 4 : index
    %c0_293 = arith.constant 0 : index
    %c0_294 = arith.constant 0 : index
    %292 = vector.load %arg7[%c4_292, %c0_293, %c0_294] : memref<10x1x128xf32, #tpu.memory_space<vmem>>, vector<1x1x128xf32>
    %293 = vector.shape_cast %292 : vector<1x1x128xf32> to vector<1x128xf32>
    %294 = vector.broadcast %293 : vector<1x128xf32> to vector<8x128xf32>
    %295 = arith.addf %291, %294 : vector<8x128xf32>
    %cst_295 = arith.constant 0.000000e+00 : f32
    %296 = vector.broadcast %cst_295 : f32 to vector<8x128xf32>
    %297 = arith.maximumf %295, %296 : vector<8x128xf32>
    %c5_i32_296 = arith.constant 5 : i32
    %c1_i32_297 = arith.constant 1 : i32
    %c1_i32_298 = arith.constant 1 : i32
    %c0_i32_299 = arith.constant 0 : i32
    %c0_i32_300 = arith.constant 0 : i32
    %298 = tpu.memref_slice %arg6[%c5_i32_296, %c0_i32_299, %c0_i32_300] : memref<10x128x128xf32, #tpu.memory_space<any>> -> memref<1x128x128xf32, #tpu.memory_space<any>>
    %299 = tpu.memref_squeeze %298 : memref<1x128x128xf32, #tpu.memory_space<any>> -> memref<128x128xf32, #tpu.memory_space<any>>
    %c0_i32_301 = arith.constant 0 : i32
    %c0_i32_302 = arith.constant 0 : i32
    %300 = tpu.memref_slice %arg16[%c1_i32_297, %c0_i32_301, %c0_i32_302] : memref<2x128x128xf32, #tpu.memory_space<vmem>> -> memref<1x128x128xf32, #tpu.memory_space<vmem>>
    %301 = tpu.memref_squeeze %300 : memref<1x128x128xf32, #tpu.memory_space<vmem>> -> memref<128x128xf32, #tpu.memory_space<vmem>>
    %302 = tpu.memref_slice %arg18[%c1_i32_298] : memref<2x!tpu.dma_semaphore, #tpu.memory_space<semaphore_mem>> -> memref<1x!tpu.dma_semaphore, #tpu.memory_space<semaphore_mem>>
    %303 = tpu.memref_squeeze %302 : memref<1x!tpu.dma_semaphore, #tpu.memory_space<semaphore_mem>> -> memref<!tpu.dma_semaphore, #tpu.memory_space<semaphore_mem>>
    tpu.wait_dma2 semaphore(%303 : memref<!tpu.dma_semaphore, #tpu.memory_space<semaphore_mem>>) src(%299 : memref<128x128xf32, #tpu.memory_space<any>>) dst(%301 : memref<128x128xf32, #tpu.memory_space<vmem>>)
    %c6_i32 = arith.constant 6 : i32
    %c0_i32_303 = arith.constant 0 : i32
    %c0_i32_304 = arith.constant 0 : i32
    %c0_i32_305 = arith.constant 0 : i32
    %c0_i32_306 = arith.constant 0 : i32
    %304 = tpu.memref_slice %arg6[%c6_i32, %c0_i32_305, %c0_i32_306] : memref<10x128x128xf32, #tpu.memory_space<any>> -> memref<1x128x128xf32, #tpu.memory_space<any>>
    %305 = tpu.memref_squeeze %304 : memref<1x128x128xf32, #tpu.memory_space<any>> -> memref<128x128xf32, #tpu.memory_space<any>>
    %c0_i32_307 = arith.constant 0 : i32
    %c0_i32_308 = arith.constant 0 : i32
    %306 = tpu.memref_slice %arg16[%c0_i32_303, %c0_i32_307, %c0_i32_308] : memref<2x128x128xf32, #tpu.memory_space<vmem>> -> memref<1x128x128xf32, #tpu.memory_space<vmem>>
    %307 = tpu.memref_squeeze %306 : memref<1x128x128xf32, #tpu.memory_space<vmem>> -> memref<128x128xf32, #tpu.memory_space<vmem>>
    %308 = tpu.memref_slice %arg18[%c0_i32_304] : memref<2x!tpu.dma_semaphore, #tpu.memory_space<semaphore_mem>> -> memref<1x!tpu.dma_semaphore, #tpu.memory_space<semaphore_mem>>
    %309 = tpu.memref_squeeze %308 : memref<1x!tpu.dma_semaphore, #tpu.memory_space<semaphore_mem>> -> memref<!tpu.dma_semaphore, #tpu.memory_space<semaphore_mem>>
    tpu.enqueue_dma source(%305 : memref<128x128xf32, #tpu.memory_space<any>>) target(%307 : memref<128x128xf32, #tpu.memory_space<vmem>>) target_semaphore(%309 : memref<!tpu.dma_semaphore, #tpu.memory_space<semaphore_mem>>)
    %c1_309 = arith.constant 1 : index
    %c0_310 = arith.constant 0 : index
    %c0_311 = arith.constant 0 : index
    %310 = vector.load %arg16[%c1_309, %c0_310, %c0_311] : memref<2x128x128xf32, #tpu.memory_space<vmem>>, vector<1x128x128xf32>
    %311 = vector.shape_cast %310 : vector<1x128x128xf32> to vector<128x128xf32>
    %cst_312 = arith.constant dense<0.000000e+00> : vector<8x128xf32>
    %312 = tpu.matmul %297, %311, %cst_312 {dimension_numbers = #tpu.dot_dimension_numbers<[1], [0], [0], [1], [0, 0, 1, 1], [], []>} : vector<8x128xf32>, vector<128x128xf32>, vector<8x128xf32> -> vector<8x128xf32>
    %c5_313 = arith.constant 5 : index
    %c0_314 = arith.constant 0 : index
    %c0_315 = arith.constant 0 : index
    %313 = vector.load %arg7[%c5_313, %c0_314, %c0_315] : memref<10x1x128xf32, #tpu.memory_space<vmem>>, vector<1x1x128xf32>
    %314 = vector.shape_cast %313 : vector<1x1x128xf32> to vector<1x128xf32>
    %315 = vector.broadcast %314 : vector<1x128xf32> to vector<8x128xf32>
    %316 = arith.addf %312, %315 : vector<8x128xf32>
    %cst_316 = arith.constant 0.000000e+00 : f32
    %317 = vector.broadcast %cst_316 : f32 to vector<8x128xf32>
    %318 = arith.maximumf %316, %317 : vector<8x128xf32>
    %c6_i32_317 = arith.constant 6 : i32
    %c0_i32_318 = arith.constant 0 : i32
    %c0_i32_319 = arith.constant 0 : i32
    %c0_i32_320 = arith.constant 0 : i32
    %c0_i32_321 = arith.constant 0 : i32
    %319 = tpu.memref_slice %arg6[%c6_i32_317, %c0_i32_320, %c0_i32_321] : memref<10x128x128xf32, #tpu.memory_space<any>> -> memref<1x128x128xf32, #tpu.memory_space<any>>
    %320 = tpu.memref_squeeze %319 : memref<1x128x128xf32, #tpu.memory_space<any>> -> memref<128x128xf32, #tpu.memory_space<any>>
    %c0_i32_322 = arith.constant 0 : i32
    %c0_i32_323 = arith.constant 0 : i32
    %321 = tpu.memref_slice %arg16[%c0_i32_318, %c0_i32_322, %c0_i32_323] : memref<2x128x128xf32, #tpu.memory_space<vmem>> -> memref<1x128x128xf32, #tpu.memory_space<vmem>>
    %322 = tpu.memref_squeeze %321 : memref<1x128x128xf32, #tpu.memory_space<vmem>> -> memref<128x128xf32, #tpu.memory_space<vmem>>
    %323 = tpu.memref_slice %arg18[%c0_i32_319] : memref<2x!tpu.dma_semaphore, #tpu.memory_space<semaphore_mem>> -> memref<1x!tpu.dma_semaphore, #tpu.memory_space<semaphore_mem>>
    %324 = tpu.memref_squeeze %323 : memref<1x!tpu.dma_semaphore, #tpu.memory_space<semaphore_mem>> -> memref<!tpu.dma_semaphore, #tpu.memory_space<semaphore_mem>>
    tpu.wait_dma2 semaphore(%324 : memref<!tpu.dma_semaphore, #tpu.memory_space<semaphore_mem>>) src(%320 : memref<128x128xf32, #tpu.memory_space<any>>) dst(%322 : memref<128x128xf32, #tpu.memory_space<vmem>>)
    %c7_i32 = arith.constant 7 : i32
    %c1_i32_324 = arith.constant 1 : i32
    %c1_i32_325 = arith.constant 1 : i32
    %c0_i32_326 = arith.constant 0 : i32
    %c0_i32_327 = arith.constant 0 : i32
    %325 = tpu.memref_slice %arg6[%c7_i32, %c0_i32_326, %c0_i32_327] : memref<10x128x128xf32, #tpu.memory_space<any>> -> memref<1x128x128xf32, #tpu.memory_space<any>>
    %326 = tpu.memref_squeeze %325 : memref<1x128x128xf32, #tpu.memory_space<any>> -> memref<128x128xf32, #tpu.memory_space<any>>
    %c0_i32_328 = arith.constant 0 : i32
    %c0_i32_329 = arith.constant 0 : i32
    %327 = tpu.memref_slice %arg16[%c1_i32_324, %c0_i32_328, %c0_i32_329] : memref<2x128x128xf32, #tpu.memory_space<vmem>> -> memref<1x128x128xf32, #tpu.memory_space<vmem>>
    %328 = tpu.memref_squeeze %327 : memref<1x128x128xf32, #tpu.memory_space<vmem>> -> memref<128x128xf32, #tpu.memory_space<vmem>>
    %329 = tpu.memref_slice %arg18[%c1_i32_325] : memref<2x!tpu.dma_semaphore, #tpu.memory_space<semaphore_mem>> -> memref<1x!tpu.dma_semaphore, #tpu.memory_space<semaphore_mem>>
    %330 = tpu.memref_squeeze %329 : memref<1x!tpu.dma_semaphore, #tpu.memory_space<semaphore_mem>> -> memref<!tpu.dma_semaphore, #tpu.memory_space<semaphore_mem>>
    tpu.enqueue_dma source(%326 : memref<128x128xf32, #tpu.memory_space<any>>) target(%328 : memref<128x128xf32, #tpu.memory_space<vmem>>) target_semaphore(%330 : memref<!tpu.dma_semaphore, #tpu.memory_space<semaphore_mem>>)
    %c0_330 = arith.constant 0 : index
    %c0_331 = arith.constant 0 : index
    %c0_332 = arith.constant 0 : index
    %331 = vector.load %arg16[%c0_330, %c0_331, %c0_332] : memref<2x128x128xf32, #tpu.memory_space<vmem>>, vector<1x128x128xf32>
    %332 = vector.shape_cast %331 : vector<1x128x128xf32> to vector<128x128xf32>
    %cst_333 = arith.constant dense<0.000000e+00> : vector<8x128xf32>
    %333 = tpu.matmul %318, %332, %cst_333 {dimension_numbers = #tpu.dot_dimension_numbers<[1], [0], [0], [1], [0, 0, 1, 1], [], []>} : vector<8x128xf32>, vector<128x128xf32>, vector<8x128xf32> -> vector<8x128xf32>
    %c6 = arith.constant 6 : index
    %c0_334 = arith.constant 0 : index
    %c0_335 = arith.constant 0 : index
    %334 = vector.load %arg7[%c6, %c0_334, %c0_335] : memref<10x1x128xf32, #tpu.memory_space<vmem>>, vector<1x1x128xf32>
    %335 = vector.shape_cast %334 : vector<1x1x128xf32> to vector<1x128xf32>
    %336 = vector.broadcast %335 : vector<1x128xf32> to vector<8x128xf32>
    %337 = arith.addf %333, %336 : vector<8x128xf32>
    %cst_336 = arith.constant 0.000000e+00 : f32
    %338 = vector.broadcast %cst_336 : f32 to vector<8x128xf32>
    %339 = arith.maximumf %337, %338 : vector<8x128xf32>
    %c7_i32_337 = arith.constant 7 : i32
    %c1_i32_338 = arith.constant 1 : i32
    %c1_i32_339 = arith.constant 1 : i32
    %c0_i32_340 = arith.constant 0 : i32
    %c0_i32_341 = arith.constant 0 : i32
    %340 = tpu.memref_slice %arg6[%c7_i32_337, %c0_i32_340, %c0_i32_341] : memref<10x128x128xf32, #tpu.memory_space<any>> -> memref<1x128x128xf32, #tpu.memory_space<any>>
    %341 = tpu.memref_squeeze %340 : memref<1x128x128xf32, #tpu.memory_space<any>> -> memref<128x128xf32, #tpu.memory_space<any>>
    %c0_i32_342 = arith.constant 0 : i32
    %c0_i32_343 = arith.constant 0 : i32
    %342 = tpu.memref_slice %arg16[%c1_i32_338, %c0_i32_342, %c0_i32_343] : memref<2x128x128xf32, #tpu.memory_space<vmem>> -> memref<1x128x128xf32, #tpu.memory_space<vmem>>
    %343 = tpu.memref_squeeze %342 : memref<1x128x128xf32, #tpu.memory_space<vmem>> -> memref<128x128xf32, #tpu.memory_space<vmem>>
    %344 = tpu.memref_slice %arg18[%c1_i32_339] : memref<2x!tpu.dma_semaphore, #tpu.memory_space<semaphore_mem>> -> memref<1x!tpu.dma_semaphore, #tpu.memory_space<semaphore_mem>>
    %345 = tpu.memref_squeeze %344 : memref<1x!tpu.dma_semaphore, #tpu.memory_space<semaphore_mem>> -> memref<!tpu.dma_semaphore, #tpu.memory_space<semaphore_mem>>
    tpu.wait_dma2 semaphore(%345 : memref<!tpu.dma_semaphore, #tpu.memory_space<semaphore_mem>>) src(%341 : memref<128x128xf32, #tpu.memory_space<any>>) dst(%343 : memref<128x128xf32, #tpu.memory_space<vmem>>)
    %c8_i32 = arith.constant 8 : i32
    %c0_i32_344 = arith.constant 0 : i32
    %c0_i32_345 = arith.constant 0 : i32
    %c0_i32_346 = arith.constant 0 : i32
    %c0_i32_347 = arith.constant 0 : i32
    %346 = tpu.memref_slice %arg6[%c8_i32, %c0_i32_346, %c0_i32_347] : memref<10x128x128xf32, #tpu.memory_space<any>> -> memref<1x128x128xf32, #tpu.memory_space<any>>
    %347 = tpu.memref_squeeze %346 : memref<1x128x128xf32, #tpu.memory_space<any>> -> memref<128x128xf32, #tpu.memory_space<any>>
    %c0_i32_348 = arith.constant 0 : i32
    %c0_i32_349 = arith.constant 0 : i32
    %348 = tpu.memref_slice %arg16[%c0_i32_344, %c0_i32_348, %c0_i32_349] : memref<2x128x128xf32, #tpu.memory_space<vmem>> -> memref<1x128x128xf32, #tpu.memory_space<vmem>>
    %349 = tpu.memref_squeeze %348 : memref<1x128x128xf32, #tpu.memory_space<vmem>> -> memref<128x128xf32, #tpu.memory_space<vmem>>
    %350 = tpu.memref_slice %arg18[%c0_i32_345] : memref<2x!tpu.dma_semaphore, #tpu.memory_space<semaphore_mem>> -> memref<1x!tpu.dma_semaphore, #tpu.memory_space<semaphore_mem>>
    %351 = tpu.memref_squeeze %350 : memref<1x!tpu.dma_semaphore, #tpu.memory_space<semaphore_mem>> -> memref<!tpu.dma_semaphore, #tpu.memory_space<semaphore_mem>>
    tpu.enqueue_dma source(%347 : memref<128x128xf32, #tpu.memory_space<any>>) target(%349 : memref<128x128xf32, #tpu.memory_space<vmem>>) target_semaphore(%351 : memref<!tpu.dma_semaphore, #tpu.memory_space<semaphore_mem>>)
    %c1_350 = arith.constant 1 : index
    %c0_351 = arith.constant 0 : index
    %c0_352 = arith.constant 0 : index
    %352 = vector.load %arg16[%c1_350, %c0_351, %c0_352] : memref<2x128x128xf32, #tpu.memory_space<vmem>>, vector<1x128x128xf32>
    %353 = vector.shape_cast %352 : vector<1x128x128xf32> to vector<128x128xf32>
    %cst_353 = arith.constant dense<0.000000e+00> : vector<8x128xf32>
    %354 = tpu.matmul %339, %353, %cst_353 {dimension_numbers = #tpu.dot_dimension_numbers<[1], [0], [0], [1], [0, 0, 1, 1], [], []>} : vector<8x128xf32>, vector<128x128xf32>, vector<8x128xf32> -> vector<8x128xf32>
    %c7 = arith.constant 7 : index
    %c0_354 = arith.constant 0 : index
    %c0_355 = arith.constant 0 : index
    %355 = vector.load %arg7[%c7, %c0_354, %c0_355] : memref<10x1x128xf32, #tpu.memory_space<vmem>>, vector<1x1x128xf32>
    %356 = vector.shape_cast %355 : vector<1x1x128xf32> to vector<1x128xf32>
    %357 = vector.broadcast %356 : vector<1x128xf32> to vector<8x128xf32>
    %358 = arith.addf %354, %357 : vector<8x128xf32>
    %cst_356 = arith.constant 0.000000e+00 : f32
    %359 = vector.broadcast %cst_356 : f32 to vector<8x128xf32>
    %360 = arith.maximumf %358, %359 : vector<8x128xf32>
    %c8_i32_357 = arith.constant 8 : i32
    %c0_i32_358 = arith.constant 0 : i32
    %c0_i32_359 = arith.constant 0 : i32
    %c0_i32_360 = arith.constant 0 : i32
    %c0_i32_361 = arith.constant 0 : i32
    %361 = tpu.memref_slice %arg6[%c8_i32_357, %c0_i32_360, %c0_i32_361] : memref<10x128x128xf32, #tpu.memory_space<any>> -> memref<1x128x128xf32, #tpu.memory_space<any>>
    %362 = tpu.memref_squeeze %361 : memref<1x128x128xf32, #tpu.memory_space<any>> -> memref<128x128xf32, #tpu.memory_space<any>>
    %c0_i32_362 = arith.constant 0 : i32
    %c0_i32_363 = arith.constant 0 : i32
    %363 = tpu.memref_slice %arg16[%c0_i32_358, %c0_i32_362, %c0_i32_363] : memref<2x128x128xf32, #tpu.memory_space<vmem>> -> memref<1x128x128xf32, #tpu.memory_space<vmem>>
    %364 = tpu.memref_squeeze %363 : memref<1x128x128xf32, #tpu.memory_space<vmem>> -> memref<128x128xf32, #tpu.memory_space<vmem>>
    %365 = tpu.memref_slice %arg18[%c0_i32_359] : memref<2x!tpu.dma_semaphore, #tpu.memory_space<semaphore_mem>> -> memref<1x!tpu.dma_semaphore, #tpu.memory_space<semaphore_mem>>
    %366 = tpu.memref_squeeze %365 : memref<1x!tpu.dma_semaphore, #tpu.memory_space<semaphore_mem>> -> memref<!tpu.dma_semaphore, #tpu.memory_space<semaphore_mem>>
    tpu.wait_dma2 semaphore(%366 : memref<!tpu.dma_semaphore, #tpu.memory_space<semaphore_mem>>) src(%362 : memref<128x128xf32, #tpu.memory_space<any>>) dst(%364 : memref<128x128xf32, #tpu.memory_space<vmem>>)
    %c9_i32 = arith.constant 9 : i32
    %c1_i32_364 = arith.constant 1 : i32
    %c1_i32_365 = arith.constant 1 : i32
    %c0_i32_366 = arith.constant 0 : i32
    %c0_i32_367 = arith.constant 0 : i32
    %367 = tpu.memref_slice %arg6[%c9_i32, %c0_i32_366, %c0_i32_367] : memref<10x128x128xf32, #tpu.memory_space<any>> -> memref<1x128x128xf32, #tpu.memory_space<any>>
    %368 = tpu.memref_squeeze %367 : memref<1x128x128xf32, #tpu.memory_space<any>> -> memref<128x128xf32, #tpu.memory_space<any>>
    %c0_i32_368 = arith.constant 0 : i32
    %c0_i32_369 = arith.constant 0 : i32
    %369 = tpu.memref_slice %arg16[%c1_i32_364, %c0_i32_368, %c0_i32_369] : memref<2x128x128xf32, #tpu.memory_space<vmem>> -> memref<1x128x128xf32, #tpu.memory_space<vmem>>
    %370 = tpu.memref_squeeze %369 : memref<1x128x128xf32, #tpu.memory_space<vmem>> -> memref<128x128xf32, #tpu.memory_space<vmem>>
    %371 = tpu.memref_slice %arg18[%c1_i32_365] : memref<2x!tpu.dma_semaphore, #tpu.memory_space<semaphore_mem>> -> memref<1x!tpu.dma_semaphore, #tpu.memory_space<semaphore_mem>>
    %372 = tpu.memref_squeeze %371 : memref<1x!tpu.dma_semaphore, #tpu.memory_space<semaphore_mem>> -> memref<!tpu.dma_semaphore, #tpu.memory_space<semaphore_mem>>
    tpu.enqueue_dma source(%368 : memref<128x128xf32, #tpu.memory_space<any>>) target(%370 : memref<128x128xf32, #tpu.memory_space<vmem>>) target_semaphore(%372 : memref<!tpu.dma_semaphore, #tpu.memory_space<semaphore_mem>>)
    %c0_370 = arith.constant 0 : index
    %c0_371 = arith.constant 0 : index
    %c0_372 = arith.constant 0 : index
    %373 = vector.load %arg16[%c0_370, %c0_371, %c0_372] : memref<2x128x128xf32, #tpu.memory_space<vmem>>, vector<1x128x128xf32>
    %374 = vector.shape_cast %373 : vector<1x128x128xf32> to vector<128x128xf32>
    %cst_373 = arith.constant dense<0.000000e+00> : vector<8x128xf32>
    %375 = tpu.matmul %360, %374, %cst_373 {dimension_numbers = #tpu.dot_dimension_numbers<[1], [0], [0], [1], [0, 0, 1, 1], [], []>} : vector<8x128xf32>, vector<128x128xf32>, vector<8x128xf32> -> vector<8x128xf32>
    %c8 = arith.constant 8 : index
    %c0_374 = arith.constant 0 : index
    %c0_375 = arith.constant 0 : index
    %376 = vector.load %arg7[%c8, %c0_374, %c0_375] : memref<10x1x128xf32, #tpu.memory_space<vmem>>, vector<1x1x128xf32>
    %377 = vector.shape_cast %376 : vector<1x1x128xf32> to vector<1x128xf32>
    %378 = vector.broadcast %377 : vector<1x128xf32> to vector<8x128xf32>
    %379 = arith.addf %375, %378 : vector<8x128xf32>
    %cst_376 = arith.constant 0.000000e+00 : f32
    %380 = vector.broadcast %cst_376 : f32 to vector<8x128xf32>
    %381 = arith.maximumf %379, %380 : vector<8x128xf32>
    %c9_i32_377 = arith.constant 9 : i32
    %c1_i32_378 = arith.constant 1 : i32
    %c1_i32_379 = arith.constant 1 : i32
    %c0_i32_380 = arith.constant 0 : i32
    %c0_i32_381 = arith.constant 0 : i32
    %382 = tpu.memref_slice %arg6[%c9_i32_377, %c0_i32_380, %c0_i32_381] : memref<10x128x128xf32, #tpu.memory_space<any>> -> memref<1x128x128xf32, #tpu.memory_space<any>>
    %383 = tpu.memref_squeeze %382 : memref<1x128x128xf32, #tpu.memory_space<any>> -> memref<128x128xf32, #tpu.memory_space<any>>
    %c0_i32_382 = arith.constant 0 : i32
    %c0_i32_383 = arith.constant 0 : i32
    %384 = tpu.memref_slice %arg16[%c1_i32_378, %c0_i32_382, %c0_i32_383] : memref<2x128x128xf32, #tpu.memory_space<vmem>> -> memref<1x128x128xf32, #tpu.memory_space<vmem>>
    %385 = tpu.memref_squeeze %384 : memref<1x128x128xf32, #tpu.memory_space<vmem>> -> memref<128x128xf32, #tpu.memory_space<vmem>>
    %386 = tpu.memref_slice %arg18[%c1_i32_379] : memref<2x!tpu.dma_semaphore, #tpu.memory_space<semaphore_mem>> -> memref<1x!tpu.dma_semaphore, #tpu.memory_space<semaphore_mem>>
    %387 = tpu.memref_squeeze %386 : memref<1x!tpu.dma_semaphore, #tpu.memory_space<semaphore_mem>> -> memref<!tpu.dma_semaphore, #tpu.memory_space<semaphore_mem>>
    tpu.wait_dma2 semaphore(%387 : memref<!tpu.dma_semaphore, #tpu.memory_space<semaphore_mem>>) src(%383 : memref<128x128xf32, #tpu.memory_space<any>>) dst(%385 : memref<128x128xf32, #tpu.memory_space<vmem>>)
    %c1_384 = arith.constant 1 : index
    %c0_385 = arith.constant 0 : index
    %c0_386 = arith.constant 0 : index
    %388 = vector.load %arg16[%c1_384, %c0_385, %c0_386] : memref<2x128x128xf32, #tpu.memory_space<vmem>>, vector<1x128x128xf32>
    %389 = vector.shape_cast %388 : vector<1x128x128xf32> to vector<128x128xf32>
    %cst_387 = arith.constant dense<0.000000e+00> : vector<8x128xf32>
    %390 = tpu.matmul %381, %389, %cst_387 {dimension_numbers = #tpu.dot_dimension_numbers<[1], [0], [0], [1], [0, 0, 1, 1], [], []>} : vector<8x128xf32>, vector<128x128xf32>, vector<8x128xf32> -> vector<8x128xf32>
    %c9 = arith.constant 9 : index
    %c0_388 = arith.constant 0 : index
    %c0_389 = arith.constant 0 : index
    %391 = vector.load %arg7[%c9, %c0_388, %c0_389] : memref<10x1x128xf32, #tpu.memory_space<vmem>>, vector<1x1x128xf32>
    %392 = vector.shape_cast %391 : vector<1x1x128xf32> to vector<1x128xf32>
    %393 = vector.broadcast %392 : vector<1x128xf32> to vector<8x128xf32>
    %394 = arith.addf %390, %393 : vector<8x128xf32>
    %c0_390 = arith.constant 0 : index
    %c0_391 = arith.constant 0 : index
    %395 = vector.load %arg12[%c0_390, %c0_391] : memref<8x128xf32, #tpu.memory_space<vmem>>, vector<8x128xf32>
    tpu.vector_store %arg12[%c0_390, %c0_391], %394 {strides = array<i32>} : memref<8x128xf32, #tpu.memory_space<vmem>>, vector<8x128xf32>,
    return
  }
}

</mosaic_0001>

<bundles_post_ra>
// kernel: _forward_jit.1
= control target key start
LH: loop header
LB: loop body
LE: loop exit
PB: predicated region body
PF: predicated region fallthrough
CT: control target
= control target key end

     0   :  { %20 = vsyncpa [#allocation7], 0  ;;  %s6245_s0 = inlined_call_operand.vmem [shape: f32[8,256], index: 0, kind: input, shape index: {}]   ;;  %s6246_s1 = inlined_call_operand.vmem [shape: f32[8,128], index: 1, kind: input, shape index: {}]   ;;  %s6247_s2 = inlined_call_operand.hbm [shape: f32[6,256,256], index: 2, kind: input, shape index: {}]   ;;  %s6248_s3 = inlined_call_operand.hbm [shape: f32[6,1,256], index: 3, kind: input, shape index: {}]   ;;  %s6249_s4 = inlined_call_operand.hbm [shape: f32[256,128], index: 4, kind: input, shape index: {}]   ;;  %s6250_s5 = inlined_call_operand.hbm [shape: f32[1,128], index: 5, kind: input, shape index: {}]   ;;  %s6251_s6 = inlined_call_operand.hbm [shape: f32[10,128,128], index: 6, kind: input, shape index: {}]   ;;  %s6252_s7 = inlined_call_operand.hbm [shape: f32[10,1,128], index: 7, kind: input, shape index: {}]   ;;  %s6253_s8 = inlined_call_operand.hbm [shape: f32[3,128,128], index: 8, kind: input, shape index: {}]   ;;  %s6254_s9 = inlined_call_operand.hbm [shape: f32[3,1,128], index: 9, kind: input, shape index: {}]   ;;  %s6255_s10 = inlined_call_operand.hbm [shape: f32[3,128,128], index: 10, kind: input, shape index: {}]   ;;  %s6256_s11 = inlined_call_operand.hbm [shape: f32[3,1,128], index: 11, kind: input, shape index: {}]   ;;  %s6257_s12 = inlined_call_operand.hbm [shape: f32[8,128], index: 12, kind: output, shape index: {0}]   ;;  %s6258_s13 = inlined_call_operand.hbm [shape: f32[8,128], index: 13, kind: output, shape index: {1}]   ;;  %s6259_s14 = inlined_call_operand.hbm [shape: f32[8,128], index: 14, kind: output, shape index: {2}]  }
   0x1   :  { %21 = vsyncpa [#allocation10], 0 }
   0x2   :  { %22 = vsyncpa [#allocation13], 0 }
   0x3   :  { %23 = vsyncpa [#allocation16], 0 }
   0x4   :  { %24 = vsyncpa [#allocation19], 0 }
   0x5   :  { %25 = vsyncpa [#allocation8], 0 }
   0x6   :  { %26 = vsyncpa [#allocation22], 0  ;;  %s5377_s29 = smov [#allocation9]   ;;  %s4695_s17 = scalar_lea.hbm %s6249_s4, 4096 }
   0x7   :  { %s48_s30 = sshll.u32 %s5377_s29, 4  ;;  %p4696_p0 = scmp.ne.s32.totalorder %s6249_s4, %s4695_s17  ;;  %s49_s30 = int_to_ptr.vmem [resolvable:$true] %s48_s30 }
   0x8   :  { %p4699_p1 = scmp.lt.u32.totalorder %s4695_s17, %s6249_s4 }
   0xa   :  { %p4701_p2 = pnand %p4699_p1, %p4696_p0 }
   0xc   :  { %4704 = shalt.err (!%p4701_p2)
}
   0xd   :  { %s4705_s22 = scalar_lea.vmem %s49_s30, 4096  ;;  %p4710_p4 = scmp.lt.s32.totalorder %s49_s30, %s49_s30 }
   0xe   :  { %p4706_p3 = scmp.ne.s32.totalorder %s49_s30, %s4705_s22  ;;  %p4711_p5 = scmp.lt.s32.totalorder %s4705_s22, %s4705_s22 }
  0x10   :  { %p4712_p6 = por %p4711_p5, %p4710_p4 }
  0x12   :  { %p4713_p7 = pnand %p4712_p6, %p4706_p3 }
  0x14   :  { %4716 = shalt.err (!%p4713_p7)
}
  0x15   :  { %s6260_s23 = smov 128   ;;  %s5379_s24 = smov 8  }
  0x16   :  { %54 = dma.hbm_to_vmem [thread:$0]  %s6249_s4, 4096, %s49_s30, [#allocation10], %s6260_s23, %s6260_s23, %s5379_s24  }
  0x17   :  { %s5380_s27 = smov [#allocation12]   ;;  %s4717_s16 = scalar_lea.hbm %s6252_s7, 160 }
  0x18   :  { %s70_s28 = sshll.u32 %s5380_s27, 4  ;;  %p4718_p8 = scmp.ne.s32.totalorder %s6252_s7, %s4717_s16  ;;  %s71_s28 = int_to_ptr.vmem [resolvable:$true] %s70_s28 }
  0x19   :  { %p4721_p9 = scmp.lt.u32.totalorder %s4717_s16, %s6252_s7 }
  0x1b   :  { %p4723_p10 = pnand %p4721_p9, %p4718_p8 }
  0x1d   :  { %4726 = shalt.err (!%p4723_p10)
}
  0x1e   :  { %s4727_s21 = scalar_lea.vmem %s71_s28, 160  ;;  %p4732_p12 = scmp.lt.s32.totalorder %s71_s28, %s71_s28 }
  0x1f   :  { %p4728_p11 = scmp.ne.s32.totalorder %s71_s28, %s4727_s21  ;;  %p4733_p13 = scmp.lt.s32.totalorder %s4727_s21, %s4727_s21 }
  0x21   :  { %p4734_p0 = por %p4733_p13, %p4732_p12 }
  0x23   :  { %p4735_p1 = pnand %p4734_p0, %p4728_p11 }
  0x25   :  { %4738 = shalt.err (!%p4735_p1)
}
  0x26   :  { %s5381_s4 = smov 16   ;;  %s5382_s30 = smov 1  }
  0x27   :  { %76 = dma.hbm_to_vmem [thread:$0]  %s6252_s7, 160, %s71_s28, [#allocation13], %s5381_s4, %s5381_s4, %s5382_s30  }
  0x28   :  { %s5383_s26 = smov [#allocation15]   ;;  %s5384_s29 = smov [#allocation6]  }
  0x29   :  { %s94_s27 = sshll.u32 %s5383_s26, 4  ;;  %s36_s15 = sshll.u32 %s5384_s29, 4  ;;  %s95_s27 = int_to_ptr.vmem [resolvable:$true] %s94_s27  ;;  %s5506_s15 = int_to_ptr.vmem [resolvable:$true] %s36_s15 }
  0x2a   :  { %s4739_s18 = scalar_lea.hbm %s6254_s9, 48 }
  0x2b   :  { %p4740_p2 = scmp.ne.s32.totalorder %s6254_s9, %s4739_s18  ;;  %p4743_p3 = scmp.lt.u32.totalorder %s4739_s18, %s6254_s9 }
  0x2d   :  { %p4745_p4 = pnand %p4743_p3, %p4740_p2 }
  0x2f   :  { %4748 = shalt.err (!%p4745_p4)
}
  0x30   :  { %s4749_s7 = scalar_lea.vmem %s95_s27, 48  ;;  %s4753_s28 = scalar_lea.vmem %s95_s27, 64 }
  0x31   :  { %p4750_p5 = scmp.ne.s32.totalorder %s95_s27, %s4749_s7  ;;  %p4754_p6 = scmp.lt.s32.totalorder %s95_s27, %s95_s27 }
  0x32   :  { %p4755_p7 = scmp.lt.s32.totalorder %s4753_s28, %s4749_s7 }
  0x34   :  { %p4756_p8 = por %p4755_p7, %p4754_p6 }
  0x36   :  { %p4757_p9 = pnand %p4756_p8, %p4750_p5 }
  0x38   :  { %4760 = shalt.err (!%p4757_p9)
}
  0x39   :  { %100 = dma.hbm_to_vmem [thread:$0]  %s6254_s9, 48, %s95_s27, [#allocation16], %s5381_s4, %s5381_s4, %s5382_s30  }
  0x3a   :  { %s4761_s29 = scalar_lea.hbm %s6248_s3, 192 }
  0x3b   :  { %p4762_p10 = scmp.ne.s32.totalorder %s6248_s3, %s4761_s29  ;;  %p4765_p11 = scmp.lt.u32.totalorder %s4761_s29, %s6248_s3 }
  0x3d   :  { %p4767_p12 = pnand %p4765_p11, %p4762_p10 }
  0x3f   :  { %4770 = shalt.err (!%p4767_p12)
}
  0x40   :  { %s4771_s20 = scalar_lea.vmem %s5506_s15, 192  ;;  %p4776_p0 = scmp.lt.s32.totalorder %s5506_s15, %s5506_s15 }
  0x41   :  { %p4772_p13 = scmp.ne.s32.totalorder %s5506_s15, %s4771_s20  ;;  %p4777_p1 = scmp.lt.s32.totalorder %s4771_s20, %s4771_s20 }
  0x43   :  { %p4778_p2 = por %p4777_p1, %p4776_p0 }
  0x45   :  { %p4779_p3 = pnand %p4778_p2, %p4772_p13 }
  0x47   :  { %4782 = shalt.err (!%p4779_p3)
}
  0x48   :  { %s5385_s9 = smov 32   ;;  %s5386_s27 = smov 2  }
  0x49   :  { %42 = dma.hbm_to_vmem [thread:$0]  %s6248_s3, 192, %s5506_s15, [#allocation7], %s5385_s9, %s5385_s9, %s5386_s27  }
  0x4a   :  { %s5387_s28 = smov [#allocation11]   ;;  %s5388_s25 = smov [#allocation14]  }
  0x4b   :  { %s61_s22 = sshll.u32 %s5387_s28, 4  ;;  %s82_s26 = sshll.u32 %s5388_s25, 4  ;;  %s62_s22 = int_to_ptr.vmem [resolvable:$true] %s61_s22  ;;  %s5540_s26 = int_to_ptr.vmem [resolvable:$true] %s82_s26 }
  0x4c   :  { %s4783_s16 = scalar_lea.hbm %s6250_s5, 16 }
  0x4d   :  { %p4784_p4 = scmp.ne.s32.totalorder %s6250_s5, %s4783_s16  ;;  %p4787_p5 = scmp.lt.u32.totalorder %s4783_s16, %s6250_s5 }
  0x4f   :  { %p4789_p6 = pnand %p4787_p5, %p4784_p4 }
  0x51   :  { %4792 = shalt.err (!%p4789_p6)
}
  0x52   :  { %s4793_s3 = scalar_lea.vmem %s62_s22, 16  ;;  %s4797_s15 = scalar_lea.vmem %s62_s22, 32 }
  0x53   :  { %p4794_p7 = scmp.ne.s32.totalorder %s62_s22, %s4793_s3  ;;  %p4798_p8 = scmp.lt.s32.totalorder %s62_s22, %s62_s22 }
  0x54   :  { %p4799_p9 = scmp.lt.s32.totalorder %s4797_s15, %s4793_s3 }
  0x56   :  { %p4800_p10 = por %p4799_p9, %p4798_p8 }
  0x58   :  { %p4801_p11 = pnand %p4800_p10, %p4794_p7 }
  0x5a   :  { %4804 = shalt.err (!%p4801_p11)
}
  0x5b   :  { %64 = dma.hbm_to_vmem [thread:$0]  %s6250_s5, 16, %s62_s22, [#allocation10]  }
  0x5c   :  { %s4805_s28 = scalar_lea.hbm %s6253_s8, 6144 }
  0x5d   :  { %p4806_p12 = scmp.ne.s32.totalorder %s6253_s8, %s4805_s28  ;;  %p4809_p13 = scmp.lt.u32.totalorder %s4805_s28, %s6253_s8 }
  0x5f   :  { %p4811_p0 = pnand %p4809_p13, %p4806_p12 }
  0x61   :  { %4814 = shalt.err (!%p4811_p0)
}
  0x62   :  { %s4815_s17 = scalar_lea.vmem %s5540_s26, 6144  ;;  %p4820_p2 = scmp.lt.s32.totalorder %s5540_s26, %s5540_s26 }
  0x63   :  { %p4816_p1 = scmp.ne.s32.totalorder %s5540_s26, %s4815_s17  ;;  %p4821_p3 = scmp.lt.s32.totalorder %s4815_s17, %s4815_s17 }
  0x65   :  { %p4822_p4 = por %p4821_p3, %p4820_p2 }
  0x67   :  { %p4823_p5 = pnand %p4822_p4, %p4816_p1 }
  0x69   :  { %4826 = shalt.err (!%p4823_p5)
}
  0x6a   :  { %s6263_s5 = smov 128   ;;  %s5389_s19 = smov [#allocation17]  }
  0x6b   :  { %88 = dma.hbm_to_vmem [thread:$0]  %s6253_s8, 6144, %s5540_s26, [#allocation13], %s6263_s5, %s6263_s5, %s5379_s24  }
  0x6c   :  { %s106_s20 = sshll.u32 %s5389_s19, 4  ;;  %s5390_s3 = smov [#allocation18]   ;;  %s107_s20 = int_to_ptr.vmem [resolvable:$true] %s106_s20 }
  0x6d   :  { %s118_s15 = sshll.u32 %s5390_s3, 4  ;;  %s4827_s21 = scalar_lea.hbm %s6255_s10, 6144  ;;  %s5574_s15 = int_to_ptr.vmem [resolvable:$true] %s118_s15 }
  0x6e   :  { %p4828_p6 = scmp.ne.s32.totalorder %s6255_s10, %s4827_s21  ;;  %p4831_p7 = scmp.lt.u32.totalorder %s4827_s21, %s6255_s10 }
  0x70   :  { %p4833_p8 = pnand %p4831_p7, %p4828_p6 }
  0x72   :  { %4836 = shalt.err (!%p4833_p8)
}
  0x73   :  { %s4837_s8 = scalar_lea.vmem %s107_s20, 6144  ;;  %p4842_p10 = scmp.lt.s32.totalorder %s107_s20, %s107_s20 }
  0x74   :  { %p4838_p9 = scmp.ne.s32.totalorder %s107_s20, %s4837_s8  ;;  %p4843_p11 = scmp.lt.s32.totalorder %s4837_s8, %s4837_s8 }
  0x76   :  { %p4844_p12 = por %p4843_p11, %p4842_p10 }
  0x78   :  { %p4845_p13 = pnand %p4844_p12, %p4838_p9 }
  0x7a   :  { %4848 = shalt.err (!%p4845_p13)
}
  0x7b   :  { %112 = dma.hbm_to_vmem [thread:$0]  %s6255_s10, 6144, %s107_s20, [#allocation16], %s6263_s5, %s6263_s5, %s5379_s24  }
  0x7c   :  { %s4849_s22 = scalar_lea.hbm %s6256_s11, 48 }
  0x7d   :  { %p4850_p0 = scmp.ne.s32.totalorder %s6256_s11, %s4849_s22  ;;  %p4853_p1 = scmp.lt.u32.totalorder %s4849_s22, %s6256_s11 }
  0x7f   :  { %p4855_p2 = pnand %p4853_p1, %p4850_p0 }
  0x81   :  { %4858 = shalt.err (!%p4855_p2)
}
  0x82   :  { %s4859_s27 = scalar_lea.vmem %s5574_s15, 48  ;;  %s4863_s10 = scalar_lea.vmem %s5574_s15, 64 }
  0x83   :  { %p4860_p3 = scmp.ne.s32.totalorder %s5574_s15, %s4859_s27  ;;  %p4864_p4 = scmp.lt.s32.totalorder %s5574_s15, %s5574_s15 }
  0x84   :  { %p4865_p5 = scmp.lt.s32.totalorder %s4863_s10, %s4859_s27 }
  0x86   :  { %p4866_p6 = por %p4865_p5, %p4864_p4 }
  0x88   :  { %p4867_p7 = pnand %p4866_p6, %p4860_p3 }
  0x8a   :  { %4870 = shalt.err (!%p4867_p7)
}
  0x8b   :  { %124 = dma.hbm_to_vmem [thread:$0]  %s6256_s11, 48, %s5574_s15, [#allocation19], %s5381_s4, %s5381_s4, %s5382_s30  }
  0x8c   :  { %5331 = dma.done.wait [#allocation7], 192  }
  0x8d   :  { %5332 = vsyncadd [#allocation7], 4294967104 }
  0x8e   :  { %5333 = dma.done.wait [#allocation10], 4112  }
  0x8f   :  { %5334 = vsyncadd [#allocation10], 4294963184 }
  0x90   :  { %5335 = dma.done.wait [#allocation13], 6304  }
  0x91   :  { %5336 = vsyncadd [#allocation13], 4294960992 }
  0x92   :  { %5337 = dma.done.wait [#allocation16], 6192  }
  0x93   :  { %5338 = vsyncadd [#allocation16], 4294961104 }
  0x94   :  { %5339 = dma.done.wait [#allocation19], 48  }
  0x95   :  { %5340 = vsyncadd [#allocation19], 4294967248  ;;  %v5391_v0 = vmov 0.0|0.0   ;;  %vm5392_vm0 = vmmov 0   ;;  %v5393_v1 = vmov 0.0   ;;  %v5621_v2 = vld [vmem:[%s6245_s0] sm:$0xff] }
  0x96   :  { %3871 = vmatprep.subr.bf16.mxu0 %v5391_v0  ;;  %3343 = vmatprep.mubr.msk.f32.mxu0 %vm5392_vm0, %v5393_v1  ;;  %v5626_v3 = vld [vmem:[%s6245_s0 + $0x8] sm:$0xff]  ;;  %v172_v4 = vld [vmem:[#allocation14] sm:$0xff]  ;;  %v173_v5 = vld [vmem:[#allocation14 + $0x8] sm:$0xff]  ;;  %s5395_s7 = smov [#allocation3]   ;;  %s5692_s8 = scalar_lea.hbm %s6247_s2, 8192 }
  0x97   :  { %3895 = vmatprep.subr.bf16.mxu1 %v5391_v0  ;;  %3378 = vmatprep.mubr.msk.f32.mxu1 %vm5392_vm0, %v5393_v1  ;;  %v174_v6 = vld [vmem:[#allocation14 + $0x10] sm:$0xff]  ;;  %v175_v7 = vld [vmem:[#allocation14 + $0x18] sm:$0xff]  ;;  %v3872_v8 = vpack.c.bf16 %v173_v5, %v172_v4  ;;  %v176_v10 = vld [vmem:[#allocation14 + $0x20] sm:$0xff]  ;;  %s167_s28 = sshll.u32 %s5395_s7, 4  ;;  %p4872_p8 = scmp.ne.s32.totalorder %s6247_s2, %s5692_s8  ;;  %s5687_s28 = int_to_ptr.vmem [resolvable:$true] %s167_s28 }
  0x98   :  { %v3875_v9 = vpack.c.bf16 %v175_v7, %v174_v6  ;;  %v177_v11 = vld [vmem:[#allocation14 + $0x28] sm:$0xff]  ;;  %v267_v12 = vld [vmem:[#allocation14 + $0x80] sm:$0xff]  ;;  %v269_v15 = vld [vmem:[#allocation14 + $0x90] sm:$0xff]  ;;  %s5701_s22 = scalar_lea.hbm %s6247_s2, 49152  ;;  %p4875_p10 = scmp.lt.u32.totalorder %s5692_s8, %s6247_s2 }
  0x99   :  { %3873 = vmatpush3.bf16.msra.mxu0 %v3872_v8  ;;  %v268_v13 = vld [vmem:[#allocation14 + $0x88] sm:$0xff]  ;;  %v270_v16 = vld [vmem:[#allocation14 + $0x98] sm:$0xff]  ;;  %v3878_v17 = vpack.c.bf16 %v177_v11, %v176_v10  ;;  %v178_v18 = vld [vmem:[#allocation14 + $0x30] sm:$0xff]  ;;  %p4874_p9 = scmp.lt.u32.totalorder %s5701_s22, %s5692_s8 }
  0x9a   :  { %3874 = vmatprep.subr.bf16.mxu0 %v5391_v0  ;;  %v3896_v14 = vpack.c.bf16 %v268_v13, %v267_v12  ;;  %v179_v19 = vld [vmem:[#allocation14 + $0x38] sm:$0xff]  ;;  %v3899_v20 = vpack.c.bf16 %v270_v16, %v269_v15  ;;  %v271_v21 = vld [vmem:[#allocation14 + $0xa0] sm:$0xff]  ;;  %v272_v22 = vld [vmem:[#allocation14 + $0xa8] sm:$0xff] }
  0x9b   :  { %v3881_v23 = vpack.c.bf16 %v179_v19, %v178_v18  ;;  %v180_v24 = vld [vmem:[#allocation14 + $0x40] sm:$0xff]  ;;  %v181_v25 = vld [vmem:[#allocation14 + $0x48] sm:$0xff]  ;;  %v3902_v26 = vpack.c.bf16 %v272_v22, %v271_v21  ;;  %v273_v27 = vld [vmem:[#allocation14 + $0xb0] sm:$0xff]  ;;  %p4876_p11 = por %p4875_p10, %p4874_p9 }
  0x9c   :  { %3897 = vmatpush3.bf16.msra.mxu1 %v3896_v14  ;;  %v274_v28 = vld [vmem:[#allocation14 + $0xb8] sm:$0xff]  ;;  %v3884_v29 = vpack.c.bf16 %v181_v25, %v180_v24  ;;  %v182_v30 = vld [vmem:[#allocation14 + $0x50] sm:$0xff]  ;;  %v275_v33 = vld [vmem:[#allocation14 + $0xc0] sm:$0xff] }
  0x9d   :  { %3876 = vmatpush3.bf16.msra.mxu0 %v3875_v9  ;;  %3898 = vmatprep.subr.bf16.mxu1 %v5391_v0  ;;  %v183_v31 = vld [vmem:[#allocation14 + $0x58] sm:$0xff]  ;;  %v3905_v32 = vpack.c.bf16 %v274_v28, %v273_v27  ;;  %v276_v34 = vld [vmem:[#allocation14 + $0xc8] sm:$0xff]  ;;  %v184_v36 = vld [vmem:[#allocation14 + $0x60] sm:$0xff]  ;;  %p4877_p12 = pnand %p4876_p11, %p4872_p8 }
  0x9e   :  { %3877 = vmatprep.subr.bf16.mxu0 %v5391_v0  ;;  %v3887_v35 = vpack.c.bf16 %v183_v31, %v182_v30  ;;  %v185_v37 = vld [vmem:[#allocation14 + $0x68] sm:$0xff]  ;;  %v3908_v38 = vpack.c.bf16 %v276_v34, %v275_v33  ;;  %v277_v39 = vld [vmem:[#allocation14 + $0xd0] sm:$0xff]  ;;  %v278_v40 = vld [vmem:[#allocation14 + $0xd8] sm:$0xff] }
  0x9f   :  { %v3890_v41 = vpack.c.bf16 %v185_v37, %v184_v36  ;;  %v186_v42 = vld [vmem:[#allocation14 + $0x70] sm:$0xff]  ;;  %v187_v43 = vld [vmem:[#allocation14 + $0x78] sm:$0xff]  ;;  %v3911_v44 = vpack.c.bf16 %v278_v40, %v277_v39  ;;  %v279_v45 = vld [vmem:[#allocation14 + $0xe0] sm:$0xff] }
  0xa0   :  { %3900 = vmatpush3.bf16.msra.mxu1 %v3899_v20  ;;  %v280_v46 = vld [vmem:[#allocation14 + $0xe8] sm:$0xff]  ;;  %v3893_v47 = vpack.c.bf16 %v187_v43, %v186_v42  ;;  %v281_v50 = vld [vmem:[#allocation14 + $0xf0] sm:$0xff]  ;;  %v282_v51 = vld [vmem:[#allocation14 + $0xf8] sm:$0xff] }
  0xa1   :  { %3879 = vmatpush3.bf16.msra.mxu0 %v3878_v17  ;;  %3901 = vmatprep.subr.bf16.mxu1 %v5391_v0  ;;  %v3914_v48 = vpack.c.bf16 %v280_v46, %v279_v45  ;;  %v171_v49 = vld [vmem:[%s6246_s1] sm:$0xff]  ;;  %v3917_v52 = vpack.c.bf16 %v282_v51, %v281_v50  ;;  %v363_v53 = vld [vmem:[#allocation14 + $0x100] sm:$0xff]  ;;  %v365_v55 = vld [vmem:[#allocation14 + $0x110] sm:$0xff]  ;;  %s5394_s1 = smov [#allocation2]  }
  0xa2   :  { %3880 = vmatprep.subr.bf16.mxu0 %v5391_v0  ;;  %v364_v54 = vld [vmem:[#allocation14 + $0x108] sm:$0xff]  ;;  %v366_v57 = vld [vmem:[#allocation14 + $0x118] sm:$0xff]  ;;  %v367_v59 = vld [vmem:[#allocation14 + $0x120] sm:$0xff]  ;;  %s156_s21 = sshll.u32 %s5394_s1, 4  ;;  %s5685_s21 = int_to_ptr.vmem [resolvable:$true] %s156_s21 }
  0xa3   :  { %v3920_v56 = vpack.c.bf16 %v364_v54, %v363_v53  ;;  %v3923_v58 = vpack.c.bf16 %v366_v57, %v365_v55  ;;  %v368_v60 = vld [vmem:[#allocation14 + $0x128] sm:$0xff]  ;;  %v369_v62 = vld [vmem:[#allocation14 + $0x130] sm:$0xff]  ;;  %v370_v63 = vld [vmem:[#allocation14 + $0x138] sm:$0xff] }
  0xa4   :  { %3903 = vmatpush3.bf16.msra.mxu1 %v3902_v26  ;;  %v3926_v61 = vpack.c.bf16 %v368_v60, %v367_v59  ;;  %v3929_v4 = vpack.c.bf16 %v370_v63, %v369_v62  ;;  %v371_v5 = vld [vmem:[#allocation14 + $0x140] sm:$0xff]  ;;  %v372_v6 = vld [vmem:[#allocation14 + $0x148] sm:$0xff]  ;;  %v373_v8 = vld [vmem:[#allocation14 + $0x150] sm:$0xff] }
  0xa5   :  { %3882 = vmatpush3.bf16.msra.mxu0 %v3881_v23  ;;  %3904 = vmatprep.subr.bf16.mxu1 %v5391_v0  ;;  %v3932_v7 = vpack.c.bf16 %v372_v6, %v371_v5  ;;  %v374_v9 = vld [vmem:[#allocation14 + $0x158] sm:$0xff]  ;;  %v375_v11 = vld [vmem:[#allocation14 + $0x160] sm:$0xff]  ;;  %v376_v12 = vld [vmem:[#allocation14 + $0x168] sm:$0xff] }
  0xa6   :  { %3883 = vmatprep.subr.bf16.mxu0 %v5391_v0  ;;  %v3935_v10 = vpack.c.bf16 %v374_v9, %v373_v8  ;;  %v3938_v13 = vpack.c.bf16 %v376_v12, %v375_v11  ;;  %v2983_v14 = vld [vmem:[#allocation15] ss:$0 sm:$0xff]  ;;  %v377_v19 = vld [vmem:[#allocation14 + $0x170] sm:$0xff]  ;;  %v378_v20 = vld [vmem:[#allocation14 + $0x178] sm:$0xff] }
  0xa7   :  { %v3941_v21 = vpack.c.bf16 %v378_v20, %v377_v19  ;;  %v458_v22 = vld [vmem:[#allocation17] sm:$0xff]  ;;  %v459_v23 = vld [vmem:[#allocation17 + $0x8] sm:$0xff]  ;;  %v460_v24 = vld [vmem:[#allocation17 + $0x10] sm:$0xff] }
  0xa8   :  { %3906 = vmatpush3.bf16.msra.mxu1 %v3905_v32  ;;  %v3944_v25 = vpack.c.bf16 %v459_v23, %v458_v22  ;;  %v461_v26 = vld [vmem:[#allocation17 + $0x18] sm:$0xff]  ;;  %v462_v28 = vld [vmem:[#allocation17 + $0x20] sm:$0xff]  ;;  %v464_v31 = vld [vmem:[#allocation17 + $0x30] sm:$0xff] }
  0xa9   :  { %3885 = vmatpush3.bf16.msra.mxu0 %v3884_v29  ;;  %3907 = vmatprep.subr.bf16.mxu1 %v5391_v0  ;;  %v3947_v27 = vpack.c.bf16 %v461_v26, %v460_v24  ;;  %v463_v29 = vld [vmem:[#allocation17 + $0x28] sm:$0xff]  ;;  %v465_v32 = vld [vmem:[#allocation17 + $0x38] sm:$0xff]  ;;  %v466_v34 = vld [vmem:[#allocation17 + $0x40] sm:$0xff] }
  0xaa   :  { %3886 = vmatprep.subr.bf16.mxu0 %v5391_v0  ;;  %v3950_v30 = vpack.c.bf16 %v463_v29, %v462_v28  ;;  %v3953_v33 = vpack.c.bf16 %v465_v32, %v464_v31  ;;  %v468_v37 = vld [vmem:[#allocation17 + $0x50] sm:$0xff]  ;;  %v470_v40 = vld [vmem:[#allocation17 + $0x60] sm:$0xff]  ;;  %v2984_v43 = vld [vmem:[#allocation15 + $0x1] ss:$0 sm:$0xff] }
  0xab   :  { %v553_v51 = vld [vmem:[#allocation17 + $0x80] sm:$0xff]  ;;  %v555_v53 = vld [vmem:[#allocation17 + $0x90] sm:$0xff]  ;;  %v556_v55 = vld [vmem:[#allocation17 + $0x98] sm:$0xff] }
  0xac   :  { %3909 = vmatpush3.bf16.msra.mxu1 %v3908_v38  ;;  %v469_v38 = vld [vmem:[#allocation17 + $0x58] sm:$0xff]  ;;  %v557_v57 = vld [vmem:[#allocation17 + $0xa0] sm:$0xff]  ;;  %v559_v60 = vld [vmem:[#allocation17 + $0xb0] sm:$0xff] }
  0xad   :  { %3888 = vmatpush3.bf16.msra.mxu0 %v3887_v35  ;;  %3910 = vmatprep.subr.bf16.mxu1 %v5391_v0  ;;  %v467_v35 = vld [vmem:[#allocation17 + $0x48] sm:$0xff]  ;;  %v3959_v39 = vpack.c.bf16 %v469_v38, %v468_v37  ;;  %v561_v63 = vld [vmem:[#allocation17 + $0xc0] sm:$0xff]  ;;  %v563_v6 = vld [vmem:[#allocation17 + $0xd0] sm:$0xff] }
  0xae   :  { %3889 = vmatprep.subr.bf16.mxu0 %v5391_v0  ;;  %v3956_v36 = vpack.c.bf16 %v467_v35, %v466_v34  ;;  %v565_v9 = vld [vmem:[#allocation17 + $0xe0] sm:$0xff]  ;;  %v2985_v12 = vld [vmem:[#allocation15 + $0x2] ss:$0 sm:$0xff]  ;;  %v650_v20 = vld [vmem:[#allocation17 + $0x108] sm:$0xff] }
  0xaf   :  { %v649_v19 = vld [vmem:[#allocation17 + $0x100] sm:$0xff]  ;;  %v652_v23 = vld [vmem:[#allocation17 + $0x118] sm:$0xff]  ;;  %v654_v26 = vld [vmem:[#allocation17 + $0x128] sm:$0xff] }
  0xb0   :  { %3912 = vmatpush3.bf16.msra.mxu1 %v3911_v44  ;;  %v3992_v22 = vpack.c.bf16 %v650_v20, %v649_v19  ;;  %v655_v28 = vld [vmem:[#allocation17 + $0x130] sm:$0xff]  ;;  %v656_v29 = vld [vmem:[#allocation17 + $0x138] sm:$0xff]  ;;  %v657_v31 = vld [vmem:[#allocation17 + $0x140] sm:$0xff] }
  0xb1   :  { %3891 = vmatpush3.bf16.msra.mxu0 %v3890_v41  ;;  %3913 = vmatprep.subr.bf16.mxu1 %v5391_v0  ;;  %v471_v41 = vld [vmem:[#allocation17 + $0x68] sm:$0xff]  ;;  %v659_v34 = vld [vmem:[#allocation17 + $0x150] sm:$0xff]  ;;  %v660_v35 = vld [vmem:[#allocation17 + $0x158] sm:$0xff] }
  0xb2   :  { %3892 = vmatprep.subr.bf16.mxu0 %v5391_v0  ;;  %v3962_v42 = vpack.c.bf16 %v471_v41, %v470_v40  ;;  %v658_v32 = vld [vmem:[#allocation17 + $0x148] sm:$0xff]  ;;  %v661_v37 = vld [vmem:[#allocation17 + $0x160] sm:$0xff] }
  0xb3   :  { %v662_v38 = vld [vmem:[#allocation17 + $0x168] sm:$0xff]  ;;  %v2986_v40 = vld [vmem:[#allocation18] ss:$0 sm:$0xff] }
  0xb4   :  { %3915 = vmatpush3.bf16.msra.mxu1 %v3914_v48  ;;  %v472_v48 = vld [vmem:[#allocation17 + $0x70] sm:$0xff] }
  0xb5   :  { %3894 = vmatpush3.bf16.msra.mxu0 %v3893_v47  ;;  %3916 = vmatprep.subr.bf16.mxu1 %v5391_v0 }
  0xb6   :  { %3919 = vmatprep.subr.bf16.mxu0 %v5391_v0 }
  0xb8   :  { %3344 = vmatmul.mubr.f32.vlgmr.msra.gmra.mrb[0].mxu0 %v171_v49  ;;  %3918 = vmatpush3.bf16.msra.mxu1 %v3917_v52  ;;  %v473_v49 = vld [vmem:[#allocation17 + $0x78] sm:$0xff]  ;;  %v554_v52 = vld [vmem:[#allocation17 + $0x88] sm:$0xff] }
  0xb9   :  { %3413 = vmatprep.mubr.msk.f32.mxu0 %vm5392_vm0, %v5393_v1  ;;  %3943 = vmatprep.subr.bf16.mxu1 %v5391_v0  ;;  %v3965_v50 = vpack.c.bf16 %v473_v49, %v472_v48  ;;  %v3968_v54 = vpack.c.bf16 %v554_v52, %v553_v51  ;;  %v2987_v48 = vld [vmem:[#allocation18 + $0x1] ss:$0 sm:$0xff] }
  0xba   :  { %3921 = vmatpush3.bf16.msra.mxu0 %v3920_v56  ;;  %v3971_v56 = vpack.c.bf16 %v556_v55, %v555_v53 }
  0xbb   :  { %3922 = vmatprep.subr.bf16.mxu0 %v5391_v0 }
  0xbe   :  { %3924 = vmatpush3.bf16.msra.mxu0 %v3923_v58  ;;  %v558_v58 = vld [vmem:[#allocation17 + $0xa8] sm:$0xff] }
  0xbf   :  { %3925 = vmatprep.subr.bf16.mxu0 %v5391_v0  ;;  %v3974_v59 = vpack.c.bf16 %v558_v58, %v557_v57 }
  0xc2   :  { %3927 = vmatpush3.bf16.msra.mxu0 %v3926_v61  ;;  %v560_v61 = vld [vmem:[#allocation17 + $0xb8] sm:$0xff] }
  0xc3   :  { %3928 = vmatprep.subr.bf16.mxu0 %v5391_v0  ;;  %v3977_v62 = vpack.c.bf16 %v560_v61, %v559_v60 }
  0xc6   :  { %3930 = vmatpush3.bf16.msra.mxu0 %v3929_v4  ;;  %v562_v4 = vld [vmem:[#allocation17 + $0xc8] sm:$0xff] }
  0xc7   :  { %3931 = vmatprep.subr.bf16.mxu0 %v5391_v0  ;;  %v3980_v5 = vpack.c.bf16 %v562_v4, %v561_v63 }
  0xca   :  { %3933 = vmatpush3.bf16.msra.mxu0 %v3932_v7  ;;  %v564_v7 = vld [vmem:[#allocation17 + $0xd8] sm:$0xff] }
  0xcb   :  { %3934 = vmatprep.subr.bf16.mxu0 %v5391_v0  ;;  %v3983_v8 = vpack.c.bf16 %v564_v7, %v563_v6 }
  0xce   :  { %3936 = vmatpush3.bf16.msra.mxu0 %v3935_v10  ;;  %v566_v10 = vld [vmem:[#allocation17 + $0xe8] sm:$0xff] }
  0xcf   :  { %3937 = vmatprep.subr.bf16.mxu0 %v5391_v0  ;;  %v3986_v11 = vpack.c.bf16 %v566_v10, %v565_v9 }
  0xd2   :  { %3939 = vmatpush3.bf16.msra.mxu0 %v3938_v13 }
  0xd3   :  { %3940 = vmatprep.subr.bf16.mxu0 %v5391_v0 }
  0xd6   :  { %3942 = vmatpush3.bf16.msra.mxu0 %v3941_v21  ;;  %v651_v21 = vld [vmem:[#allocation17 + $0x110] sm:$0xff] }
  0xd7   :  { %3967 = vmatprep.subr.bf16.mxu0 %v5391_v0  ;;  %v3995_v24 = vpack.c.bf16 %v652_v23, %v651_v21 }
 0x18b   :  { %v261_v15 = vpop.f32.mrb[0].mxu0 }
 0x18c   :  { %v262_v16 = vadd.f32 %v2983_v14, %v261_v15  ;;  %v3345_v17 = vpop.f32.mrb[1].mxu0 }
 0x18d   :  { %v568_v17 = vld [vmem:[#allocation17 + $0xf8] sm:$0xff] }
 0x18e   :  { %v265_v18 = vmax.f32 %v262_v16, 0.0  ;;  %v567_v16 = vld [vmem:[#allocation17 + $0xf0] sm:$0xff] }
 0x190   :  { %3379 = vmatmul.mubr.f32.vlgmr.msra.gmra.mrb[0].mxu1 %v265_v18  ;;  %v3989_v18 = vpack.c.bf16 %v568_v17, %v567_v16 }
 0x191   :  { %3448 = vmatprep.mubr.msk.f32.mxu1 %vm5392_vm0, %v5393_v1  ;;  %3945 = vmatpush3.bf16.msra.mxu1 %v3944_v25  ;;  %v653_v25 = vld [vmem:[#allocation17 + $0x120] sm:$0xff] }
 0x192   :  { %3946 = vmatprep.subr.bf16.mxu1 %v5391_v0 }
 0x195   :  { %3948 = vmatpush3.bf16.msra.mxu1 %v3947_v27  ;;  %v3998_v27 = vpack.c.bf16 %v654_v26, %v653_v25 }
 0x196   :  { %3949 = vmatprep.subr.bf16.mxu1 %v5391_v0 }
 0x199   :  { %3951 = vmatpush3.bf16.msra.mxu1 %v3950_v30  ;;  %v4001_v30 = vpack.c.bf16 %v656_v29, %v655_v28 }
 0x19a   :  { %3952 = vmatprep.subr.bf16.mxu1 %v5391_v0 }
 0x19d   :  { %3954 = vmatpush3.bf16.msra.mxu1 %v3953_v33  ;;  %v4004_v33 = vpack.c.bf16 %v658_v32, %v657_v31 }
 0x19e   :  { %3955 = vmatprep.subr.bf16.mxu1 %v5391_v0 }
 0x1a1   :  { %3957 = vmatpush3.bf16.msra.mxu1 %v3956_v36  ;;  %v4007_v36 = vpack.c.bf16 %v660_v35, %v659_v34 }
 0x1a2   :  { %3958 = vmatprep.subr.bf16.mxu1 %v5391_v0 }
 0x1a5   :  { %3960 = vmatpush3.bf16.msra.mxu1 %v3959_v39  ;;  %v4010_v39 = vpack.c.bf16 %v662_v38, %v661_v37 }
 0x1a6   :  { %3961 = vmatprep.subr.bf16.mxu1 %v5391_v0 }
 0x1a9   :  { %3963 = vmatpush3.bf16.msra.mxu1 %v3962_v42 }
 0x1aa   :  { %3964 = vmatprep.subr.bf16.mxu1 %v5391_v0 }
 0x1ad   :  { %3966 = vmatpush3.bf16.msra.mxu1 %v3965_v50 }
 0x1ae   :  { %3991 = vmatprep.subr.bf16.mxu1 %v5391_v0 }
 0x263   :  { %v357_v44 = vpop.f32.mrb[0].mxu1 }
 0x264   :  { %v358_v45 = vadd.f32 %v2984_v43, %v357_v44  ;;  %v3380_v46 = vpop.f32.mrb[1].mxu1 }
 0x265   :  { %v664_v46 = vld [vmem:[#allocation17 + $0x178] sm:$0xff] }
 0x266   :  { %v361_v47 = vmax.f32 %v358_v45, 0.0  ;;  %v663_v45 = vld [vmem:[#allocation17 + $0x170] sm:$0xff] }
 0x268   :  { %3414 = vmatmul.mubr.f32.vlgmr.msra.gmra.mrb[2].mxu0 %v361_v47  ;;  %v4013_v47 = vpack.c.bf16 %v664_v46, %v663_v45 }
 0x269   :  { %3483 = vmatprep.mubr.msk.f32.mxu0 %vm5392_vm0, %v5393_v1  ;;  %3969 = vmatpush3.bf16.msra.mxu0 %v3968_v54 }
 0x26a   :  { %3970 = vmatprep.subr.bf16.mxu0 %v5391_v0 }
 0x26d   :  { %3972 = vmatpush3.bf16.msra.mxu0 %v3971_v56 }
 0x26e   :  { %3973 = vmatprep.subr.bf16.mxu0 %v5391_v0 }
 0x271   :  { %3975 = vmatpush3.bf16.msra.mxu0 %v3974_v59 }
 0x272   :  { %3976 = vmatprep.subr.bf16.mxu0 %v5391_v0 }
 0x275   :  { %3978 = vmatpush3.bf16.msra.mxu0 %v3977_v62 }
 0x276   :  { %3979 = vmatprep.subr.bf16.mxu0 %v5391_v0 }
 0x279   :  { %3981 = vmatpush3.bf16.msra.mxu0 %v3980_v5 }
 0x27a   :  { %3982 = vmatprep.subr.bf16.mxu0 %v5391_v0 }
 0x27d   :  { %3984 = vmatpush3.bf16.msra.mxu0 %v3983_v8 }
 0x27e   :  { %3985 = vmatprep.subr.bf16.mxu0 %v5391_v0 }
 0x281   :  { %3987 = vmatpush3.bf16.msra.mxu0 %v3986_v11 }
 0x282   :  { %3988 = vmatprep.subr.bf16.mxu0 %v5391_v0 }
 0x285   :  { %3990 = vmatpush3.bf16.msra.mxu0 %v3989_v18 }
 0x33b   :  { %v453_v13 = vpop.f32.mrb[2].mxu0 }
 0x33c   :  { %v454_v14 = vadd.f32 %v2985_v12, %v453_v13  ;;  %v3415_v15 = vpop.f32.mrb[3].mxu0 }
 0x33e   :  { %457 = vst [vmem:[#allocation21] sm:$0xff] %v454_v14  ;;  %3449 = vmatmul.mubr.f32.vlgmr.msra.gmra.mrb[2].mxu1 %v454_v14 }
 0x33f   :  { %3518 = vmatprep.mubr.msk.f32.mxu1 %vm5392_vm0, %v5393_v1  ;;  %3993 = vmatpush3.bf16.msra.mxu1 %v3992_v22 }
 0x340   :  { %3994 = vmatprep.subr.bf16.mxu1 %v5391_v0 }
 0x343   :  { %3996 = vmatpush3.bf16.msra.mxu1 %v3995_v24 }
 0x344   :  { %3997 = vmatprep.subr.bf16.mxu1 %v5391_v0 }
 0x347   :  { %3999 = vmatpush3.bf16.msra.mxu1 %v3998_v27 }
 0x348   :  { %4000 = vmatprep.subr.bf16.mxu1 %v5391_v0 }
 0x34b   :  { %4002 = vmatpush3.bf16.msra.mxu1 %v4001_v30 }
 0x34c   :  { %4003 = vmatprep.subr.bf16.mxu1 %v5391_v0 }
 0x34f   :  { %4005 = vmatpush3.bf16.msra.mxu1 %v4004_v33 }
 0x350   :  { %4006 = vmatprep.subr.bf16.mxu1 %v5391_v0 }
 0x353   :  { %4008 = vmatpush3.bf16.msra.mxu1 %v4007_v36 }
 0x354   :  { %4009 = vmatprep.subr.bf16.mxu1 %v5391_v0 }
 0x357   :  { %4011 = vmatpush3.bf16.msra.mxu1 %v4010_v39 }
 0x358   :  { %4012 = vmatprep.subr.bf16.mxu1 %v5391_v0 }
 0x35b   :  { %4014 = vmatpush3.bf16.msra.mxu1 %v4013_v47 }
 0x411   :  { %v547_v41 = vpop.f32.mrb[2].mxu1 }
 0x412   :  { %v548_v42 = vadd.f32 %v2986_v40, %v547_v41  ;;  %v3450_v43 = vpop.f32.mrb[3].mxu1 }
 0x414   :  { %v551_v44 = vmax.f32 %v548_v42, 0.0 }
 0x416   :  { %3484 = vmatmul.mubr.f32.vlgmr.msra.gmra.mrb[4].mxu0 %v551_v44 }
 0x4e9   :  { %v643_v49 = vpop.f32.mrb[4].mxu0 }
 0x4ea   :  { %v644_v50 = vadd.f32 %v2987_v48, %v643_v49  ;;  %v3485_v51 = vpop.f32.mrb[5].mxu0 }
 0x4ec   :  { %v647_v52 = vmax.f32 %v644_v50, 0.0 }
 0x4ee   :  { %3519 = vmatmul.mubr.f32.vlgmr.msra.gmra.mrb[4].mxu1 %v647_v52 }
 0x4ef   :  { %4880 = shalt.err (!%p4877_p12)  }
 0x4f0   :  { %s4881_s27 = scalar_lea.vmem %s5685_s21, 8192  ;;  %s4885_s10 = scalar_lea.vmem %s5685_s21, 16384 }
 0x4f1   :  { %p4882_p13 = scmp.ne.s32.totalorder %s5685_s21, %s4881_s27  ;;  %p4886_p0 = scmp.lt.s32.totalorder %s5685_s21, %s5685_s21 }
 0x4f2   :  { %p4887_p1 = scmp.lt.s32.totalorder %s4885_s10, %s4881_s27 }
 0x4f4   :  { %p4888_p2 = por %p4887_p1, %p4886_p0 }
 0x4f6   :  { %p5721_p3 = pnand %p4888_p2, %p4882_p13 }
 0x4f8   :  { %4892 = shalt.err (!%p5721_p3)  }
 0x4f9   :  { %159 = dma.hbm_to_vmem [thread:$0]  %s6247_s2, 8192, %s5685_s21, [#allocation4] }
 0x4fa   :  { %s5734_s20 = scalar_lea.hbm %s6251_s6, 2048  ;;  %s5743_s25 = scalar_lea.hbm %s6251_s6, 20480 }
 0x4fb   :  { %p4894_p4 = scmp.ne.s32.totalorder %s6251_s6, %s5734_s20  ;;  %p4896_p5 = scmp.lt.u32.totalorder %s5743_s25, %s5734_s20 }
 0x4fc   :  { %p6262_p6 = scmp.lt.u32.totalorder %s5734_s20, %s6251_s6 }
 0x4fe   :  { %p4898_p7 = por %p6262_p6, %p4896_p5 }
 0x500   :  { %p4899_p8 = pnand %p4898_p7, %p4894_p4 }
 0x502   :  { %4902 = shalt.err (!%p4899_p8)  }
 0x503   :  { %s4903_s17 = scalar_lea.vmem %s5687_s28, 2048  ;;  %s4907_s18 = scalar_lea.vmem %s5687_s28, 4096 }
 0x504   :  { %p4904_p9 = scmp.ne.s32.totalorder %s5687_s28, %s4903_s17  ;;  %p4908_p11 = scmp.lt.s32.totalorder %s5687_s28, %s5687_s28 }
 0x505   :  { %p4909_p12 = scmp.lt.s32.totalorder %s4907_s18, %s4903_s17 }
 0x507   :  { %p4910_p13 = por %p4909_p12, %p4908_p11 }
 0x509   :  { %p5763_p0 = pnand %p4910_p13, %p4904_p9 }
 0x50b   :  { %4914 = shalt.err (!%p5763_p0)  }
 0x50c   :  { %170 = dma.hbm_to_vmem [thread:$0]  %s6251_s6, 2048, %s5687_s28, [#allocation5]  ;;  %v2988_v53 = vld [vmem:[#allocation18 + $0x2] ss:$0 sm:$0xff] }
 0x5c1   :  { %v739_v54 = vpop.f32.mrb[4].mxu1 }
 0x5c2   :  { %v740_v55 = vadd.f32 %v2988_v53, %v739_v54  ;;  %v3520_v56 = vpop.f32.mrb[5].mxu1 }
 0x5c4   :  { %743 = vst [vmem:[#allocation23] sm:$0xff] %v740_v55 }
 0x5c5   :  { %5341 = dma.done.wait [#allocation4], 8192 }
 0x5c6   :  { %5342 = vsyncadd [#allocation4], 4294959104  ;;  %904 = vmatprep.mubr.f32.mxu0 %v5626_v3  ;;  %s5396_s27 = smov [#allocation2 + $0x200]   ;;  %s5779_s30 = scalar_lea.hbm %s6247_s2, 16384 }
 0x5c7   :  { %s760_s5 = sshll.u32 %s5396_s27, 4  ;;  %p4916_p1 = scmp.ne.s32.totalorder %s5692_s8, %s5779_s30  ;;  %s5774_s5 = int_to_ptr.vmem [resolvable:$true] %s760_s5 }
 0x5c8   :  { %p4919_p2 = scmp.lt.u32.totalorder %s5701_s22, %s5779_s30  ;;  %p4921_p5 = scmp.lt.u32.totalorder %s5779_s30, %s5692_s8 }
 0x5ca   :  { %p4920_p4 = por %p4919_p2, %p4875_p10 }
 0x5cc   :  { %p4922_p7 = por %p4921_p5, %p4920_p4 }
 0x5ce   :  { %p4923_p8 = pnand %p4922_p7, %p4916_p1 }
 0x5d0   :  { %4926 = shalt.err (!%p4923_p8)  }
 0x5d1   :  { %s4927_s1 = scalar_lea.vmem %s5774_s5, 8192  ;;  %p4932_p11 = scmp.lt.s32.totalorder %s5774_s5, %s5685_s21 }
 0x5d2   :  { %p4928_p9 = scmp.ne.s32.totalorder %s5774_s5, %s4927_s1  ;;  %p4933_p12 = scmp.lt.s32.totalorder %s4885_s10, %s4927_s1 }
 0x5d4   :  { %p4934_p13 = por %p4933_p12, %p4932_p11 }
 0x5d6   :  { %p5798_p6 = pnand %p4934_p13, %p4928_p9 }
 0x5d8   :  { %4938 = shalt.err (!%p5798_p6)  }
 0x5d9   :  { %763 = dma.hbm_to_vmem [thread:$0]  %s5692_s8, 8192, %s5774_s5, [#allocation4 + $0x1] }
 0x5da   :  { %v765_v3 = vld [vmem:[#allocation2 + $0x8] sm:$0xff]  ;;  %v767_v57 = vld [vmem:[#allocation2 + $0x18] sm:$0xff]  ;;  %v764_v58 = vld [vmem:[#allocation2] sm:$0xff] }
 0x5db   :  { %v4015_v59 = vpack.c.bf16 %v767_v57, %v765_v3  ;;  %v766_v60 = vld [vmem:[#allocation2 + $0x10] sm:$0xff]  ;;  %v769_v61 = vld [vmem:[#allocation2 + $0x28] sm:$0xff]  ;;  %v771_v62 = vld [vmem:[#allocation2 + $0x38] sm:$0xff] }
 0x5dc   :  { %v4017_v63 = vpack.c.bf16 %v766_v60, %v764_v58  ;;  %v4019_v4 = vpack.c.bf16 %v771_v62, %v769_v61  ;;  %v768_v5 = vld [vmem:[#allocation2 + $0x20] sm:$0xff]  ;;  %v770_v6 = vld [vmem:[#allocation2 + $0x30] sm:$0xff]  ;;  %v773_v7 = vld [vmem:[#allocation2 + $0x48] sm:$0xff] }
 0x5dd   :  { %4016 = vmatprep.subr.bf16.mxu0 %v4015_v59  ;;  %v775_v8 = vld [vmem:[#allocation2 + $0x58] sm:$0xff]  ;;  %v4021_v9 = vpack.c.bf16 %v770_v6, %v768_v5  ;;  %v772_v11 = vld [vmem:[#allocation2 + $0x40] sm:$0xff]  ;;  %v774_v12 = vld [vmem:[#allocation2 + $0x50] sm:$0xff] }
 0x5de   :  { %4018 = vmatpush1.bf16.msra.mxu0 %v4017_v63  ;;  %v4023_v10 = vpack.c.bf16 %v775_v8, %v773_v7  ;;  %v777_v13 = vld [vmem:[#allocation2 + $0x68] sm:$0xff]  ;;  %v779_v14 = vld [vmem:[#allocation2 + $0x78] sm:$0xff]  ;;  %v4025_v15 = vpack.c.bf16 %v774_v12, %v772_v11  ;;  %v776_v17 = vld [vmem:[#allocation2 + $0x60] sm:$0xff] }
 0x5df   :  { %4020 = vmatprep.subr.bf16.mxu0 %v4019_v4  ;;  %v4027_v16 = vpack.c.bf16 %v779_v14, %v777_v13  ;;  %v778_v18 = vld [vmem:[#allocation2 + $0x70] sm:$0xff]  ;;  %v781_v19 = vld [vmem:[#allocation2 + $0x88] sm:$0xff]  ;;  %v783_v20 = vld [vmem:[#allocation2 + $0x98] sm:$0xff] }
 0x5e0   :  { %v4029_v21 = vpack.c.bf16 %v778_v18, %v776_v17  ;;  %v4031_v22 = vpack.c.bf16 %v783_v20, %v781_v19  ;;  %v780_v23 = vld [vmem:[#allocation2 + $0x80] sm:$0xff]  ;;  %v782_v24 = vld [vmem:[#allocation2 + $0x90] sm:$0xff]  ;;  %v785_v25 = vld [vmem:[#allocation2 + $0xa8] sm:$0xff] }
 0x5e1   :  { %v787_v26 = vld [vmem:[#allocation2 + $0xb8] sm:$0xff]  ;;  %v4033_v27 = vpack.c.bf16 %v782_v24, %v780_v23  ;;  %v784_v29 = vld [vmem:[#allocation2 + $0xa0] sm:$0xff]  ;;  %v786_v30 = vld [vmem:[#allocation2 + $0xb0] sm:$0xff] }
 0x5e2   :  { %4022 = vmatpush1.bf16.msra.mxu0 %v4021_v9  ;;  %v4035_v28 = vpack.c.bf16 %v787_v26, %v785_v25  ;;  %v789_v31 = vld [vmem:[#allocation2 + $0xc8] sm:$0xff]  ;;  %v791_v32 = vld [vmem:[#allocation2 + $0xd8] sm:$0xff]  ;;  %v4037_v33 = vpack.c.bf16 %v786_v30, %v784_v29  ;;  %v788_v35 = vld [vmem:[#allocation2 + $0xc0] sm:$0xff] }
 0x5e3   :  { %4024 = vmatprep.subr.bf16.mxu0 %v4023_v10  ;;  %v4039_v34 = vpack.c.bf16 %v791_v32, %v789_v31  ;;  %v790_v36 = vld [vmem:[#allocation2 + $0xd0] sm:$0xff]  ;;  %v793_v37 = vld [vmem:[#allocation2 + $0xe8] sm:$0xff]  ;;  %v795_v38 = vld [vmem:[#allocation2 + $0xf8] sm:$0xff]  ;;  %v830_v31 = vlaneseq }
 0x5e4   :  { %v4041_v39 = vpack.c.bf16 %v790_v36, %v788_v35  ;;  %v4043_v40 = vpack.c.bf16 %v795_v38, %v793_v37  ;;  %v792_v41 = vld [vmem:[#allocation2 + $0xe0] sm:$0xff]  ;;  %v794_v42 = vld [vmem:[#allocation2 + $0xf0] sm:$0xff]  ;;  %v797_v43 = vld [vmem:[#allocation2 + $0x108] sm:$0xff] }
 0x5e5   :  { %v799_v44 = vld [vmem:[#allocation2 + $0x118] sm:$0xff]  ;;  %v4045_v45 = vpack.c.bf16 %v794_v42, %v792_v41  ;;  %v796_v47 = vld [vmem:[#allocation2 + $0x100] sm:$0xff]  ;;  %v798_v48 = vld [vmem:[#allocation2 + $0x110] sm:$0xff]  ;;  %v831_v32 = vshrl.u32 %v830_v31, 7 }
 0x5e6   :  { %4026 = vmatpush1.bf16.msra.mxu0 %v4025_v15  ;;  %v4047_v46 = vpack.c.bf16 %v799_v44, %v797_v43  ;;  %v801_v49 = vld [vmem:[#allocation2 + $0x128] sm:$0xff]  ;;  %v803_v50 = vld [vmem:[#allocation2 + $0x138] sm:$0xff]  ;;  %v4049_v51 = vpack.c.bf16 %v798_v48, %v796_v47  ;;  %v800_v53 = vld [vmem:[#allocation2 + $0x120] sm:$0xff] }
 0x5e7   :  { %4028 = vmatprep.subr.bf16.mxu0 %v4027_v16  ;;  %v4051_v52 = vpack.c.bf16 %v803_v50, %v801_v49  ;;  %v802_v54 = vld [vmem:[#allocation2 + $0x130] sm:$0xff]  ;;  %v805_v55 = vld [vmem:[#allocation2 + $0x148] sm:$0xff]  ;;  %v807_v56 = vld [vmem:[#allocation2 + $0x158] sm:$0xff]  ;;  %v5809_v35 = vsub.s32 1, %v831_v32 }
 0x5e8   :  { %v4053_v3 = vpack.c.bf16 %v802_v54, %v800_v53  ;;  %v4055_v57 = vpack.c.bf16 %v807_v56, %v805_v55  ;;  %v804_v58 = vld [vmem:[#allocation2 + $0x140] sm:$0xff]  ;;  %v806_v59 = vld [vmem:[#allocation2 + $0x150] sm:$0xff]  ;;  %v809_v60 = vld [vmem:[#allocation2 + $0x168] sm:$0xff] }
 0x5e9   :  { %v811_v61 = vld [vmem:[#allocation2 + $0x178] sm:$0xff]  ;;  %v4057_v62 = vpack.c.bf16 %v806_v59, %v804_v58  ;;  %v808_v4 = vld [vmem:[#allocation2 + $0x160] sm:$0xff]  ;;  %v810_v5 = vld [vmem:[#allocation2 + $0x170] sm:$0xff] }
 0x5ea   :  { %4030 = vmatpush1.bf16.msra.mxu0 %v4029_v21  ;;  %v4059_v63 = vpack.c.bf16 %v811_v61, %v809_v60  ;;  %v813_v6 = vld [vmem:[#allocation2 + $0x188] sm:$0xff]  ;;  %v815_v7 = vld [vmem:[#allocation2 + $0x198] sm:$0xff]  ;;  %v4061_v8 = vpack.c.bf16 %v810_v5, %v808_v4  ;;  %v812_v10 = vld [vmem:[#allocation2 + $0x180] sm:$0xff] }
 0x5eb   :  { %4032 = vmatprep.subr.bf16.mxu0 %v4031_v22  ;;  %v4063_v9 = vpack.c.bf16 %v815_v7, %v813_v6  ;;  %v814_v11 = vld [vmem:[#allocation2 + $0x190] sm:$0xff]  ;;  %v817_v12 = vld [vmem:[#allocation2 + $0x1a8] sm:$0xff]  ;;  %v819_v13 = vld [vmem:[#allocation2 + $0x1b8] sm:$0xff] }
 0x5ec   :  { %v4065_v14 = vpack.c.bf16 %v814_v11, %v812_v10  ;;  %v4067_v15 = vpack.c.bf16 %v819_v13, %v817_v12  ;;  %v816_v16 = vld [vmem:[#allocation2 + $0x1a0] sm:$0xff]  ;;  %v818_v17 = vld [vmem:[#allocation2 + $0x1b0] sm:$0xff]  ;;  %v821_v18 = vld [vmem:[#allocation2 + $0x1c8] sm:$0xff] }
 0x5ed   :  { %v823_v19 = vld [vmem:[#allocation2 + $0x1d8] sm:$0xff]  ;;  %v4069_v20 = vpack.c.bf16 %v818_v17, %v816_v16  ;;  %v820_v22 = vld [vmem:[#allocation2 + $0x1c0] sm:$0xff]  ;;  %v822_v23 = vld [vmem:[#allocation2 + $0x1d0] sm:$0xff] }
 0x5ee   :  { %4034 = vmatpush1.bf16.msra.mxu0 %v4033_v27  ;;  %v4071_v21 = vpack.c.bf16 %v823_v19, %v821_v18  ;;  %v825_v24 = vld [vmem:[#allocation2 + $0x1e8] sm:$0xff]  ;;  %v827_v25 = vld [vmem:[#allocation2 + $0x1f8] sm:$0xff]  ;;  %v4073_v26 = vpack.c.bf16 %v822_v23, %v820_v22  ;;  %v826_v29 = vld [vmem:[#allocation2 + $0x1f0] sm:$0xff] }
 0x5ef   :  { %4036 = vmatprep.subr.bf16.mxu0 %v4035_v28  ;;  %v4075_v27 = vpack.c.bf16 %v827_v25, %v825_v24  ;;  %v824_v28 = vld [vmem:[#allocation2 + $0x1e0] sm:$0xff] }
 0x5f0   :  { %v4077_v30 = vpack.c.bf16 %v826_v29, %v824_v28 }
 0x5f2   :  { %4038 = vmatpush1.bf16.msra.mxu0 %v4037_v33  ;;  %v5807_v33 = vsub.s32 0, %v831_v32 }
 0x5f3   :  { %4040 = vmatprep.subr.bf16.mxu0 %v4039_v34  ;;  %v828_v34 = vld [vmem:[#allocation6] sm:$0x3] }
 0x5f4   :  { %v833_v36 = vrot.slane %v828_v34, %v5807_v33  ;;  %v837_v37 = vrot.slane %v828_v34, %v5809_v35 }
 0x5f6   :  { %4042 = vmatpush1.bf16.msra.mxu0 %v4041_v39 }
 0x5f7   :  { %4044 = vmatprep.subr.bf16.mxu0 %v4043_v40 }
 0x5fa   :  { %4046 = vmatpush1.bf16.msra.mxu0 %v4045_v45 }
 0x5fb   :  { %4048 = vmatprep.subr.bf16.mxu0 %v4047_v46 }
 0x5fe   :  { %4050 = vmatpush1.bf16.msra.mxu0 %v4049_v51 }
 0x5ff   :  { %4052 = vmatprep.subr.bf16.mxu0 %v4051_v52 }
 0x602   :  { %4054 = vmatpush1.bf16.msra.mxu0 %v4053_v3 }
 0x603   :  { %4056 = vmatprep.subr.bf16.mxu0 %v4055_v57 }
 0x606   :  { %4058 = vmatpush1.bf16.msra.mxu0 %v4057_v62 }
 0x607   :  { %4060 = vmatprep.subr.bf16.mxu0 %v4059_v63 }
 0x60a   :  { %4062 = vmatpush1.bf16.msra.mxu0 %v4061_v8 }
 0x60b   :  { %4064 = vmatprep.subr.bf16.mxu0 %v4063_v9 }
 0x60e   :  { %4066 = vmatpush1.bf16.msra.mxu0 %v4065_v14 }
 0x60f   :  { %4068 = vmatprep.subr.bf16.mxu0 %v4067_v15 }
 0x612   :  { %4070 = vmatpush1.bf16.msra.mxu0 %v4069_v20 }
 0x613   :  { %4072 = vmatprep.subr.bf16.mxu0 %v4071_v21 }
 0x616   :  { %4074 = vmatpush1.bf16.msra.mxu0 %v4073_v26 }
 0x617   :  { %4076 = vmatprep.subr.bf16.mxu0 %v4075_v27 }
 0x61a   :  { %4078 = vmatpush1.bf16.msra.mxu0 %v4077_v30 }
 0x61d   :  { %905 = vmatmul.mubr.f32.vlgmr.msra.gmra.mrb[6].mxu0 %v5621_v2 }
 0x6f0   :  { %v906_v38 = vpop.f32.mrb[6].mxu0 }
 0x6f1   :  { %v5813_v39 = vadd.f32 %v906_v38, %v833_v36  ;;  %v908_v40 = vpop.f32.mrb[7].mxu0 }
 0x6f2   :  { %v909_v41 = vadd.f32 %v908_v40, %v837_v37 }
 0x6f3   :  { %v911_v42 = vmax.f32 %v5813_v39, 0.0 }
 0x6f4   :  { %v912_v43 = vmax.f32 %v909_v41, 0.0 }
 0x6f5   :  { %5343 = dma.done.wait [#allocation4 + $0x1], 8192 }
 0x6f6   :  { %5344 = vsyncadd [#allocation4 + $0x1], 4294959104  ;;  %1068 = vmatprep.mubr.f32.mxu1 %v912_v43  ;;  %s5819_s23 = scalar_lea.hbm %s6247_s2, 24576  ;;  %p4943_p1 = scmp.lt.u32.totalorder %s5779_s30, %s6247_s2 }
 0x6f7   :  { %p4941_p10 = scmp.ne.s32.totalorder %s5779_s30, %s5819_s23  ;;  %p4944_p2 = scmp.lt.u32.totalorder %s5701_s22, %s5819_s23 }
 0x6f8   :  { %p4946_p5 = scmp.lt.u32.totalorder %s5819_s23, %s5779_s30 }
 0x6f9   :  { %p4945_p4 = por %p4944_p2, %p4943_p1 }
 0x6fb   :  { %p4947_p7 = por %p4946_p5, %p4945_p4 }
 0x6fd   :  { %p4948_p8 = pnand %p4947_p7, %p4941_p10 }
 0x6ff   :  { %4951 = shalt.err (!%p4948_p8)  }
 0x700   :  { %4963 = shalt.err (!%p5721_p3)  }
 0x701   :  { %926 = dma.hbm_to_vmem [thread:$0]  %s5779_s30, 8192, %s5685_s21, [#allocation4] }
 0x702   :  { %v928_v2 = vld [vmem:[#allocation2 + $0x208] sm:$0xff]  ;;  %v930_v44 = vld [vmem:[#allocation2 + $0x218] sm:$0xff]  ;;  %v927_v45 = vld [vmem:[#allocation2 + $0x200] sm:$0xff] }
 0x703   :  { %v4079_v46 = vpack.c.bf16 %v930_v44, %v928_v2  ;;  %v929_v47 = vld [vmem:[#allocation2 + $0x210] sm:$0xff]  ;;  %v932_v48 = vld [vmem:[#allocation2 + $0x228] sm:$0xff]  ;;  %v934_v49 = vld [vmem:[#allocation2 + $0x238] sm:$0xff] }
 0x704   :  { %v4081_v50 = vpack.c.bf16 %v929_v47, %v927_v45  ;;  %v4083_v51 = vpack.c.bf16 %v934_v49, %v932_v48  ;;  %v931_v52 = vld [vmem:[#allocation2 + $0x220] sm:$0xff]  ;;  %v933_v53 = vld [vmem:[#allocation2 + $0x230] sm:$0xff]  ;;  %v936_v54 = vld [vmem:[#allocation2 + $0x248] sm:$0xff] }
 0x705   :  { %4080 = vmatprep.subr.bf16.mxu1 %v4079_v46  ;;  %v938_v55 = vld [vmem:[#allocation2 + $0x258] sm:$0xff]  ;;  %v4085_v56 = vpack.c.bf16 %v933_v53, %v931_v52  ;;  %v935_v57 = vld [vmem:[#allocation2 + $0x240] sm:$0xff]  ;;  %v937_v58 = vld [vmem:[#allocation2 + $0x250] sm:$0xff] }
 0x706   :  { %4082 = vmatpush1.bf16.msra.mxu1 %v4081_v50  ;;  %v4087_v3 = vpack.c.bf16 %v938_v55, %v936_v54  ;;  %v940_v59 = vld [vmem:[#allocation2 + $0x268] sm:$0xff]  ;;  %v942_v60 = vld [vmem:[#allocation2 + $0x278] sm:$0xff]  ;;  %v4089_v61 = vpack.c.bf16 %v937_v58, %v935_v57  ;;  %v939_v63 = vld [vmem:[#allocation2 + $0x260] sm:$0xff] }
 0x707   :  { %4084 = vmatprep.subr.bf16.mxu1 %v4083_v51  ;;  %v4091_v62 = vpack.c.bf16 %v942_v60, %v940_v59  ;;  %v941_v4 = vld [vmem:[#allocation2 + $0x270] sm:$0xff]  ;;  %v944_v5 = vld [vmem:[#allocation2 + $0x288] sm:$0xff]  ;;  %v946_v6 = vld [vmem:[#allocation2 + $0x298] sm:$0xff] }
 0x708   :  { %v4093_v7 = vpack.c.bf16 %v941_v4, %v939_v63  ;;  %v4095_v8 = vpack.c.bf16 %v946_v6, %v944_v5  ;;  %v943_v9 = vld [vmem:[#allocation2 + $0x280] sm:$0xff]  ;;  %v945_v10 = vld [vmem:[#allocation2 + $0x290] sm:$0xff]  ;;  %v948_v11 = vld [vmem:[#allocation2 + $0x2a8] sm:$0xff] }
 0x709   :  { %v950_v12 = vld [vmem:[#allocation2 + $0x2b8] sm:$0xff]  ;;  %v4097_v13 = vpack.c.bf16 %v945_v10, %v943_v9  ;;  %v947_v15 = vld [vmem:[#allocation2 + $0x2a0] sm:$0xff]  ;;  %v949_v16 = vld [vmem:[#allocation2 + $0x2b0] sm:$0xff] }
 0x70a   :  { %4086 = vmatpush1.bf16.msra.mxu1 %v4085_v56  ;;  %v4099_v14 = vpack.c.bf16 %v950_v12, %v948_v11  ;;  %v952_v17 = vld [vmem:[#allocation2 + $0x2c8] sm:$0xff]  ;;  %v954_v18 = vld [vmem:[#allocation2 + $0x2d8] sm:$0xff]  ;;  %v4101_v19 = vpack.c.bf16 %v949_v16, %v947_v15  ;;  %v951_v21 = vld [vmem:[#allocation2 + $0x2c0] sm:$0xff] }
 0x70b   :  { %4088 = vmatprep.subr.bf16.mxu1 %v4087_v3  ;;  %v4103_v20 = vpack.c.bf16 %v954_v18, %v952_v17  ;;  %v953_v22 = vld [vmem:[#allocation2 + $0x2d0] sm:$0xff]  ;;  %v956_v23 = vld [vmem:[#allocation2 + $0x2e8] sm:$0xff]  ;;  %v958_v24 = vld [vmem:[#allocation2 + $0x2f8] sm:$0xff] }
 0x70c   :  { %v4105_v25 = vpack.c.bf16 %v953_v22, %v951_v21  ;;  %v4107_v26 = vpack.c.bf16 %v958_v24, %v956_v23  ;;  %v955_v27 = vld [vmem:[#allocation2 + $0x2e0] sm:$0xff]  ;;  %v957_v28 = vld [vmem:[#allocation2 + $0x2f0] sm:$0xff]  ;;  %v960_v29 = vld [vmem:[#allocation2 + $0x308] sm:$0xff] }
 0x70d   :  { %v962_v30 = vld [vmem:[#allocation2 + $0x318] sm:$0xff]  ;;  %v4109_v31 = vpack.c.bf16 %v957_v28, %v955_v27  ;;  %v959_v34 = vld [vmem:[#allocation2 + $0x300] sm:$0xff]  ;;  %v961_v36 = vld [vmem:[#allocation2 + $0x310] sm:$0xff] }
 0x70e   :  { %4090 = vmatpush1.bf16.msra.mxu1 %v4089_v61  ;;  %v4111_v32 = vpack.c.bf16 %v962_v30, %v960_v29  ;;  %v964_v37 = vld [vmem:[#allocation2 + $0x328] sm:$0xff]  ;;  %v966_v38 = vld [vmem:[#allocation2 + $0x338] sm:$0xff]  ;;  %v4113_v40 = vpack.c.bf16 %v961_v36, %v959_v34  ;;  %v963_v43 = vld [vmem:[#allocation2 + $0x320] sm:$0xff] }
 0x70f   :  { %4092 = vmatprep.subr.bf16.mxu1 %v4091_v62  ;;  %v4115_v41 = vpack.c.bf16 %v966_v38, %v964_v37  ;;  %v965_v2 = vld [vmem:[#allocation2 + $0x330] sm:$0xff]  ;;  %v968_v44 = vld [vmem:[#allocation2 + $0x348] sm:$0xff]  ;;  %v970_v45 = vld [vmem:[#allocation2 + $0x358] sm:$0xff] }
 0x710   :  { %v4117_v46 = vpack.c.bf16 %v965_v2, %v963_v43  ;;  %v4119_v47 = vpack.c.bf16 %v970_v45, %v968_v44  ;;  %v967_v48 = vld [vmem:[#allocation2 + $0x340] sm:$0xff]  ;;  %v969_v49 = vld [vmem:[#allocation2 + $0x350] sm:$0xff]  ;;  %v972_v50 = vld [vmem:[#allocation2 + $0x368] sm:$0xff] }
 0x711   :  { %v974_v51 = vld [vmem:[#allocation2 + $0x378] sm:$0xff]  ;;  %v4121_v52 = vpack.c.bf16 %v969_v49, %v967_v48  ;;  %v971_v54 = vld [vmem:[#allocation2 + $0x360] sm:$0xff]  ;;  %v973_v55 = vld [vmem:[#allocation2 + $0x370] sm:$0xff] }
 0x712   :  { %4094 = vmatpush1.bf16.msra.mxu1 %v4093_v7  ;;  %v4123_v53 = vpack.c.bf16 %v974_v51, %v972_v50  ;;  %v976_v56 = vld [vmem:[#allocation2 + $0x388] sm:$0xff]  ;;  %v978_v3 = vld [vmem:[#allocation2 + $0x398] sm:$0xff]  ;;  %v4125_v57 = vpack.c.bf16 %v973_v55, %v971_v54  ;;  %v975_v59 = vld [vmem:[#allocation2 + $0x380] sm:$0xff] }
 0x713   :  { %4096 = vmatprep.subr.bf16.mxu1 %v4095_v8  ;;  %v4127_v58 = vpack.c.bf16 %v978_v3, %v976_v56  ;;  %v977_v60 = vld [vmem:[#allocation2 + $0x390] sm:$0xff]  ;;  %v980_v61 = vld [vmem:[#allocation2 + $0x3a8] sm:$0xff]  ;;  %v982_v62 = vld [vmem:[#allocation2 + $0x3b8] sm:$0xff] }
 0x714   :  { %v4129_v63 = vpack.c.bf16 %v977_v60, %v975_v59  ;;  %v4131_v4 = vpack.c.bf16 %v982_v62, %v980_v61  ;;  %v979_v5 = vld [vmem:[#allocation2 + $0x3a0] sm:$0xff]  ;;  %v981_v6 = vld [vmem:[#allocation2 + $0x3b0] sm:$0xff]  ;;  %v984_v7 = vld [vmem:[#allocation2 + $0x3c8] sm:$0xff] }
 0x715   :  { %v986_v8 = vld [vmem:[#allocation2 + $0x3d8] sm:$0xff]  ;;  %v4133_v9 = vpack.c.bf16 %v981_v6, %v979_v5  ;;  %v983_v11 = vld [vmem:[#allocation2 + $0x3c0] sm:$0xff]  ;;  %v985_v12 = vld [vmem:[#allocation2 + $0x3d0] sm:$0xff] }
 0x716   :  { %4098 = vmatpush1.bf16.msra.mxu1 %v4097_v13  ;;  %v4135_v10 = vpack.c.bf16 %v986_v8, %v984_v7  ;;  %v988_v13 = vld [vmem:[#allocation2 + $0x3e8] sm:$0xff]  ;;  %v4137_v15 = vpack.c.bf16 %v985_v12, %v983_v11  ;;  %v987_v17 = vld [vmem:[#allocation2 + $0x3e0] sm:$0xff]  ;;  %v989_v18 = vld [vmem:[#allocation2 + $0x3f0] sm:$0xff] }
 0x717   :  { %4100 = vmatprep.subr.bf16.mxu1 %v4099_v14  ;;  %v990_v14 = vld [vmem:[#allocation2 + $0x3f8] sm:$0xff] }
 0x718   :  { %v4139_v16 = vpack.c.bf16 %v990_v14, %v988_v13 }
 0x71a   :  { %4102 = vmatpush1.bf16.msra.mxu1 %v4101_v19  ;;  %v4141_v19 = vpack.c.bf16 %v989_v18, %v987_v17 }
 0x71b   :  { %4104 = vmatprep.subr.bf16.mxu1 %v4103_v20  ;;  %v992_v20 = vld [vmem:[#allocation6 + $0x2] sm:$0x3] }
 0x71c   :  { %v997_v21 = vrot.slane %v992_v20, %v5807_v33  ;;  %v1001_v22 = vrot.slane %v992_v20, %v5809_v35 }
 0x71e   :  { %4106 = vmatpush1.bf16.msra.mxu1 %v4105_v25 }
 0x71f   :  { %4108 = vmatprep.subr.bf16.mxu1 %v4107_v26 }
 0x722   :  { %4110 = vmatpush1.bf16.msra.mxu1 %v4109_v31 }
 0x723   :  { %4112 = vmatprep.subr.bf16.mxu1 %v4111_v32 }
 0x726   :  { %4114 = vmatpush1.bf16.msra.mxu1 %v4113_v40 }
 0x727   :  { %4116 = vmatprep.subr.bf16.mxu1 %v4115_v41 }
 0x72a   :  { %4118 = vmatpush1.bf16.msra.mxu1 %v4117_v46 }
 0x72b   :  { %4120 = vmatprep.subr.bf16.mxu1 %v4119_v47 }
 0x72e   :  { %4122 = vmatpush1.bf16.msra.mxu1 %v4121_v52 }
 0x72f   :  { %4124 = vmatprep.subr.bf16.mxu1 %v4123_v53 }
 0x732   :  { %4126 = vmatpush1.bf16.msra.mxu1 %v4125_v57 }
 0x733   :  { %4128 = vmatprep.subr.bf16.mxu1 %v4127_v58 }
 0x736   :  { %4130 = vmatpush1.bf16.msra.mxu1 %v4129_v63 }
 0x737   :  { %4132 = vmatprep.subr.bf16.mxu1 %v4131_v4 }
 0x73a   :  { %4134 = vmatpush1.bf16.msra.mxu1 %v4133_v9 }
 0x73b   :  { %4136 = vmatprep.subr.bf16.mxu1 %v4135_v10 }
 0x73e   :  { %4138 = vmatpush1.bf16.msra.mxu1 %v4137_v15 }
 0x73f   :  { %4140 = vmatprep.subr.bf16.mxu1 %v4139_v16 }
 0x742   :  { %4142 = vmatpush1.bf16.msra.mxu1 %v4141_v19 }
 0x745   :  { %1069 = vmatmul.mubr.f32.vlgmr.msra.gmra.mrb[6].mxu1 %v911_v42 }
 0x818   :  { %v1070_v23 = vpop.f32.mrb[6].mxu1 }
 0x819   :  { %v5839_v24 = vadd.f32 %v1070_v23, %v997_v21  ;;  %v1072_v25 = vpop.f32.mrb[7].mxu1 }
 0x81a   :  { %v1073_v26 = vadd.f32 %v1072_v25, %v1001_v22 }
 0x81b   :  { %v1075_v27 = vmax.f32 %v5839_v24, 0.0 }
 0x81c   :  { %v1076_v28 = vmax.f32 %v1073_v26, 0.0 }
 0x81d   :  { %5345 = dma.done.wait [#allocation4], 8192 }
 0x81e   :  { %5346 = vsyncadd [#allocation4], 4294959104  ;;  %1232 = vmatprep.mubr.f32.mxu0 %v1076_v28  ;;  %s5845_s3 = scalar_lea.hbm %s6247_s2, 32768  ;;  %p4968_p11 = scmp.lt.u32.totalorder %s5819_s23, %s6247_s2 }
 0x81f   :  { %p4966_p9 = scmp.ne.s32.totalorder %s5819_s23, %s5845_s3  ;;  %p4969_p12 = scmp.lt.u32.totalorder %s5701_s22, %s5845_s3 }
 0x820   :  { %p4971_p10 = scmp.lt.u32.totalorder %s5845_s3, %s5819_s23 }
 0x821   :  { %p4970_p13 = por %p4969_p12, %p4968_p11 }
 0x823   :  { %p4972_p1 = por %p4971_p10, %p4970_p13 }
 0x825   :  { %p4973_p2 = pnand %p4972_p1, %p4966_p9 }
 0x827   :  { %4976 = shalt.err (!%p4973_p2)  }
 0x828   :  { %4988 = shalt.err (!%p5798_p6)  }
 0x829   :  { %1090 = dma.hbm_to_vmem [thread:$0]  %s5819_s23, 8192, %s5774_s5, [#allocation4 + $0x1] }
 0x82a   :  { %v1092_v39 = vld [vmem:[#allocation2 + $0x8] sm:$0xff]  ;;  %v1094_v42 = vld [vmem:[#allocation2 + $0x18] sm:$0xff]  ;;  %v1091_v29 = vld [vmem:[#allocation2] sm:$0xff] }
 0x82b   :  { %v4143_v30 = vpack.c.bf16 %v1094_v42, %v1092_v39  ;;  %v1093_v31 = vld [vmem:[#allocation2 + $0x10] sm:$0xff]  ;;  %v1096_v32 = vld [vmem:[#allocation2 + $0x28] sm:$0xff]  ;;  %v1098_v34 = vld [vmem:[#allocation2 + $0x38] sm:$0xff] }
 0x82c   :  { %v4145_v36 = vpack.c.bf16 %v1093_v31, %v1091_v29  ;;  %v4147_v37 = vpack.c.bf16 %v1098_v34, %v1096_v32  ;;  %v1095_v38 = vld [vmem:[#allocation2 + $0x20] sm:$0xff]  ;;  %v1097_v40 = vld [vmem:[#allocation2 + $0x30] sm:$0xff]  ;;  %v1100_v41 = vld [vmem:[#allocation2 + $0x48] sm:$0xff] }
 0x82d   :  { %4144 = vmatprep.subr.bf16.mxu0 %v4143_v30  ;;  %v1102_v43 = vld [vmem:[#allocation2 + $0x58] sm:$0xff]  ;;  %v4149_v2 = vpack.c.bf16 %v1097_v40, %v1095_v38  ;;  %v1099_v45 = vld [vmem:[#allocation2 + $0x40] sm:$0xff]  ;;  %v1101_v46 = vld [vmem:[#allocation2 + $0x50] sm:$0xff] }
 0x82e   :  { %4146 = vmatpush1.bf16.msra.mxu0 %v4145_v36  ;;  %v4151_v44 = vpack.c.bf16 %v1102_v43, %v1100_v41  ;;  %v1104_v47 = vld [vmem:[#allocation2 + $0x68] sm:$0xff]  ;;  %v1106_v48 = vld [vmem:[#allocation2 + $0x78] sm:$0xff]  ;;  %v4153_v49 = vpack.c.bf16 %v1101_v46, %v1099_v45  ;;  %v1103_v51 = vld [vmem:[#allocation2 + $0x60] sm:$0xff] }
 0x82f   :  { %4148 = vmatprep.subr.bf16.mxu0 %v4147_v37  ;;  %v4155_v50 = vpack.c.bf16 %v1106_v48, %v1104_v47  ;;  %v1105_v52 = vld [vmem:[#allocation2 + $0x70] sm:$0xff]  ;;  %v1108_v53 = vld [vmem:[#allocation2 + $0x88] sm:$0xff]  ;;  %v1110_v54 = vld [vmem:[#allocation2 + $0x98] sm:$0xff] }
 0x830   :  { %v4157_v55 = vpack.c.bf16 %v1105_v52, %v1103_v51  ;;  %v4159_v56 = vpack.c.bf16 %v1110_v54, %v1108_v53  ;;  %v1107_v3 = vld [vmem:[#allocation2 + $0x80] sm:$0xff]  ;;  %v1109_v57 = vld [vmem:[#allocation2 + $0x90] sm:$0xff]  ;;  %v1112_v58 = vld [vmem:[#allocation2 + $0xa8] sm:$0xff] }
 0x831   :  { %v1114_v59 = vld [vmem:[#allocation2 + $0xb8] sm:$0xff]  ;;  %v4161_v60 = vpack.c.bf16 %v1109_v57, %v1107_v3  ;;  %v1111_v62 = vld [vmem:[#allocation2 + $0xa0] sm:$0xff]  ;;  %v1113_v63 = vld [vmem:[#allocation2 + $0xb0] sm:$0xff] }
 0x832   :  { %4150 = vmatpush1.bf16.msra.mxu0 %v4149_v2  ;;  %v4163_v61 = vpack.c.bf16 %v1114_v59, %v1112_v58  ;;  %v1116_v4 = vld [vmem:[#allocation2 + $0xc8] sm:$0xff]  ;;  %v1118_v5 = vld [vmem:[#allocation2 + $0xd8] sm:$0xff]  ;;  %v4165_v6 = vpack.c.bf16 %v1113_v63, %v1111_v62  ;;  %v1115_v8 = vld [vmem:[#allocation2 + $0xc0] sm:$0xff] }
 0x833   :  { %4152 = vmatprep.subr.bf16.mxu0 %v4151_v44  ;;  %v4167_v7 = vpack.c.bf16 %v1118_v5, %v1116_v4  ;;  %v1117_v9 = vld [vmem:[#allocation2 + $0xd0] sm:$0xff]  ;;  %v1120_v10 = vld [vmem:[#allocation2 + $0xe8] sm:$0xff]  ;;  %v1122_v11 = vld [vmem:[#allocation2 + $0xf8] sm:$0xff] }
 0x834   :  { %v4169_v12 = vpack.c.bf16 %v1117_v9, %v1115_v8  ;;  %v4171_v13 = vpack.c.bf16 %v1122_v11, %v1120_v10  ;;  %v1119_v14 = vld [vmem:[#allocation2 + $0xe0] sm:$0xff]  ;;  %v1121_v15 = vld [vmem:[#allocation2 + $0xf0] sm:$0xff]  ;;  %v1124_v16 = vld [vmem:[#allocation2 + $0x108] sm:$0xff] }
 0x835   :  { %v1126_v17 = vld [vmem:[#allocation2 + $0x118] sm:$0xff]  ;;  %v4173_v18 = vpack.c.bf16 %v1121_v15, %v1119_v14  ;;  %v1123_v20 = vld [vmem:[#allocation2 + $0x100] sm:$0xff]  ;;  %v1125_v21 = vld [vmem:[#allocation2 + $0x110] sm:$0xff] }
 0x836   :  { %4154 = vmatpush1.bf16.msra.mxu0 %v4153_v49  ;;  %v4175_v19 = vpack.c.bf16 %v1126_v17, %v1124_v16  ;;  %v1128_v22 = vld [vmem:[#allocation2 + $0x128] sm:$0xff]  ;;  %v1130_v23 = vld [vmem:[#allocation2 + $0x138] sm:$0xff]  ;;  %v4177_v25 = vpack.c.bf16 %v1125_v21, %v1123_v20  ;;  %v1127_v28 = vld [vmem:[#allocation2 + $0x120] sm:$0xff] }
 0x837   :  { %4156 = vmatprep.subr.bf16.mxu0 %v4155_v50  ;;  %v4179_v26 = vpack.c.bf16 %v1130_v23, %v1128_v22  ;;  %v1129_v39 = vld [vmem:[#allocation2 + $0x130] sm:$0xff]  ;;  %v1132_v42 = vld [vmem:[#allocation2 + $0x148] sm:$0xff]  ;;  %v1134_v29 = vld [vmem:[#allocation2 + $0x158] sm:$0xff] }
 0x838   :  { %v4181_v30 = vpack.c.bf16 %v1129_v39, %v1127_v28  ;;  %v4183_v31 = vpack.c.bf16 %v1134_v29, %v1132_v42  ;;  %v1131_v32 = vld [vmem:[#allocation2 + $0x140] sm:$0xff]  ;;  %v1133_v34 = vld [vmem:[#allocation2 + $0x150] sm:$0xff]  ;;  %v1136_v36 = vld [vmem:[#allocation2 + $0x168] sm:$0xff] }
 0x839   :  { %v1138_v37 = vld [vmem:[#allocation2 + $0x178] sm:$0xff]  ;;  %v4185_v38 = vpack.c.bf16 %v1133_v34, %v1131_v32  ;;  %v1135_v41 = vld [vmem:[#allocation2 + $0x160] sm:$0xff]  ;;  %v1137_v43 = vld [vmem:[#allocation2 + $0x170] sm:$0xff] }
 0x83a   :  { %4158 = vmatpush1.bf16.msra.mxu0 %v4157_v55  ;;  %v4187_v40 = vpack.c.bf16 %v1138_v37, %v1136_v36  ;;  %v1140_v2 = vld [vmem:[#allocation2 + $0x188] sm:$0xff]  ;;  %v1142_v44 = vld [vmem:[#allocation2 + $0x198] sm:$0xff]  ;;  %v4189_v45 = vpack.c.bf16 %v1137_v43, %v1135_v41  ;;  %v1139_v47 = vld [vmem:[#allocation2 + $0x180] sm:$0xff] }
 0x83b   :  { %4160 = vmatprep.subr.bf16.mxu0 %v4159_v56  ;;  %v4191_v46 = vpack.c.bf16 %v1142_v44, %v1140_v2  ;;  %v1141_v48 = vld [vmem:[#allocation2 + $0x190] sm:$0xff]  ;;  %v1144_v49 = vld [vmem:[#allocation2 + $0x1a8] sm:$0xff]  ;;  %v1146_v50 = vld [vmem:[#allocation2 + $0x1b8] sm:$0xff] }
 0x83c   :  { %v4193_v51 = vpack.c.bf16 %v1141_v48, %v1139_v47  ;;  %v4195_v52 = vpack.c.bf16 %v1146_v50, %v1144_v49  ;;  %v1143_v53 = vld [vmem:[#allocation2 + $0x1a0] sm:$0xff]  ;;  %v1145_v54 = vld [vmem:[#allocation2 + $0x1b0] sm:$0xff]  ;;  %v1148_v55 = vld [vmem:[#allocation2 + $0x1c8] sm:$0xff] }
 0x83d   :  { %v1150_v56 = vld [vmem:[#allocation2 + $0x1d8] sm:$0xff]  ;;  %v4197_v3 = vpack.c.bf16 %v1145_v54, %v1143_v53  ;;  %v1147_v58 = vld [vmem:[#allocation2 + $0x1c0] sm:$0xff]  ;;  %v1149_v59 = vld [vmem:[#allocation2 + $0x1d0] sm:$0xff] }
 0x83e   :  { %4162 = vmatpush1.bf16.msra.mxu0 %v4161_v60  ;;  %v4199_v57 = vpack.c.bf16 %v1150_v56, %v1148_v55  ;;  %v1152_v60 = vld [vmem:[#allocation2 + $0x1e8] sm:$0xff]  ;;  %v4201_v62 = vpack.c.bf16 %v1149_v59, %v1147_v58  ;;  %v1151_v4 = vld [vmem:[#allocation2 + $0x1e0] sm:$0xff]  ;;  %v1153_v5 = vld [vmem:[#allocation2 + $0x1f0] sm:$0xff] }
 0x83f   :  { %4164 = vmatprep.subr.bf16.mxu0 %v4163_v61  ;;  %v1154_v61 = vld [vmem:[#allocation2 + $0x1f8] sm:$0xff] }
 0x840   :  { %v4203_v63 = vpack.c.bf16 %v1154_v61, %v1152_v60 }
 0x842   :  { %4166 = vmatpush1.bf16.msra.mxu0 %v4165_v6  ;;  %v4205_v6 = vpack.c.bf16 %v1153_v5, %v1151_v4 }
 0x843   :  { %4168 = vmatprep.subr.bf16.mxu0 %v4167_v7  ;;  %v1156_v7 = vld [vmem:[#allocation6 + $0x4] sm:$0x3] }
 0x844   :  { %v1161_v8 = vrot.slane %v1156_v7, %v5807_v33  ;;  %v1165_v9 = vrot.slane %v1156_v7, %v5809_v35 }
 0x846   :  { %4170 = vmatpush1.bf16.msra.mxu0 %v4169_v12 }
 0x847   :  { %4172 = vmatprep.subr.bf16.mxu0 %v4171_v13 }
 0x84a   :  { %4174 = vmatpush1.bf16.msra.mxu0 %v4173_v18 }
 0x84b   :  { %4176 = vmatprep.subr.bf16.mxu0 %v4175_v19 }
 0x84e   :  { %4178 = vmatpush1.bf16.msra.mxu0 %v4177_v25 }
 0x84f   :  { %4180 = vmatprep.subr.bf16.mxu0 %v4179_v26 }
 0x852   :  { %4182 = vmatpush1.bf16.msra.mxu0 %v4181_v30 }
 0x853   :  { %4184 = vmatprep.subr.bf16.mxu0 %v4183_v31 }
 0x856   :  { %4186 = vmatpush1.bf16.msra.mxu0 %v4185_v38 }
 0x857   :  { %4188 = vmatprep.subr.bf16.mxu0 %v4187_v40 }
 0x85a   :  { %4190 = vmatpush1.bf16.msra.mxu0 %v4189_v45 }
 0x85b   :  { %4192 = vmatprep.subr.bf16.mxu0 %v4191_v46 }
 0x85e   :  { %4194 = vmatpush1.bf16.msra.mxu0 %v4193_v51 }
 0x85f   :  { %4196 = vmatprep.subr.bf16.mxu0 %v4195_v52 }
 0x862   :  { %4198 = vmatpush1.bf16.msra.mxu0 %v4197_v3 }
 0x863   :  { %4200 = vmatprep.subr.bf16.mxu0 %v4199_v57 }
 0x866   :  { %4202 = vmatpush1.bf16.msra.mxu0 %v4201_v62 }
 0x867   :  { %4204 = vmatprep.subr.bf16.mxu0 %v4203_v63 }
 0x86a   :  { %4206 = vmatpush1.bf16.msra.mxu0 %v4205_v6 }
 0x86d   :  { %1233 = vmatmul.mubr.f32.vlgmr.msra.gmra.mrb[8].mxu0 %v1075_v27 }
 0x940   :  { %v1234_v10 = vpop.f32.mrb[8].mxu0 }
 0x941   :  { %v5865_v11 = vadd.f32 %v1234_v10, %v1161_v8  ;;  %v1236_v12 = vpop.f32.mrb[9].mxu0 }
 0x942   :  { %v1237_v13 = vadd.f32 %v1236_v12, %v1165_v9 }
 0x943   :  { %v1239_v14 = vmax.f32 %v5865_v11, 0.0 }
 0x944   :  { %v1240_v15 = vmax.f32 %v1237_v13, 0.0 }
 0x945   :  { %5347 = dma.done.wait [#allocation4 + $0x1], 8192 }
 0x946   :  { %5348 = vsyncadd [#allocation4 + $0x1], 4294959104  ;;  %1396 = vmatprep.mubr.f32.mxu1 %v1240_v15  ;;  %s5871_s30 = scalar_lea.hbm %s6247_s2, 40960  ;;  %p4993_p5 = scmp.lt.u32.totalorder %s5845_s3, %s6247_s2 }
 0x947   :  { %p4991_p4 = scmp.ne.s32.totalorder %s5845_s3, %s5871_s30  ;;  %p4994_p7 = scmp.lt.u32.totalorder %s5701_s22, %s5871_s30 }
 0x948   :  { %p4996_p9 = scmp.lt.u32.totalorder %s5871_s30, %s5845_s3 }
 0x949   :  { %p4995_p8 = por %p4994_p7, %p4993_p5 }
 0x94b   :  { %p4997_p11 = por %p4996_p9, %p4995_p8 }
 0x94d   :  { %p4998_p12 = pnand %p4997_p11, %p4991_p4 }
 0x94f   :  { %5001 = shalt.err (!%p4998_p12)  }
 0x950   :  { %5013 = shalt.err (!%p5721_p3)  }
 0x951   :  { %1254 = dma.hbm_to_vmem [thread:$0]  %s5845_s3, 8192, %s5685_s21, [#allocation4] }
 0x952   :  { %v1256_v24 = vld [vmem:[#allocation2 + $0x208] sm:$0xff]  ;;  %v1258_v27 = vld [vmem:[#allocation2 + $0x218] sm:$0xff]  ;;  %v1255_v16 = vld [vmem:[#allocation2 + $0x200] sm:$0xff] }
 0x953   :  { %v4207_v17 = vpack.c.bf16 %v1258_v27, %v1256_v24  ;;  %v1257_v18 = vld [vmem:[#allocation2 + $0x210] sm:$0xff]  ;;  %v1260_v19 = vld [vmem:[#allocation2 + $0x228] sm:$0xff]  ;;  %v1262_v20 = vld [vmem:[#allocation2 + $0x238] sm:$0xff] }
 0x954   :  { %v4209_v21 = vpack.c.bf16 %v1257_v18, %v1255_v16  ;;  %v4211_v22 = vpack.c.bf16 %v1262_v20, %v1260_v19  ;;  %v1259_v23 = vld [vmem:[#allocation2 + $0x220] sm:$0xff]  ;;  %v1261_v25 = vld [vmem:[#allocation2 + $0x230] sm:$0xff]  ;;  %v1264_v26 = vld [vmem:[#allocation2 + $0x248] sm:$0xff] }
 0x955   :  { %4208 = vmatprep.subr.bf16.mxu1 %v4207_v17  ;;  %v1266_v28 = vld [vmem:[#allocation2 + $0x258] sm:$0xff]  ;;  %v4213_v39 = vpack.c.bf16 %v1261_v25, %v1259_v23  ;;  %v1263_v29 = vld [vmem:[#allocation2 + $0x240] sm:$0xff]  ;;  %v1265_v30 = vld [vmem:[#allocation2 + $0x250] sm:$0xff] }
 0x956   :  { %4210 = vmatpush1.bf16.msra.mxu1 %v4209_v21  ;;  %v4215_v42 = vpack.c.bf16 %v1266_v28, %v1264_v26  ;;  %v1268_v31 = vld [vmem:[#allocation2 + $0x268] sm:$0xff]  ;;  %v1270_v32 = vld [vmem:[#allocation2 + $0x278] sm:$0xff]  ;;  %v4217_v34 = vpack.c.bf16 %v1265_v30, %v1263_v29  ;;  %v1267_v37 = vld [vmem:[#allocation2 + $0x260] sm:$0xff] }
 0x957   :  { %4212 = vmatprep.subr.bf16.mxu1 %v4211_v22  ;;  %v4219_v36 = vpack.c.bf16 %v1270_v32, %v1268_v31  ;;  %v1269_v38 = vld [vmem:[#allocation2 + $0x270] sm:$0xff]  ;;  %v1272_v40 = vld [vmem:[#allocation2 + $0x288] sm:$0xff]  ;;  %v1274_v41 = vld [vmem:[#allocation2 + $0x298] sm:$0xff] }
 0x958   :  { %v4221_v43 = vpack.c.bf16 %v1269_v38, %v1267_v37  ;;  %v4223_v2 = vpack.c.bf16 %v1274_v41, %v1272_v40  ;;  %v1271_v44 = vld [vmem:[#allocation2 + $0x280] sm:$0xff]  ;;  %v1273_v45 = vld [vmem:[#allocation2 + $0x290] sm:$0xff]  ;;  %v1276_v46 = vld [vmem:[#allocation2 + $0x2a8] sm:$0xff] }
 0x959   :  { %v1278_v47 = vld [vmem:[#allocation2 + $0x2b8] sm:$0xff]  ;;  %v4225_v48 = vpack.c.bf16 %v1273_v45, %v1271_v44  ;;  %v1275_v50 = vld [vmem:[#allocation2 + $0x2a0] sm:$0xff]  ;;  %v1277_v51 = vld [vmem:[#allocation2 + $0x2b0] sm:$0xff] }
 0x95a   :  { %4214 = vmatpush1.bf16.msra.mxu1 %v4213_v39  ;;  %v4227_v49 = vpack.c.bf16 %v1278_v47, %v1276_v46  ;;  %v1280_v52 = vld [vmem:[#allocation2 + $0x2c8] sm:$0xff]  ;;  %v1282_v53 = vld [vmem:[#allocation2 + $0x2d8] sm:$0xff]  ;;  %v4229_v54 = vpack.c.bf16 %v1277_v51, %v1275_v50  ;;  %v1279_v56 = vld [vmem:[#allocation2 + $0x2c0] sm:$0xff] }
 0x95b   :  { %4216 = vmatprep.subr.bf16.mxu1 %v4215_v42  ;;  %v4231_v55 = vpack.c.bf16 %v1282_v53, %v1280_v52  ;;  %v1281_v3 = vld [vmem:[#allocation2 + $0x2d0] sm:$0xff]  ;;  %v1284_v57 = vld [vmem:[#allocation2 + $0x2e8] sm:$0xff]  ;;  %v1286_v58 = vld [vmem:[#allocation2 + $0x2f8] sm:$0xff] }
 0x95c   :  { %v4233_v59 = vpack.c.bf16 %v1281_v3, %v1279_v56  ;;  %v4235_v60 = vpack.c.bf16 %v1286_v58, %v1284_v57  ;;  %v1283_v61 = vld [vmem:[#allocation2 + $0x2e0] sm:$0xff]  ;;  %v1285_v62 = vld [vmem:[#allocation2 + $0x2f0] sm:$0xff]  ;;  %v1288_v63 = vld [vmem:[#allocation2 + $0x308] sm:$0xff] }
 0x95d   :  { %v1290_v4 = vld [vmem:[#allocation2 + $0x318] sm:$0xff]  ;;  %v4237_v5 = vpack.c.bf16 %v1285_v62, %v1283_v61  ;;  %v1287_v7 = vld [vmem:[#allocation2 + $0x300] sm:$0xff]  ;;  %v1289_v8 = vld [vmem:[#allocation2 + $0x310] sm:$0xff] }
 0x95e   :  { %4218 = vmatpush1.bf16.msra.mxu1 %v4217_v34  ;;  %v4239_v6 = vpack.c.bf16 %v1290_v4, %v1288_v63  ;;  %v1292_v9 = vld [vmem:[#allocation2 + $0x328] sm:$0xff]  ;;  %v1294_v10 = vld [vmem:[#allocation2 + $0x338] sm:$0xff]  ;;  %v4241_v12 = vpack.c.bf16 %v1289_v8, %v1287_v7  ;;  %v1291_v15 = vld [vmem:[#allocation2 + $0x320] sm:$0xff] }
 0x95f   :  { %4220 = vmatprep.subr.bf16.mxu1 %v4219_v36  ;;  %v4243_v13 = vpack.c.bf16 %v1294_v10, %v1292_v9  ;;  %v1293_v24 = vld [vmem:[#allocation2 + $0x330] sm:$0xff]  ;;  %v1296_v27 = vld [vmem:[#allocation2 + $0x348] sm:$0xff]  ;;  %v1298_v16 = vld [vmem:[#allocation2 + $0x358] sm:$0xff] }
 0x960   :  { %v4245_v17 = vpack.c.bf16 %v1293_v24, %v1291_v15  ;;  %v4247_v18 = vpack.c.bf16 %v1298_v16, %v1296_v27  ;;  %v1295_v19 = vld [vmem:[#allocation2 + $0x340] sm:$0xff]  ;;  %v1297_v20 = vld [vmem:[#allocation2 + $0x350] sm:$0xff]  ;;  %v1300_v21 = vld [vmem:[#allocation2 + $0x368] sm:$0xff] }
 0x961   :  { %v1302_v22 = vld [vmem:[#allocation2 + $0x378] sm:$0xff]  ;;  %v4249_v23 = vpack.c.bf16 %v1297_v20, %v1295_v19  ;;  %v1299_v26 = vld [vmem:[#allocation2 + $0x360] sm:$0xff]  ;;  %v1301_v28 = vld [vmem:[#allocation2 + $0x370] sm:$0xff] }
 0x962   :  { %4222 = vmatpush1.bf16.msra.mxu1 %v4221_v43  ;;  %v4251_v25 = vpack.c.bf16 %v1302_v22, %v1300_v21  ;;  %v1304_v39 = vld [vmem:[#allocation2 + $0x388] sm:$0xff]  ;;  %v1306_v42 = vld [vmem:[#allocation2 + $0x398] sm:$0xff]  ;;  %v4253_v29 = vpack.c.bf16 %v1301_v28, %v1299_v26  ;;  %v1303_v31 = vld [vmem:[#allocation2 + $0x380] sm:$0xff] }
 0x963   :  { %4224 = vmatprep.subr.bf16.mxu1 %v4223_v2  ;;  %v4255_v30 = vpack.c.bf16 %v1306_v42, %v1304_v39  ;;  %v1305_v32 = vld [vmem:[#allocation2 + $0x390] sm:$0xff]  ;;  %v1308_v34 = vld [vmem:[#allocation2 + $0x3a8] sm:$0xff]  ;;  %v1310_v36 = vld [vmem:[#allocation2 + $0x3b8] sm:$0xff] }
 0x964   :  { %v4257_v37 = vpack.c.bf16 %v1305_v32, %v1303_v31  ;;  %v4259_v38 = vpack.c.bf16 %v1310_v36, %v1308_v34  ;;  %v1307_v40 = vld [vmem:[#allocation2 + $0x3a0] sm:$0xff]  ;;  %v1309_v41 = vld [vmem:[#allocation2 + $0x3b0] sm:$0xff]  ;;  %v1312_v43 = vld [vmem:[#allocation2 + $0x3c8] sm:$0xff] }
 0x965   :  { %v1314_v2 = vld [vmem:[#allocation2 + $0x3d8] sm:$0xff]  ;;  %v4261_v44 = vpack.c.bf16 %v1309_v41, %v1307_v40  ;;  %v1311_v46 = vld [vmem:[#allocation2 + $0x3c0] sm:$0xff]  ;;  %v1313_v47 = vld [vmem:[#allocation2 + $0x3d0] sm:$0xff] }
 0x966   :  { %4226 = vmatpush1.bf16.msra.mxu1 %v4225_v48  ;;  %v4263_v45 = vpack.c.bf16 %v1314_v2, %v1312_v43  ;;  %v1316_v48 = vld [vmem:[#allocation2 + $0x3e8] sm:$0xff]  ;;  %v4265_v50 = vpack.c.bf16 %v1313_v47, %v1311_v46  ;;  %v1315_v52 = vld [vmem:[#allocation2 + $0x3e0] sm:$0xff]  ;;  %v1317_v53 = vld [vmem:[#allocation2 + $0x3f0] sm:$0xff] }
 0x967   :  { %4228 = vmatprep.subr.bf16.mxu1 %v4227_v49  ;;  %v1318_v49 = vld [vmem:[#allocation2 + $0x3f8] sm:$0xff] }
 0x968   :  { %v4267_v51 = vpack.c.bf16 %v1318_v49, %v1316_v48 }
 0x96a   :  { %4230 = vmatpush1.bf16.msra.mxu1 %v4229_v54  ;;  %v4269_v54 = vpack.c.bf16 %v1317_v53, %v1315_v52 }
 0x96b   :  { %4232 = vmatprep.subr.bf16.mxu1 %v4231_v55  ;;  %v1320_v55 = vld [vmem:[#allocation6 + $0x6] sm:$0x3] }
 0x96c   :  { %v1325_v56 = vrot.slane %v1320_v55, %v5807_v33  ;;  %v1329_v3 = vrot.slane %v1320_v55, %v5809_v35 }
 0x96e   :  { %4234 = vmatpush1.bf16.msra.mxu1 %v4233_v59 }
 0x96f   :  { %4236 = vmatprep.subr.bf16.mxu1 %v4235_v60 }
 0x972   :  { %4238 = vmatpush1.bf16.msra.mxu1 %v4237_v5 }
 0x973   :  { %4240 = vmatprep.subr.bf16.mxu1 %v4239_v6 }
 0x976   :  { %4242 = vmatpush1.bf16.msra.mxu1 %v4241_v12 }
 0x977   :  { %4244 = vmatprep.subr.bf16.mxu1 %v4243_v13 }
 0x97a   :  { %4246 = vmatpush1.bf16.msra.mxu1 %v4245_v17 }
 0x97b   :  { %4248 = vmatprep.subr.bf16.mxu1 %v4247_v18 }
 0x97e   :  { %4250 = vmatpush1.bf16.msra.mxu1 %v4249_v23 }
 0x97f   :  { %4252 = vmatprep.subr.bf16.mxu1 %v4251_v25 }
 0x982   :  { %4254 = vmatpush1.bf16.msra.mxu1 %v4253_v29 }
 0x983   :  { %4256 = vmatprep.subr.bf16.mxu1 %v4255_v30 }
 0x986   :  { %4258 = vmatpush1.bf16.msra.mxu1 %v4257_v37 }
 0x987   :  { %4260 = vmatprep.subr.bf16.mxu1 %v4259_v38 }
 0x98a   :  { %4262 = vmatpush1.bf16.msra.mxu1 %v4261_v44 }
 0x98b   :  { %4264 = vmatprep.subr.bf16.mxu1 %v4263_v45 }
 0x98e   :  { %4266 = vmatpush1.bf16.msra.mxu1 %v4265_v50 }
 0x98f   :  { %4268 = vmatprep.subr.bf16.mxu1 %v4267_v51 }
 0x992   :  { %4270 = vmatpush1.bf16.msra.mxu1 %v4269_v54 }
 0x995   :  { %1397 = vmatmul.mubr.f32.vlgmr.msra.gmra.mrb[8].mxu1 %v1239_v14 }
 0xa68   :  { %v1398_v57 = vpop.f32.mrb[8].mxu1 }
 0xa69   :  { %v5894_v58 = vadd.f32 %v1398_v57, %v1325_v56  ;;  %v1400_v59 = vpop.f32.mrb[9].mxu1 }
 0xa6a   :  { %v1401_v60 = vadd.f32 %v1400_v59, %v1329_v3 }
 0xa6b   :  { %v1403_v61 = vmax.f32 %v5894_v58, 0.0 }
 0xa6c   :  { %v1404_v62 = vmax.f32 %v1401_v60, 0.0 }
 0xa6d   :  { %5349 = dma.done.wait [#allocation4], 8192 }
 0xa6e   :  { %5350 = vsyncadd [#allocation4], 4294959104  ;;  %1560 = vmatprep.mubr.f32.mxu0 %v1404_v62  ;;  %p5016_p3 = scmp.ne.s32.totalorder %s5871_s30, %s5701_s22  ;;  %p5018_p13 = scmp.lt.u32.totalorder %s5871_s30, %s6247_s2 }
 0xa6f   :  { %p5019_p10 = scmp.lt.u32.totalorder %s5701_s22, %s5701_s22 }
 0xa71   :  { %p5020_p1 = por %p5019_p10, %p5018_p13 }
 0xa73   :  { %p5022_p2 = por %p5020_p1, %p4994_p7 }
 0xa75   :  { %p5023_p4 = pnand %p5022_p2, %p5016_p3 }
 0xa77   :  { %5026 = shalt.err (!%p5023_p4)  }
 0xa78   :  { %5038 = shalt.err (!%p5798_p6)  }
 0xa79   :  { %1418 = dma.hbm_to_vmem [thread:$0]  %s5871_s30, 8192, %s5774_s5, [#allocation4 + $0x1] }
 0xa7a   :  { %v1420_v11 = vld [vmem:[#allocation2 + $0x8] sm:$0xff]  ;;  %v1422_v14 = vld [vmem:[#allocation2 + $0x18] sm:$0xff]  ;;  %v1419_v63 = vld [vmem:[#allocation2] sm:$0xff] }
 0xa7b   :  { %v4271_v4 = vpack.c.bf16 %v1422_v14, %v1420_v11  ;;  %v1421_v5 = vld [vmem:[#allocation2 + $0x10] sm:$0xff]  ;;  %v1424_v6 = vld [vmem:[#allocation2 + $0x28] sm:$0xff]  ;;  %v1426_v7 = vld [vmem:[#allocation2 + $0x38] sm:$0xff] }
 0xa7c   :  { %v4273_v8 = vpack.c.bf16 %v1421_v5, %v1419_v63  ;;  %v4275_v9 = vpack.c.bf16 %v1426_v7, %v1424_v6  ;;  %v1423_v10 = vld [vmem:[#allocation2 + $0x20] sm:$0xff]  ;;  %v1425_v12 = vld [vmem:[#allocation2 + $0x30] sm:$0xff]  ;;  %v1428_v13 = vld [vmem:[#allocation2 + $0x48] sm:$0xff] }
 0xa7d   :  { %4272 = vmatprep.subr.bf16.mxu0 %v4271_v4  ;;  %v1430_v15 = vld [vmem:[#allocation2 + $0x58] sm:$0xff]  ;;  %v4277_v24 = vpack.c.bf16 %v1425_v12, %v1423_v10  ;;  %v1427_v16 = vld [vmem:[#allocation2 + $0x40] sm:$0xff]  ;;  %v1429_v17 = vld [vmem:[#allocation2 + $0x50] sm:$0xff] }
 0xa7e   :  { %4274 = vmatpush1.bf16.msra.mxu0 %v4273_v8  ;;  %v4279_v27 = vpack.c.bf16 %v1430_v15, %v1428_v13  ;;  %v1432_v18 = vld [vmem:[#allocation2 + $0x68] sm:$0xff]  ;;  %v1434_v19 = vld [vmem:[#allocation2 + $0x78] sm:$0xff]  ;;  %v4281_v20 = vpack.c.bf16 %v1429_v17, %v1427_v16  ;;  %v1431_v22 = vld [vmem:[#allocation2 + $0x60] sm:$0xff] }
 0xa7f   :  { %4276 = vmatprep.subr.bf16.mxu0 %v4275_v9  ;;  %v4283_v21 = vpack.c.bf16 %v1434_v19, %v1432_v18  ;;  %v1433_v23 = vld [vmem:[#allocation2 + $0x70] sm:$0xff]  ;;  %v1436_v25 = vld [vmem:[#allocation2 + $0x88] sm:$0xff]  ;;  %v1438_v26 = vld [vmem:[#allocation2 + $0x98] sm:$0xff] }
 0xa80   :  { %v4285_v28 = vpack.c.bf16 %v1433_v23, %v1431_v22  ;;  %v4287_v39 = vpack.c.bf16 %v1438_v26, %v1436_v25  ;;  %v1435_v42 = vld [vmem:[#allocation2 + $0x80] sm:$0xff]  ;;  %v1437_v29 = vld [vmem:[#allocation2 + $0x90] sm:$0xff]  ;;  %v1440_v30 = vld [vmem:[#allocation2 + $0xa8] sm:$0xff] }
 0xa81   :  { %v1442_v31 = vld [vmem:[#allocation2 + $0xb8] sm:$0xff]  ;;  %v4289_v32 = vpack.c.bf16 %v1437_v29, %v1435_v42  ;;  %v1439_v36 = vld [vmem:[#allocation2 + $0xa0] sm:$0xff]  ;;  %v1441_v37 = vld [vmem:[#allocation2 + $0xb0] sm:$0xff] }
 0xa82   :  { %4278 = vmatpush1.bf16.msra.mxu0 %v4277_v24  ;;  %v4291_v34 = vpack.c.bf16 %v1442_v31, %v1440_v30  ;;  %v1444_v38 = vld [vmem:[#allocation2 + $0xc8] sm:$0xff]  ;;  %v1446_v40 = vld [vmem:[#allocation2 + $0xd8] sm:$0xff]  ;;  %v4293_v41 = vpack.c.bf16 %v1441_v37, %v1439_v36  ;;  %v1443_v2 = vld [vmem:[#allocation2 + $0xc0] sm:$0xff] }
 0xa83   :  { %4280 = vmatprep.subr.bf16.mxu0 %v4279_v27  ;;  %v4295_v43 = vpack.c.bf16 %v1446_v40, %v1444_v38  ;;  %v1445_v44 = vld [vmem:[#allocation2 + $0xd0] sm:$0xff]  ;;  %v1448_v45 = vld [vmem:[#allocation2 + $0xe8] sm:$0xff]  ;;  %v1450_v46 = vld [vmem:[#allocation2 + $0xf8] sm:$0xff] }
 0xa84   :  { %v4297_v47 = vpack.c.bf16 %v1445_v44, %v1443_v2  ;;  %v4299_v48 = vpack.c.bf16 %v1450_v46, %v1448_v45  ;;  %v1447_v49 = vld [vmem:[#allocation2 + $0xe0] sm:$0xff]  ;;  %v1449_v50 = vld [vmem:[#allocation2 + $0xf0] sm:$0xff]  ;;  %v1452_v51 = vld [vmem:[#allocation2 + $0x108] sm:$0xff] }
 0xa85   :  { %v1454_v52 = vld [vmem:[#allocation2 + $0x118] sm:$0xff]  ;;  %v4301_v53 = vpack.c.bf16 %v1449_v50, %v1447_v49  ;;  %v1451_v55 = vld [vmem:[#allocation2 + $0x100] sm:$0xff]  ;;  %v1453_v56 = vld [vmem:[#allocation2 + $0x110] sm:$0xff] }
 0xa86   :  { %4282 = vmatpush1.bf16.msra.mxu0 %v4281_v20  ;;  %v4303_v54 = vpack.c.bf16 %v1454_v52, %v1452_v51  ;;  %v1456_v3 = vld [vmem:[#allocation2 + $0x128] sm:$0xff]  ;;  %v1458_v57 = vld [vmem:[#allocation2 + $0x138] sm:$0xff]  ;;  %v4305_v59 = vpack.c.bf16 %v1453_v56, %v1451_v55  ;;  %v1455_v62 = vld [vmem:[#allocation2 + $0x120] sm:$0xff] }
 0xa87   :  { %4284 = vmatprep.subr.bf16.mxu0 %v4283_v21  ;;  %v4307_v60 = vpack.c.bf16 %v1458_v57, %v1456_v3  ;;  %v1457_v11 = vld [vmem:[#allocation2 + $0x130] sm:$0xff]  ;;  %v1460_v14 = vld [vmem:[#allocation2 + $0x148] sm:$0xff]  ;;  %v1462_v63 = vld [vmem:[#allocation2 + $0x158] sm:$0xff] }
 0xa88   :  { %v4309_v4 = vpack.c.bf16 %v1457_v11, %v1455_v62  ;;  %v4311_v5 = vpack.c.bf16 %v1462_v63, %v1460_v14  ;;  %v1459_v6 = vld [vmem:[#allocation2 + $0x140] sm:$0xff]  ;;  %v1461_v7 = vld [vmem:[#allocation2 + $0x150] sm:$0xff]  ;;  %v1464_v8 = vld [vmem:[#allocation2 + $0x168] sm:$0xff] }
 0xa89   :  { %v1466_v9 = vld [vmem:[#allocation2 + $0x178] sm:$0xff]  ;;  %v4313_v10 = vpack.c.bf16 %v1461_v7, %v1459_v6  ;;  %v1463_v13 = vld [vmem:[#allocation2 + $0x160] sm:$0xff]  ;;  %v1465_v15 = vld [vmem:[#allocation2 + $0x170] sm:$0xff] }
 0xa8a   :  { %4286 = vmatpush1.bf16.msra.mxu0 %v4285_v28  ;;  %v4315_v12 = vpack.c.bf16 %v1466_v9, %v1464_v8  ;;  %v1468_v24 = vld [vmem:[#allocation2 + $0x188] sm:$0xff]  ;;  %v1470_v27 = vld [vmem:[#allocation2 + $0x198] sm:$0xff]  ;;  %v4317_v16 = vpack.c.bf16 %v1465_v15, %v1463_v13  ;;  %v1467_v18 = vld [vmem:[#allocation2 + $0x180] sm:$0xff] }
 0xa8b   :  { %4288 = vmatprep.subr.bf16.mxu0 %v4287_v39  ;;  %v4319_v17 = vpack.c.bf16 %v1470_v27, %v1468_v24  ;;  %v1469_v19 = vld [vmem:[#allocation2 + $0x190] sm:$0xff]  ;;  %v1472_v20 = vld [vmem:[#allocation2 + $0x1a8] sm:$0xff]  ;;  %v1474_v21 = vld [vmem:[#allocation2 + $0x1b8] sm:$0xff] }
 0xa8c   :  { %v4321_v22 = vpack.c.bf16 %v1469_v19, %v1467_v18  ;;  %v4323_v23 = vpack.c.bf16 %v1474_v21, %v1472_v20  ;;  %v1471_v25 = vld [vmem:[#allocation2 + $0x1a0] sm:$0xff]  ;;  %v1473_v26 = vld [vmem:[#allocation2 + $0x1b0] sm:$0xff]  ;;  %v1476_v28 = vld [vmem:[#allocation2 + $0x1c8] sm:$0xff] }
 0xa8d   :  { %v1478_v39 = vld [vmem:[#allocation2 + $0x1d8] sm:$0xff]  ;;  %v4325_v42 = vpack.c.bf16 %v1473_v26, %v1471_v25  ;;  %v1475_v30 = vld [vmem:[#allocation2 + $0x1c0] sm:$0xff]  ;;  %v1477_v31 = vld [vmem:[#allocation2 + $0x1d0] sm:$0xff] }
 0xa8e   :  { %4290 = vmatpush1.bf16.msra.mxu0 %v4289_v32  ;;  %v4327_v29 = vpack.c.bf16 %v1478_v39, %v1476_v28  ;;  %v1480_v32 = vld [vmem:[#allocation2 + $0x1e8] sm:$0xff]  ;;  %v4329_v36 = vpack.c.bf16 %v1477_v31, %v1475_v30  ;;  %v1479_v38 = vld [vmem:[#allocation2 + $0x1e0] sm:$0xff]  ;;  %v1481_v40 = vld [vmem:[#allocation2 + $0x1f0] sm:$0xff] }
 0xa8f   :  { %4292 = vmatprep.subr.bf16.mxu0 %v4291_v34  ;;  %v1482_v34 = vld [vmem:[#allocation2 + $0x1f8] sm:$0xff] }
 0xa90   :  { %v4331_v37 = vpack.c.bf16 %v1482_v34, %v1480_v32 }
 0xa92   :  { %4294 = vmatpush1.bf16.msra.mxu0 %v4293_v41  ;;  %v4333_v41 = vpack.c.bf16 %v1481_v40, %v1479_v38 }
 0xa93   :  { %4296 = vmatprep.subr.bf16.mxu0 %v4295_v43  ;;  %v1484_v43 = vld [vmem:[#allocation6 + $0x8] sm:$0x3] }
 0xa94   :  { %v1489_v2 = vrot.slane %v1484_v43, %v5807_v33  ;;  %v1493_v44 = vrot.slane %v1484_v43, %v5809_v35 }
 0xa96   :  { %4298 = vmatpush1.bf16.msra.mxu0 %v4297_v47 }
 0xa97   :  { %4300 = vmatprep.subr.bf16.mxu0 %v4299_v48 }
 0xa9a   :  { %4302 = vmatpush1.bf16.msra.mxu0 %v4301_v53 }
 0xa9b   :  { %4304 = vmatprep.subr.bf16.mxu0 %v4303_v54 }
 0xa9e   :  { %4306 = vmatpush1.bf16.msra.mxu0 %v4305_v59 }
 0xa9f   :  { %4308 = vmatprep.subr.bf16.mxu0 %v4307_v60 }
 0xaa2   :  { %4310 = vmatpush1.bf16.msra.mxu0 %v4309_v4 }
 0xaa3   :  { %4312 = vmatprep.subr.bf16.mxu0 %v4311_v5 }
 0xaa6   :  { %4314 = vmatpush1.bf16.msra.mxu0 %v4313_v10 }
 0xaa7   :  { %4316 = vmatprep.subr.bf16.mxu0 %v4315_v12 }
 0xaaa   :  { %4318 = vmatpush1.bf16.msra.mxu0 %v4317_v16 }
 0xaab   :  { %4320 = vmatprep.subr.bf16.mxu0 %v4319_v17 }
 0xaae   :  { %4322 = vmatpush1.bf16.msra.mxu0 %v4321_v22 }
 0xaaf   :  { %4324 = vmatprep.subr.bf16.mxu0 %v4323_v23 }
 0xab2   :  { %4326 = vmatpush1.bf16.msra.mxu0 %v4325_v42 }
 0xab3   :  { %4328 = vmatprep.subr.bf16.mxu0 %v4327_v29 }
 0xab6   :  { %4330 = vmatpush1.bf16.msra.mxu0 %v4329_v36 }
 0xab7   :  { %4332 = vmatprep.subr.bf16.mxu0 %v4331_v37 }
 0xaba   :  { %4334 = vmatpush1.bf16.msra.mxu0 %v4333_v41 }
 0xabd   :  { %1561 = vmatmul.mubr.f32.vlgmr.msra.gmra.mrb[10].mxu0 %v1403_v61 }
 0xb90   :  { %v1562_v45 = vpop.f32.mrb[10].mxu0 }
 0xb91   :  { %v5916_v46 = vadd.f32 %v1562_v45, %v1489_v2  ;;  %v1564_v47 = vpop.f32.mrb[11].mxu0 }
 0xb92   :  { %v1565_v48 = vadd.f32 %v1564_v47, %v1493_v44 }
 0xb93   :  { %v1567_v49 = vmax.f32 %v5916_v46, 0.0 }
 0xb94   :  { %v1568_v50 = vmax.f32 %v1565_v48, 0.0 }
 0xb95   :  { %5351 = dma.done.wait [#allocation4 + $0x1], 8192 }
 0xb96   :  { %5352 = vsyncadd [#allocation4 + $0x1], 4294959104  ;;  %1712 = vmatprep.mubr.f32.mxu1 %v1568_v50  ;;  %v1572_v51 = vld [vmem:[#allocation2 + $0x208] sm:$0xff]  ;;  %v1574_v52 = vld [vmem:[#allocation2 + $0x218] sm:$0xff] }
 0xb97   :  { %v1571_v58 = vld [vmem:[#allocation2 + $0x200] sm:$0xff]  ;;  %v4335_v61 = vpack.c.bf16 %v1574_v52, %v1572_v51  ;;  %v1573_v53 = vld [vmem:[#allocation2 + $0x210] sm:$0xff]  ;;  %v1576_v54 = vld [vmem:[#allocation2 + $0x228] sm:$0xff] }
 0xb98   :  { %v1578_v55 = vld [vmem:[#allocation2 + $0x238] sm:$0xff]  ;;  %v4337_v56 = vpack.c.bf16 %v1573_v53, %v1571_v58  ;;  %v1575_v57 = vld [vmem:[#allocation2 + $0x220] sm:$0xff]  ;;  %v1577_v59 = vld [vmem:[#allocation2 + $0x230] sm:$0xff] }
 0xb99   :  { %v4339_v3 = vpack.c.bf16 %v1578_v55, %v1576_v54  ;;  %v1580_v60 = vld [vmem:[#allocation2 + $0x248] sm:$0xff]  ;;  %4336 = vmatprep.subr.bf16.mxu1 %v4335_v61  ;;  %v1582_v62 = vld [vmem:[#allocation2 + $0x258] sm:$0xff]  ;;  %v4341_v11 = vpack.c.bf16 %v1577_v59, %v1575_v57  ;;  %v1579_v63 = vld [vmem:[#allocation2 + $0x240] sm:$0xff] }
 0xb9a   :  { %4338 = vmatpush1.bf16.msra.mxu1 %v4337_v56  ;;  %v4343_v14 = vpack.c.bf16 %v1582_v62, %v1580_v60  ;;  %v1581_v4 = vld [vmem:[#allocation2 + $0x250] sm:$0xff]  ;;  %v1584_v5 = vld [vmem:[#allocation2 + $0x268] sm:$0xff]  ;;  %v1586_v6 = vld [vmem:[#allocation2 + $0x278] sm:$0xff] }
 0xb9b   :  { %4340 = vmatprep.subr.bf16.mxu1 %v4339_v3  ;;  %v4345_v7 = vpack.c.bf16 %v1581_v4, %v1579_v63  ;;  %v4347_v8 = vpack.c.bf16 %v1586_v6, %v1584_v5  ;;  %v1583_v9 = vld [vmem:[#allocation2 + $0x260] sm:$0xff]  ;;  %v1585_v10 = vld [vmem:[#allocation2 + $0x270] sm:$0xff]  ;;  %v1588_v12 = vld [vmem:[#allocation2 + $0x288] sm:$0xff] }
 0xb9c   :  { %v1590_v13 = vld [vmem:[#allocation2 + $0x298] sm:$0xff]  ;;  %v4349_v15 = vpack.c.bf16 %v1585_v10, %v1583_v9  ;;  %v1587_v27 = vld [vmem:[#allocation2 + $0x280] sm:$0xff]  ;;  %v1589_v16 = vld [vmem:[#allocation2 + $0x290] sm:$0xff] }
 0xb9d   :  { %v4351_v24 = vpack.c.bf16 %v1590_v13, %v1588_v12  ;;  %v1592_v17 = vld [vmem:[#allocation2 + $0x2a8] sm:$0xff]  ;;  %v1594_v18 = vld [vmem:[#allocation2 + $0x2b8] sm:$0xff]  ;;  %v4353_v19 = vpack.c.bf16 %v1589_v16, %v1587_v27  ;;  %v1591_v21 = vld [vmem:[#allocation2 + $0x2a0] sm:$0xff] }
 0xb9e   :  { %4342 = vmatpush1.bf16.msra.mxu1 %v4341_v11  ;;  %v4355_v20 = vpack.c.bf16 %v1594_v18, %v1592_v17  ;;  %v1593_v22 = vld [vmem:[#allocation2 + $0x2b0] sm:$0xff]  ;;  %v1596_v23 = vld [vmem:[#allocation2 + $0x2c8] sm:$0xff]  ;;  %v1598_v25 = vld [vmem:[#allocation2 + $0x2d8] sm:$0xff] }
 0xb9f   :  { %4344 = vmatprep.subr.bf16.mxu1 %v4343_v14  ;;  %v4357_v26 = vpack.c.bf16 %v1593_v22, %v1591_v21  ;;  %v1595_v28 = vld [vmem:[#allocation2 + $0x2c0] sm:$0xff]  ;;  %v1597_v39 = vld [vmem:[#allocation2 + $0x2d0] sm:$0xff]  ;;  %v1600_v42 = vld [vmem:[#allocation2 + $0x2e8] sm:$0xff]  ;;  %v4359_v29 = vpack.c.bf16 %v1598_v25, %v1596_v23 }
 0xba0   :  { %v1602_v30 = vld [vmem:[#allocation2 + $0x2f8] sm:$0xff]  ;;  %v1737_v31 = vld [vmem:[#allocation9 + $0x80] sm:$0xff]  ;;  %v1740_v41 = vld [vmem:[#allocation9 + $0x98] sm:$0xff]  ;;  %v4361_v44 = vpack.c.bf16 %v1597_v39, %v1595_v28 }
 0xba1   :  { %v1738_v32 = vld [vmem:[#allocation9 + $0x88] sm:$0xff]  ;;  %v1721_v36 = vld [vmem:[#allocation9] sm:$0xff]  ;;  %v1739_v38 = vld [vmem:[#allocation9 + $0x90] sm:$0xff]  ;;  %v4363_v50 = vpack.c.bf16 %v1602_v30, %v1600_v42 }
 0xba2   :  { %4346 = vmatpush1.bf16.msra.mxu1 %v4345_v7  ;;  %v4399_v34 = vpack.c.bf16 %v1738_v32, %v1737_v31  ;;  %v1722_v37 = vld [vmem:[#allocation9 + $0x8] sm:$0xff]  ;;  %v1723_v43 = vld [vmem:[#allocation9 + $0x10] sm:$0xff]  ;;  %v1724_v2 = vld [vmem:[#allocation9 + $0x18] sm:$0xff]  ;;  %v4403_v45 = vpack.c.bf16 %v1740_v41, %v1739_v38 }
 0xba3   :  { %4348 = vmatprep.subr.bf16.mxu1 %v4347_v8  ;;  %v4401_v40 = vpack.c.bf16 %v1722_v37, %v1721_v36  ;;  %v1741_v47 = vld [vmem:[#allocation9 + $0xa0] sm:$0xff]  ;;  %v1742_v48 = vld [vmem:[#allocation9 + $0xa8] sm:$0xff]  ;;  %v1599_v51 = vld [vmem:[#allocation2 + $0x2e0] sm:$0xff]  ;;  %v4405_v61 = vpack.c.bf16 %v1724_v2, %v1723_v43 }
 0xba4   :  { %4400 = vmatprep.subr.bf16.mxu0 %v4399_v34  ;;  %v1601_v52 = vld [vmem:[#allocation2 + $0x2f0] sm:$0xff]  ;;  %v1604_v58 = vld [vmem:[#allocation2 + $0x308] sm:$0xff]  ;;  %v1606_v53 = vld [vmem:[#allocation2 + $0x318] sm:$0xff]  ;;  %v4407_v54 = vpack.c.bf16 %v1742_v48, %v1741_v47 }
 0xba5   :  { %4402 = vmatpush3.bf16.msra.mxu0 %v4401_v40  ;;  %v1725_v55 = vld [vmem:[#allocation9 + $0x20] sm:$0xff]  ;;  %v1726_v56 = vld [vmem:[#allocation9 + $0x28] sm:$0xff]  ;;  %v1743_v3 = vld [vmem:[#allocation9 + $0xb0] sm:$0xff]  ;;  %v4365_v59 = vpack.c.bf16 %v1601_v52, %v1599_v51  ;;  %v4367_v60 = vpack.c.bf16 %v1606_v53, %v1604_v58 }
 0xba6   :  { %4350 = vmatpush1.bf16.msra.mxu1 %v4349_v15  ;;  %4404 = vmatprep.subr.bf16.mxu0 %v4403_v45  ;;  %v1744_v57 = vld [vmem:[#allocation9 + $0xb8] sm:$0xff]  ;;  %v1605_v11 = vld [vmem:[#allocation2 + $0x310] sm:$0xff]  ;;  %v4409_v63 = vpack.c.bf16 %v1726_v56, %v1725_v55  ;;  %v1610_v4 = vld [vmem:[#allocation2 + $0x338] sm:$0xff] }
 0xba7   :  { %4352 = vmatprep.subr.bf16.mxu1 %v4351_v24  ;;  %v1603_v62 = vld [vmem:[#allocation2 + $0x300] sm:$0xff]  ;;  %v1608_v14 = vld [vmem:[#allocation2 + $0x328] sm:$0xff]  ;;  %v4411_v5 = vpack.c.bf16 %v1744_v57, %v1743_v3  ;;  %v1746_v9 = vld [vmem:[#allocation9 + $0xc8] sm:$0xff] }
 0xba8   :  { %v1727_v6 = vld [vmem:[#allocation9 + $0x30] sm:$0xff]  ;;  %v1728_v7 = vld [vmem:[#allocation9 + $0x38] sm:$0xff]  ;;  %v1745_v8 = vld [vmem:[#allocation9 + $0xc0] sm:$0xff]  ;;  %v4369_v10 = vpack.c.bf16 %v1605_v11, %v1603_v62  ;;  %v4371_v12 = vpack.c.bf16 %v1610_v4, %v1608_v14 }
 0xba9   :  { %4406 = vmatpush3.bf16.msra.mxu0 %v4405_v61  ;;  %v1607_v13 = vld [vmem:[#allocation2 + $0x320] sm:$0xff]  ;;  %v1609_v15 = vld [vmem:[#allocation2 + $0x330] sm:$0xff]  ;;  %v1612_v24 = vld [vmem:[#allocation2 + $0x348] sm:$0xff]  ;;  %v4413_v27 = vpack.c.bf16 %v1728_v7, %v1727_v6  ;;  %v4415_v17 = vpack.c.bf16 %v1746_v9, %v1745_v8 }
 0xbaa   :  { %4354 = vmatpush1.bf16.msra.mxu1 %v4353_v19  ;;  %4408 = vmatprep.subr.bf16.mxu0 %v4407_v54  ;;  %v1614_v16 = vld [vmem:[#allocation2 + $0x358] sm:$0xff]  ;;  %v1729_v18 = vld [vmem:[#allocation9 + $0x40] sm:$0xff]  ;;  %v1748_v21 = vld [vmem:[#allocation9 + $0xd8] sm:$0xff]  ;;  %v4373_v22 = vpack.c.bf16 %v1609_v15, %v1607_v13 }
 0xbab   :  { %4356 = vmatprep.subr.bf16.mxu1 %v4355_v20  ;;  %v1730_v19 = vld [vmem:[#allocation9 + $0x48] sm:$0xff]  ;;  %v1747_v20 = vld [vmem:[#allocation9 + $0xd0] sm:$0xff]  ;;  %v4375_v23 = vpack.c.bf16 %v1614_v16, %v1612_v24  ;;  %v1616_v28 = vld [vmem:[#allocation2 + $0x368] sm:$0xff] }
 0xbac   :  { %v1611_v25 = vld [vmem:[#allocation2 + $0x340] sm:$0xff]  ;;  %v4417_v39 = vpack.c.bf16 %v1730_v19, %v1729_v18  ;;  %v1618_v42 = vld [vmem:[#allocation2 + $0x378] sm:$0xff]  ;;  %v1749_v32 = vld [vmem:[#allocation9 + $0xe0] sm:$0xff] }
 0xbad   :  { %4410 = vmatpush3.bf16.msra.mxu0 %v4409_v63  ;;  %v1731_v30 = vld [vmem:[#allocation9 + $0x50] sm:$0xff]  ;;  %v1732_v31 = vld [vmem:[#allocation9 + $0x58] sm:$0xff]  ;;  %v1750_v34 = vld [vmem:[#allocation9 + $0xe8] sm:$0xff]  ;;  %v4379_v37 = vpack.c.bf16 %v1618_v42, %v1616_v28 }
 0xbae   :  { %4358 = vmatpush1.bf16.msra.mxu1 %v4357_v26  ;;  %4412 = vmatprep.subr.bf16.mxu0 %v4411_v5  ;;  %v1613_v26 = vld [vmem:[#allocation2 + $0x350] sm:$0xff]  ;;  %v1615_v38 = vld [vmem:[#allocation2 + $0x360] sm:$0xff]  ;;  %v4421_v41 = vpack.c.bf16 %v1732_v31, %v1731_v30  ;;  %v1620_v43 = vld [vmem:[#allocation2 + $0x388] sm:$0xff] }
 0xbaf   :  { %4360 = vmatprep.subr.bf16.mxu1 %v4359_v29  ;;  %v4419_v29 = vpack.c.bf16 %v1748_v21, %v1747_v20  ;;  %v4377_v36 = vpack.c.bf16 %v1613_v26, %v1611_v25  ;;  %v1617_v40 = vld [vmem:[#allocation2 + $0x370] sm:$0xff]  ;;  %v1622_v2 = vld [vmem:[#allocation2 + $0x398] sm:$0xff]  ;;  %v1619_v48 = vld [vmem:[#allocation2 + $0x380] sm:$0xff] }
 0xbb0   :  { %v4381_v45 = vpack.c.bf16 %v1617_v40, %v1615_v38  ;;  %v4383_v47 = vpack.c.bf16 %v1622_v2, %v1620_v43  ;;  %v1624_v51 = vld [vmem:[#allocation2 + $0x3a8] sm:$0xff]  ;;  %v1626_v52 = vld [vmem:[#allocation2 + $0x3b8] sm:$0xff]  ;;  %v1623_v53 = vld [vmem:[#allocation2 + $0x3a0] sm:$0xff] }
 0xbb1   :  { %4414 = vmatpush3.bf16.msra.mxu0 %v4413_v27  ;;  %v4387_v61 = vpack.c.bf16 %v1626_v52, %v1624_v51  ;;  %v1625_v54 = vld [vmem:[#allocation2 + $0x3b0] sm:$0xff]  ;;  %v1628_v55 = vld [vmem:[#allocation2 + $0x3c8] sm:$0xff]  ;;  %v1630_v56 = vld [vmem:[#allocation2 + $0x3d8] sm:$0xff] }
 0xbb2   :  { %4362 = vmatpush1.bf16.msra.mxu1 %v4361_v44  ;;  %4416 = vmatprep.subr.bf16.mxu0 %v4415_v17  ;;  %v4423_v44 = vpack.c.bf16 %v1750_v34, %v1749_v32  ;;  %v4389_v3 = vpack.c.bf16 %v1625_v54, %v1623_v53  ;;  %v4391_v57 = vpack.c.bf16 %v1630_v56, %v1628_v55  ;;  %v1632_v62 = vld [vmem:[#allocation2 + $0x3e8] sm:$0xff]  ;;  %v1634_v11 = vld [vmem:[#allocation2 + $0x3f8] sm:$0xff]  ;;  %v1631_v4 = vld [vmem:[#allocation2 + $0x3e0] sm:$0xff] }
 0xbb3   :  { %4364 = vmatprep.subr.bf16.mxu1 %v4363_v50  ;;  %v1621_v50 = vld [vmem:[#allocation2 + $0x390] sm:$0xff]  ;;  %v4395_v63 = vpack.c.bf16 %v1634_v11, %v1632_v62  ;;  %v1735_v15 = vld [vmem:[#allocation9 + $0x70] sm:$0xff]  ;;  %v1736_v24 = vld [vmem:[#allocation9 + $0x78] sm:$0xff] }
 0xbb4   :  { %v4385_v58 = vpack.c.bf16 %v1621_v50, %v1619_v48  ;;  %v1633_v5 = vld [vmem:[#allocation2 + $0x3f0] sm:$0xff]  ;;  %v4429_v27 = vpack.c.bf16 %v1736_v24, %v1735_v15  ;;  %v1636_v16 = vld [vmem:[#allocation6 + $0xa] sm:$0x3]  ;;  %v2989_v25 = vld [vmem:[#allocation11] ss:$0 sm:$0xff] }
 0xbb5   :  { %4418 = vmatpush3.bf16.msra.mxu0 %v4417_v39  ;;  %v4397_v6 = vpack.c.bf16 %v1633_v5, %v1631_v4  ;;  %v1733_v7 = vld [vmem:[#allocation9 + $0x60] sm:$0xff]  ;;  %v1734_v8 = vld [vmem:[#allocation9 + $0x68] sm:$0xff]  ;;  %v1641_v17 = vrot.slane %v1636_v16, %v5807_v33  ;;  %v1645_v18 = vrot.slane %v1636_v16, %v5809_v35 }
 0xbb6   :  { %4366 = vmatpush1.bf16.msra.mxu1 %v4365_v59  ;;  %4420 = vmatprep.subr.bf16.mxu0 %v4419_v29  ;;  %v1627_v59 = vld [vmem:[#allocation2 + $0x3c0] sm:$0xff]  ;;  %v4425_v9 = vpack.c.bf16 %v1734_v8, %v1733_v7 }
 0xbb7   :  { %4368 = vmatprep.subr.bf16.mxu1 %v4367_v60  ;;  %v1629_v60 = vld [vmem:[#allocation2 + $0x3d0] sm:$0xff] }
 0xbb8   :  { %v4393_v14 = vpack.c.bf16 %v1629_v60, %v1627_v59 }
 0xbb9   :  { %4422 = vmatpush3.bf16.msra.mxu0 %v4421_v41 }
 0xbba   :  { %4370 = vmatpush1.bf16.msra.mxu1 %v4369_v10  ;;  %4424 = vmatprep.subr.bf16.mxu0 %v4423_v44  ;;  %v1751_v10 = vld [vmem:[#allocation9 + $0xf0] sm:$0xff] }
 0xbbb   :  { %4372 = vmatprep.subr.bf16.mxu1 %v4371_v12  ;;  %v1752_v12 = vld [vmem:[#allocation9 + $0xf8] sm:$0xff] }
 0xbbc   :  { %v4427_v13 = vpack.c.bf16 %v1752_v12, %v1751_v10 }
 0xbbd   :  { %4426 = vmatpush3.bf16.msra.mxu0 %v4425_v9 }
 0xbbe   :  { %4374 = vmatpush1.bf16.msra.mxu1 %v4373_v22  ;;  %4428 = vmatprep.subr.bf16.mxu0 %v4427_v13 }
 0xbbf   :  { %4376 = vmatprep.subr.bf16.mxu1 %v4375_v23 }
 0xbc1   :  { %4430 = vmatpush3.bf16.msra.mxu0 %v4429_v27 }
 0xbc2   :  { %4378 = vmatpush1.bf16.msra.mxu1 %v4377_v36 }
 0xbc3   :  { %4380 = vmatprep.subr.bf16.mxu1 %v4379_v37 }
 0xbc6   :  { %4382 = vmatpush1.bf16.msra.mxu1 %v4381_v45 }
 0xbc7   :  { %4384 = vmatprep.subr.bf16.mxu1 %v4383_v47 }
 0xbca   :  { %4386 = vmatpush1.bf16.msra.mxu1 %v4385_v58 }
 0xbcb   :  { %4388 = vmatprep.subr.bf16.mxu1 %v4387_v61 }
 0xbce   :  { %4390 = vmatpush1.bf16.msra.mxu1 %v4389_v3 }
 0xbcf   :  { %4392 = vmatprep.subr.bf16.mxu1 %v4391_v57 }
 0xbd2   :  { %4394 = vmatpush1.bf16.msra.mxu1 %v4393_v14 }
 0xbd3   :  { %4396 = vmatprep.subr.bf16.mxu1 %v4395_v63 }
 0xbd6   :  { %4398 = vmatpush1.bf16.msra.mxu1 %v4397_v6 }
 0xbd9   :  { %1713 = vmatmul.mubr.f32.vlgmr.msra.gmra.mrb[10].mxu1 %v1567_v49 }
 0xcac   :  { %v1714_v19 = vpop.f32.mrb[10].mxu1 }
 0xcad   :  { %v1715_v46 = vadd.f32 %v1714_v19, %v1641_v17  ;;  %v1716_v49 = vpop.f32.mrb[11].mxu1 }
 0xcae   :  { %v1717_v20 = vadd.f32 %v1716_v49, %v1645_v18 }
 0xcaf   :  { %v1719_v22 = vmax.f32 %v1715_v46, 0.0 }
 0xcb0   :  { %v1720_v21 = vmax.f32 %v1717_v20, 0.0 }
 0xcb2   :  { %1824 = vmatprep.mubr.f32.mxu0 %v1720_v21 }
 0xcb3   :  { %1825 = vmatmul.mubr.f32.vlgmr.msra.gmra.mrb[12].mxu0 %v1719_v22 }
 0xd86   :  { %v3138_v23 = vpop.f32.mrb[12].mxu0 }
 0xd87   :  { %v3139_v26 = vpop.f32.mrb[13].mxu0 }
 0xd88   :  { %v3140_v28 = vadd.f32 %v3139_v26, %v3138_v23 }
 0xd8a   :  { %v5923_v39 = vadd.f32 %v3140_v28, %v2989_v25 }
 0xd8c   :  { %v1830_v42 = vmax.f32 %v5923_v39, 0.0 }
 0xd8d   :  { %5353 = dma.done.wait [#allocation5], 2048 }
 0xd8e   :  { %5354 = vsyncadd [#allocation5], 4294965248  ;;  %4431 = vmatprep.subr.bf16.mxu1 %v5391_v0  ;;  %3553 = vmatprep.mubr.msk.f32.mxu1 %vm5392_vm0, %v5393_v1  ;;  %s5397_s2 = smov [#allocation3 + $0x80]   ;;  %s5934_s7 = scalar_lea.hbm %s6251_s6, 4096 }
 0xd8f   :  { %s1844_s22 = sshll.u32 %s5397_s2, 4  ;;  %p5041_p6 = scmp.ne.s32.totalorder %s5734_s20, %s5934_s7  ;;  %s5929_s22 = int_to_ptr.vmem [resolvable:$true] %s1844_s22 }
 0xd90   :  { %p5044_p5 = scmp.lt.u32.totalorder %s5743_s25, %s5934_s7  ;;  %p6267_p7 = scmp.lt.u32.totalorder %s5734_s20, %s6251_s6 }
 0xd91   :  { %p5046_p9 = scmp.lt.u32.totalorder %s5934_s7, %s5734_s20 }
 0xd92   :  { %p5045_p8 = por %p5044_p5, %p6267_p7 }
 0xd94   :  { %p5047_p11 = por %p5046_p9, %p5045_p8 }
 0xd96   :  { %p5048_p12 = pnand %p5047_p11, %p5041_p6 }
 0xd98   :  { %5051 = shalt.err (!%p5048_p12)  }
 0xd99   :  { %s5052_s23 = scalar_lea.vmem %s5929_s22, 2048  ;;  %p5057_p13 = scmp.lt.s32.totalorder %s5929_s22, %s5687_s28 }
 0xd9a   :  { %p5053_p3 = scmp.ne.s32.totalorder %s5929_s22, %s5052_s23  ;;  %p5058_p10 = scmp.lt.s32.totalorder %s4907_s18, %s5052_s23 }
 0xd9c   :  { %p5059_p1 = por %p5058_p10, %p5057_p13 }
 0xd9e   :  { %p5953_p2 = pnand %p5059_p1, %p5053_p3 }
 0xda0   :  { %5063 = shalt.err (!%p5953_p2)  }
 0xda1   :  { %1847 = dma.hbm_to_vmem [thread:$0]  %s5734_s20, 2048, %s5929_s22, [#allocation5 + $0x1]  ;;  %v2990_v54 = vld [vmem:[#allocation12] ss:$0 sm:$0xff] }
 0xda2   :  { %v1848_v33 = vld [vmem:[#allocation3] sm:$0xff]  ;;  %v1849_v35 = vld [vmem:[#allocation3 + $0x8] sm:$0xff]  ;;  %v1850_v29 = vld [vmem:[#allocation3 + $0x10] sm:$0xff] }
 0xda3   :  { %v4432_v30 = vpack.c.bf16 %v1849_v35, %v1848_v33  ;;  %v1851_v31 = vld [vmem:[#allocation3 + $0x18] sm:$0xff]  ;;  %v1852_v34 = vld [vmem:[#allocation3 + $0x20] sm:$0xff]  ;;  %v1853_v36 = vld [vmem:[#allocation3 + $0x28] sm:$0xff] }
 0xda4   :  { %v4435_v32 = vpack.c.bf16 %v1851_v31, %v1850_v29  ;;  %v4438_v37 = vpack.c.bf16 %v1853_v36, %v1852_v34  ;;  %v1854_v38 = vld [vmem:[#allocation3 + $0x30] sm:$0xff]  ;;  %v1855_v40 = vld [vmem:[#allocation3 + $0x38] sm:$0xff]  ;;  %v1856_v43 = vld [vmem:[#allocation3 + $0x40] sm:$0xff] }
 0xda5   :  { %4433 = vmatpush3.bf16.msra.mxu1 %v4432_v30  ;;  %v4441_v41 = vpack.c.bf16 %v1855_v40, %v1854_v38  ;;  %v1857_v2 = vld [vmem:[#allocation3 + $0x48] sm:$0xff]  ;;  %v1858_v45 = vld [vmem:[#allocation3 + $0x50] sm:$0xff]  ;;  %v1859_v47 = vld [vmem:[#allocation3 + $0x58] sm:$0xff] }
 0xda6   :  { %4434 = vmatprep.subr.bf16.mxu1 %v5391_v0  ;;  %v4444_v44 = vpack.c.bf16 %v1857_v2, %v1856_v43  ;;  %v4447_v48 = vpack.c.bf16 %v1859_v47, %v1858_v45  ;;  %v1860_v50 = vld [vmem:[#allocation3 + $0x60] sm:$0xff]  ;;  %v1861_v51 = vld [vmem:[#allocation3 + $0x68] sm:$0xff]  ;;  %v1862_v58 = vld [vmem:[#allocation3 + $0x70] sm:$0xff] }
 0xda7   :  { %v4450_v52 = vpack.c.bf16 %v1861_v51, %v1860_v50  ;;  %v1863_v61 = vld [vmem:[#allocation3 + $0x78] sm:$0xff] }
 0xda8   :  { %v4453_v53 = vpack.c.bf16 %v1863_v61, %v1862_v58 }
 0xda9   :  { %4436 = vmatpush3.bf16.msra.mxu1 %v4435_v32 }
 0xdaa   :  { %4437 = vmatprep.subr.bf16.mxu1 %v5391_v0 }
 0xdad   :  { %4439 = vmatpush3.bf16.msra.mxu1 %v4438_v37 }
 0xdae   :  { %4440 = vmatprep.subr.bf16.mxu1 %v5391_v0 }
 0xdb1   :  { %4442 = vmatpush3.bf16.msra.mxu1 %v4441_v41 }
 0xdb2   :  { %4443 = vmatprep.subr.bf16.mxu1 %v5391_v0 }
 0xdb5   :  { %4445 = vmatpush3.bf16.msra.mxu1 %v4444_v44 }
 0xdb6   :  { %4446 = vmatprep.subr.bf16.mxu1 %v5391_v0 }
 0xdb9   :  { %4448 = vmatpush3.bf16.msra.mxu1 %v4447_v48 }
 0xdba   :  { %4449 = vmatprep.subr.bf16.mxu1 %v5391_v0 }
 0xdbd   :  { %4451 = vmatpush3.bf16.msra.mxu1 %v4450_v52 }
 0xdbe   :  { %4452 = vmatprep.subr.bf16.mxu1 %v5391_v0 }
 0xdc1   :  { %4454 = vmatpush3.bf16.msra.mxu1 %v4453_v53 }
 0xdc4   :  { %3554 = vmatmul.mubr.f32.vlgmr.msra.gmra.mrb[12].mxu1 %v1830_v42 }
 0xe97   :  { %v1937_v55 = vpop.f32.mrb[12].mxu1 }
 0xe98   :  { %v1938_v56 = vadd.f32 %v2990_v54, %v1937_v55  ;;  %v3555_v3 = vpop.f32.mrb[13].mxu1 }
 0xe9a   :  { %v1941_v57 = vmax.f32 %v1938_v56, 0.0 }
 0xe9b   :  { %5355 = dma.done.wait [#allocation5 + $0x1], 2048 }
 0xe9c   :  { %5356 = vsyncadd [#allocation5 + $0x1], 4294965248  ;;  %4455 = vmatprep.subr.bf16.mxu0 %v5391_v0  ;;  %3588 = vmatprep.mubr.msk.f32.mxu0 %vm5392_vm0, %v5393_v1  ;;  %s5974_s29 = scalar_lea.hbm %s6251_s6, 6144  ;;  %p5068_p6 = scmp.lt.u32.totalorder %s5934_s7, %s6251_s6 }
 0xe9d   :  { %p5066_p4 = scmp.ne.s32.totalorder %s5934_s7, %s5974_s29  ;;  %p5069_p5 = scmp.lt.u32.totalorder %s5743_s25, %s5974_s29 }
 0xe9e   :  { %p5071_p8 = scmp.lt.u32.totalorder %s5974_s29, %s5934_s7 }
 0xe9f   :  { %p5070_p7 = por %p5069_p5, %p5068_p6 }
 0xea1   :  { %p5072_p9 = por %p5071_p8, %p5070_p7 }
 0xea3   :  { %p5073_p11 = pnand %p5072_p9, %p5066_p4 }
 0xea5   :  { %5076 = shalt.err (!%p5073_p11)  }
 0xea6   :  { %5088 = shalt.err (!%p5763_p0)  }
 0xea7   :  { %1955 = dma.hbm_to_vmem [thread:$0]  %s5934_s7, 2048, %s5687_s28, [#allocation5]  ;;  %v2991_v20 = vld [vmem:[#allocation12 + $0x1] ss:$0 sm:$0xff] }
 0xea8   :  { %v1956_v59 = vld [vmem:[#allocation3 + $0x80] sm:$0xff]  ;;  %v1957_v60 = vld [vmem:[#allocation3 + $0x88] sm:$0xff]  ;;  %v1958_v62 = vld [vmem:[#allocation3 + $0x90] sm:$0xff] }
 0xea9   :  { %v4456_v11 = vpack.c.bf16 %v1957_v60, %v1956_v59  ;;  %v1959_v14 = vld [vmem:[#allocation3 + $0x98] sm:$0xff]  ;;  %v1960_v4 = vld [vmem:[#allocation3 + $0xa0] sm:$0xff]  ;;  %v1961_v5 = vld [vmem:[#allocation3 + $0xa8] sm:$0xff] }
 0xeaa   :  { %v4459_v63 = vpack.c.bf16 %v1959_v14, %v1958_v62  ;;  %v4462_v6 = vpack.c.bf16 %v1961_v5, %v1960_v4  ;;  %v1962_v7 = vld [vmem:[#allocation3 + $0xb0] sm:$0xff]  ;;  %v1963_v8 = vld [vmem:[#allocation3 + $0xb8] sm:$0xff]  ;;  %v1964_v10 = vld [vmem:[#allocation3 + $0xc0] sm:$0xff] }
 0xeab   :  { %4457 = vmatpush3.bf16.msra.mxu0 %v4456_v11  ;;  %v4465_v9 = vpack.c.bf16 %v1963_v8, %v1962_v7  ;;  %v1965_v12 = vld [vmem:[#allocation3 + $0xc8] sm:$0xff]  ;;  %v1966_v15 = vld [vmem:[#allocation3 + $0xd0] sm:$0xff]  ;;  %v1967_v24 = vld [vmem:[#allocation3 + $0xd8] sm:$0xff] }
 0xeac   :  { %4458 = vmatprep.subr.bf16.mxu0 %v5391_v0  ;;  %v4468_v13 = vpack.c.bf16 %v1965_v12, %v1964_v10  ;;  %v4471_v27 = vpack.c.bf16 %v1967_v24, %v1966_v15  ;;  %v1968_v16 = vld [vmem:[#allocation3 + $0xe0] sm:$0xff]  ;;  %v1969_v17 = vld [vmem:[#allocation3 + $0xe8] sm:$0xff]  ;;  %v1970_v19 = vld [vmem:[#allocation3 + $0xf0] sm:$0xff] }
 0xead   :  { %v4474_v18 = vpack.c.bf16 %v1969_v17, %v1968_v16  ;;  %v1971_v46 = vld [vmem:[#allocation3 + $0xf8] sm:$0xff] }
 0xeae   :  { %v4477_v49 = vpack.c.bf16 %v1971_v46, %v1970_v19 }
 0xeaf   :  { %4460 = vmatpush3.bf16.msra.mxu0 %v4459_v63 }
 0xeb0   :  { %4461 = vmatprep.subr.bf16.mxu0 %v5391_v0 }
 0xeb3   :  { %4463 = vmatpush3.bf16.msra.mxu0 %v4462_v6 }
 0xeb4   :  { %4464 = vmatprep.subr.bf16.mxu0 %v5391_v0 }
 0xeb7   :  { %4466 = vmatpush3.bf16.msra.mxu0 %v4465_v9 }
 0xeb8   :  { %4467 = vmatprep.subr.bf16.mxu0 %v5391_v0 }
 0xebb   :  { %4469 = vmatpush3.bf16.msra.mxu0 %v4468_v13 }
 0xebc   :  { %4470 = vmatprep.subr.bf16.mxu0 %v5391_v0 }
 0xebf   :  { %4472 = vmatpush3.bf16.msra.mxu0 %v4471_v27 }
 0xec0   :  { %4473 = vmatprep.subr.bf16.mxu0 %v5391_v0 }
 0xec3   :  { %4475 = vmatpush3.bf16.msra.mxu0 %v4474_v18 }
 0xec4   :  { %4476 = vmatprep.subr.bf16.mxu0 %v5391_v0 }
 0xec7   :  { %4478 = vmatpush3.bf16.msra.mxu0 %v4477_v49 }
 0xeca   :  { %3589 = vmatmul.mubr.f32.vlgmr.msra.gmra.mrb[14].mxu0 %v1941_v57 }
 0xf9d   :  { %v2046_v21 = vpop.f32.mrb[14].mxu0 }
 0xf9e   :  { %v2047_v22 = vadd.f32 %v2991_v20, %v2046_v21  ;;  %v3590_v23 = vpop.f32.mrb[15].mxu0 }
 0xfa0   :  { %v2050_v25 = vmax.f32 %v2047_v22, 0.0 }
 0xfa1   :  { %5357 = dma.done.wait [#allocation5], 2048 }
 0xfa2   :  { %5358 = vsyncadd [#allocation5], 4294965248  ;;  %4479 = vmatprep.subr.bf16.mxu1 %v5391_v0  ;;  %3623 = vmatprep.mubr.msk.f32.mxu1 %vm5392_vm0, %v5393_v1  ;;  %s6003_s27 = scalar_lea.hbm %s6251_s6, 8192  ;;  %p5093_p3 = scmp.lt.u32.totalorder %s5974_s29, %s6251_s6 }
 0xfa3   :  { %p5091_p12 = scmp.ne.s32.totalorder %s5974_s29, %s6003_s27  ;;  %p5094_p13 = scmp.lt.u32.totalorder %s5743_s25, %s6003_s27 }
 0xfa4   :  { %p5096_p1 = scmp.lt.u32.totalorder %s6003_s27, %s5974_s29 }
 0xfa5   :  { %p5095_p10 = por %p5094_p13, %p5093_p3 }
 0xfa7   :  { %p5097_p4 = por %p5096_p1, %p5095_p10 }
 0xfa9   :  { %p5098_p6 = pnand %p5097_p4, %p5091_p12 }
 0xfab   :  { %5101 = shalt.err (!%p5098_p6)  }
 0xfac   :  { %5113 = shalt.err (!%p5953_p2)  }
 0xfad   :  { %2064 = dma.hbm_to_vmem [thread:$0]  %s5974_s29, 2048, %s5929_s22, [#allocation5 + $0x1]  ;;  %v2992_v52 = vld [vmem:[#allocation12 + $0x2] ss:$0 sm:$0xff] }
 0xfae   :  { %v2065_v26 = vld [vmem:[#allocation3] sm:$0xff]  ;;  %v2066_v28 = vld [vmem:[#allocation3 + $0x8] sm:$0xff]  ;;  %v2067_v39 = vld [vmem:[#allocation3 + $0x10] sm:$0xff] }
 0xfaf   :  { %v4480_v42 = vpack.c.bf16 %v2066_v28, %v2065_v26  ;;  %v2068_v33 = vld [vmem:[#allocation3 + $0x18] sm:$0xff]  ;;  %v2069_v29 = vld [vmem:[#allocation3 + $0x20] sm:$0xff]  ;;  %v2070_v30 = vld [vmem:[#allocation3 + $0x28] sm:$0xff] }
 0xfb0   :  { %v4483_v35 = vpack.c.bf16 %v2068_v33, %v2067_v39  ;;  %v4486_v31 = vpack.c.bf16 %v2070_v30, %v2069_v29  ;;  %v2071_v32 = vld [vmem:[#allocation3 + $0x30] sm:$0xff]  ;;  %v2072_v34 = vld [vmem:[#allocation3 + $0x38] sm:$0xff]  ;;  %v2073_v37 = vld [vmem:[#allocation3 + $0x40] sm:$0xff] }
 0xfb1   :  { %4481 = vmatpush3.bf16.msra.mxu1 %v4480_v42  ;;  %v4489_v36 = vpack.c.bf16 %v2072_v34, %v2071_v32  ;;  %v2074_v38 = vld [vmem:[#allocation3 + $0x48] sm:$0xff]  ;;  %v2075_v41 = vld [vmem:[#allocation3 + $0x50] sm:$0xff]  ;;  %v2076_v43 = vld [vmem:[#allocation3 + $0x58] sm:$0xff] }
 0xfb2   :  { %4482 = vmatprep.subr.bf16.mxu1 %v5391_v0  ;;  %v4492_v40 = vpack.c.bf16 %v2074_v38, %v2073_v37  ;;  %v4495_v2 = vpack.c.bf16 %v2076_v43, %v2075_v41  ;;  %v2077_v44 = vld [vmem:[#allocation3 + $0x60] sm:$0xff]  ;;  %v2078_v45 = vld [vmem:[#allocation3 + $0x68] sm:$0xff]  ;;  %v2079_v48 = vld [vmem:[#allocation3 + $0x70] sm:$0xff] }
 0xfb3   :  { %v4498_v47 = vpack.c.bf16 %v2078_v45, %v2077_v44  ;;  %v2080_v50 = vld [vmem:[#allocation3 + $0x78] sm:$0xff] }
 0xfb4   :  { %v4501_v51 = vpack.c.bf16 %v2080_v50, %v2079_v48 }
 0xfb5   :  { %4484 = vmatpush3.bf16.msra.mxu1 %v4483_v35 }
 0xfb6   :  { %4485 = vmatprep.subr.bf16.mxu1 %v5391_v0 }
 0xfb9   :  { %4487 = vmatpush3.bf16.msra.mxu1 %v4486_v31 }
 0xfba   :  { %4488 = vmatprep.subr.bf16.mxu1 %v5391_v0 }
 0xfbd   :  { %4490 = vmatpush3.bf16.msra.mxu1 %v4489_v36 }
 0xfbe   :  { %4491 = vmatprep.subr.bf16.mxu1 %v5391_v0 }
 0xfc1   :  { %4493 = vmatpush3.bf16.msra.mxu1 %v4492_v40 }
 0xfc2   :  { %4494 = vmatprep.subr.bf16.mxu1 %v5391_v0 }
 0xfc5   :  { %4496 = vmatpush3.bf16.msra.mxu1 %v4495_v2 }
 0xfc6   :  { %4497 = vmatprep.subr.bf16.mxu1 %v5391_v0 }
 0xfc9   :  { %4499 = vmatpush3.bf16.msra.mxu1 %v4498_v47 }
 0xfca   :  { %4500 = vmatprep.subr.bf16.mxu1 %v5391_v0 }
 0xfcd   :  { %4502 = vmatpush3.bf16.msra.mxu1 %v4501_v51 }
 0xfd0   :  { %3624 = vmatmul.mubr.f32.vlgmr.msra.gmra.mrb[14].mxu1 %v2050_v25 }
0x10a3   :  { %v2155_v58 = vpop.f32.mrb[14].mxu1 }
0x10a4   :  { %v2156_v61 = vadd.f32 %v2992_v52, %v2155_v58  ;;  %v3625_v53 = vpop.f32.mrb[15].mxu1 }
0x10a6   :  { %v2159_v54 = vmax.f32 %v2156_v61, 0.0 }
0x10a7   :  { %5359 = dma.done.wait [#allocation5 + $0x1], 2048 }
0x10a8   :  { %5360 = vsyncadd [#allocation5 + $0x1], 4294965248  ;;  %4503 = vmatprep.subr.bf16.mxu0 %v5391_v0  ;;  %3658 = vmatprep.mubr.msk.f32.mxu0 %vm5392_vm0, %v5393_v1  ;;  %s6032_s15 = scalar_lea.hbm %s6251_s6, 10240  ;;  %p5118_p7 = scmp.lt.u32.totalorder %s6003_s27, %s6251_s6 }
0x10a9   :  { %p5116_p5 = scmp.ne.s32.totalorder %s6003_s27, %s6032_s15  ;;  %p5119_p8 = scmp.lt.u32.totalorder %s5743_s25, %s6032_s15 }
0x10aa   :  { %p5121_p11 = scmp.lt.u32.totalorder %s6032_s15, %s6003_s27 }
0x10ab   :  { %p5120_p9 = por %p5119_p8, %p5118_p7 }
0x10ad   :  { %p5122_p12 = por %p5121_p11, %p5120_p9 }
0x10af   :  { %p5123_p3 = pnand %p5122_p12, %p5116_p5 }
0x10b1   :  { %5126 = shalt.err (!%p5123_p3)  }
0x10b2   :  { %5138 = shalt.err (!%p5763_p0)  }
0x10b3   :  { %2173 = dma.hbm_to_vmem [thread:$0]  %s6003_s27, 2048, %s5687_s28, [#allocation5]  ;;  %v2993_v18 = vld [vmem:[#allocation12 + $0x3] ss:$0 sm:$0xff] }
0x10b4   :  { %v2174_v55 = vld [vmem:[#allocation3 + $0x80] sm:$0xff]  ;;  %v2175_v56 = vld [vmem:[#allocation3 + $0x88] sm:$0xff]  ;;  %v2176_v3 = vld [vmem:[#allocation3 + $0x90] sm:$0xff] }
0x10b5   :  { %v4504_v57 = vpack.c.bf16 %v2175_v56, %v2174_v55  ;;  %v2177_v59 = vld [vmem:[#allocation3 + $0x98] sm:$0xff]  ;;  %v2178_v62 = vld [vmem:[#allocation3 + $0xa0] sm:$0xff]  ;;  %v2179_v11 = vld [vmem:[#allocation3 + $0xa8] sm:$0xff] }
0x10b6   :  { %v4507_v60 = vpack.c.bf16 %v2177_v59, %v2176_v3  ;;  %v4510_v14 = vpack.c.bf16 %v2179_v11, %v2178_v62  ;;  %v2180_v63 = vld [vmem:[#allocation3 + $0xb0] sm:$0xff]  ;;  %v2181_v4 = vld [vmem:[#allocation3 + $0xb8] sm:$0xff]  ;;  %v2182_v6 = vld [vmem:[#allocation3 + $0xc0] sm:$0xff] }
0x10b7   :  { %4505 = vmatpush3.bf16.msra.mxu0 %v4504_v57  ;;  %v4513_v5 = vpack.c.bf16 %v2181_v4, %v2180_v63  ;;  %v2183_v7 = vld [vmem:[#allocation3 + $0xc8] sm:$0xff]  ;;  %v2184_v9 = vld [vmem:[#allocation3 + $0xd0] sm:$0xff]  ;;  %v2185_v10 = vld [vmem:[#allocation3 + $0xd8] sm:$0xff] }
0x10b8   :  { %4506 = vmatprep.subr.bf16.mxu0 %v5391_v0  ;;  %v4516_v8 = vpack.c.bf16 %v2183_v7, %v2182_v6  ;;  %v4519_v12 = vpack.c.bf16 %v2185_v10, %v2184_v9  ;;  %v2186_v13 = vld [vmem:[#allocation3 + $0xe0] sm:$0xff]  ;;  %v2187_v15 = vld [vmem:[#allocation3 + $0xe8] sm:$0xff]  ;;  %v2188_v27 = vld [vmem:[#allocation3 + $0xf0] sm:$0xff] }
0x10b9   :  { %v4522_v24 = vpack.c.bf16 %v2187_v15, %v2186_v13  ;;  %v2189_v16 = vld [vmem:[#allocation3 + $0xf8] sm:$0xff] }
0x10ba   :  { %v4525_v17 = vpack.c.bf16 %v2189_v16, %v2188_v27 }
0x10bb   :  { %4508 = vmatpush3.bf16.msra.mxu0 %v4507_v60 }
0x10bc   :  { %4509 = vmatprep.subr.bf16.mxu0 %v5391_v0 }
0x10bf   :  { %4511 = vmatpush3.bf16.msra.mxu0 %v4510_v14 }
0x10c0   :  { %4512 = vmatprep.subr.bf16.mxu0 %v5391_v0 }
0x10c3   :  { %4514 = vmatpush3.bf16.msra.mxu0 %v4513_v5 }
0x10c4   :  { %4515 = vmatprep.subr.bf16.mxu0 %v5391_v0 }
0x10c7   :  { %4517 = vmatpush3.bf16.msra.mxu0 %v4516_v8 }
0x10c8   :  { %4518 = vmatprep.subr.bf16.mxu0 %v5391_v0 }
0x10cb   :  { %4520 = vmatpush3.bf16.msra.mxu0 %v4519_v12 }
0x10cc   :  { %4521 = vmatprep.subr.bf16.mxu0 %v5391_v0 }
0x10cf   :  { %4523 = vmatpush3.bf16.msra.mxu0 %v4522_v24 }
0x10d0   :  { %4524 = vmatprep.subr.bf16.mxu0 %v5391_v0 }
0x10d3   :  { %4526 = vmatpush3.bf16.msra.mxu0 %v4525_v17 }
0x10d6   :  { %3659 = vmatmul.mubr.f32.vlgmr.msra.gmra.mrb[16].mxu0 %v2159_v54 }
0x11a9   :  { %v2264_v19 = vpop.f32.mrb[16].mxu0 }
0x11aa   :  { %v2265_v46 = vadd.f32 %v2993_v18, %v2264_v19  ;;  %v3660_v49 = vpop.f32.mrb[17].mxu0 }
0x11ac   :  { %v2268_v20 = vmax.f32 %v2265_v46, 0.0 }
0x11ad   :  { %5361 = dma.done.wait [#allocation5], 2048 }
0x11ae   :  { %5362 = vsyncadd [#allocation5], 4294965248  ;;  %4527 = vmatprep.subr.bf16.mxu1 %v5391_v0  ;;  %3693 = vmatprep.mubr.msk.f32.mxu1 %vm5392_vm0, %v5393_v1  ;;  %s6061_s1 = scalar_lea.hbm %s6251_s6, 12288  ;;  %p5143_p10 = scmp.lt.u32.totalorder %s6032_s15, %s6251_s6 }
0x11af   :  { %p5141_p13 = scmp.ne.s32.totalorder %s6032_s15, %s6061_s1  ;;  %p5144_p1 = scmp.lt.u32.totalorder %s5743_s25, %s6061_s1 }
0x11b0   :  { %p5146_p6 = scmp.lt.u32.totalorder %s6061_s1, %s6032_s15 }
0x11b1   :  { %p5145_p4 = por %p5144_p1, %p5143_p10 }
0x11b3   :  { %p5147_p5 = por %p5146_p6, %p5145_p4 }
0x11b5   :  { %p5148_p7 = pnand %p5147_p5, %p5141_p13 }
0x11b7   :  { %5151 = shalt.err (!%p5148_p7)  }
0x11b8   :  { %5163 = shalt.err (!%p5953_p2)  }
0x11b9   :  { %2282 = dma.hbm_to_vmem [thread:$0]  %s6032_s15, 2048, %s5929_s22, [#allocation5 + $0x1]  ;;  %v2994_v47 = vld [vmem:[#allocation12 + $0x4] ss:$0 sm:$0xff] }
0x11ba   :  { %v2283_v21 = vld [vmem:[#allocation3] sm:$0xff]  ;;  %v2284_v22 = vld [vmem:[#allocation3 + $0x8] sm:$0xff]  ;;  %v2285_v23 = vld [vmem:[#allocation3 + $0x10] sm:$0xff] }
0x11bb   :  { %v4528_v25 = vpack.c.bf16 %v2284_v22, %v2283_v21  ;;  %v2286_v26 = vld [vmem:[#allocation3 + $0x18] sm:$0xff]  ;;  %v2287_v39 = vld [vmem:[#allocation3 + $0x20] sm:$0xff]  ;;  %v2288_v42 = vld [vmem:[#allocation3 + $0x28] sm:$0xff] }
0x11bc   :  { %v4531_v28 = vpack.c.bf16 %v2286_v26, %v2285_v23  ;;  %v4534_v33 = vpack.c.bf16 %v2288_v42, %v2287_v39  ;;  %v2289_v35 = vld [vmem:[#allocation3 + $0x30] sm:$0xff]  ;;  %v2290_v29 = vld [vmem:[#allocation3 + $0x38] sm:$0xff]  ;;  %v2291_v31 = vld [vmem:[#allocation3 + $0x40] sm:$0xff] }
0x11bd   :  { %4529 = vmatpush3.bf16.msra.mxu1 %v4528_v25  ;;  %v4537_v30 = vpack.c.bf16 %v2290_v29, %v2289_v35  ;;  %v2292_v32 = vld [vmem:[#allocation3 + $0x48] sm:$0xff]  ;;  %v2293_v36 = vld [vmem:[#allocation3 + $0x50] sm:$0xff]  ;;  %v2294_v37 = vld [vmem:[#allocation3 + $0x58] sm:$0xff] }
0x11be   :  { %4530 = vmatprep.subr.bf16.mxu1 %v5391_v0  ;;  %v4540_v34 = vpack.c.bf16 %v2292_v32, %v2291_v31  ;;  %v4543_v38 = vpack.c.bf16 %v2294_v37, %v2293_v36  ;;  %v2295_v40 = vld [vmem:[#allocation3 + $0x60] sm:$0xff]  ;;  %v2296_v41 = vld [vmem:[#allocation3 + $0x68] sm:$0xff]  ;;  %v2297_v2 = vld [vmem:[#allocation3 + $0x70] sm:$0xff] }
0x11bf   :  { %v4546_v43 = vpack.c.bf16 %v2296_v41, %v2295_v40  ;;  %v2298_v44 = vld [vmem:[#allocation3 + $0x78] sm:$0xff] }
0x11c0   :  { %v4549_v45 = vpack.c.bf16 %v2298_v44, %v2297_v2 }
0x11c1   :  { %4532 = vmatpush3.bf16.msra.mxu1 %v4531_v28 }
0x11c2   :  { %4533 = vmatprep.subr.bf16.mxu1 %v5391_v0 }
0x11c5   :  { %4535 = vmatpush3.bf16.msra.mxu1 %v4534_v33 }
0x11c6   :  { %4536 = vmatprep.subr.bf16.mxu1 %v5391_v0 }
0x11c9   :  { %4538 = vmatpush3.bf16.msra.mxu1 %v4537_v30 }
0x11ca   :  { %4539 = vmatprep.subr.bf16.mxu1 %v5391_v0 }
0x11cd   :  { %4541 = vmatpush3.bf16.msra.mxu1 %v4540_v34 }
0x11ce   :  { %4542 = vmatprep.subr.bf16.mxu1 %v5391_v0 }
0x11d1   :  { %4544 = vmatpush3.bf16.msra.mxu1 %v4543_v38 }
0x11d2   :  { %4545 = vmatprep.subr.bf16.mxu1 %v5391_v0 }
0x11d5   :  { %4547 = vmatpush3.bf16.msra.mxu1 %v4546_v43 }
0x11d6   :  { %4548 = vmatprep.subr.bf16.mxu1 %v5391_v0 }
0x11d9   :  { %4550 = vmatpush3.bf16.msra.mxu1 %v4549_v45 }
0x11dc   :  { %3694 = vmatmul.mubr.f32.vlgmr.msra.gmra.mrb[16].mxu1 %v2268_v20 }
0x12af   :  { %v2373_v48 = vpop.f32.mrb[16].mxu1 }
0x12b0   :  { %v2374_v50 = vadd.f32 %v2994_v47, %v2373_v48  ;;  %v3695_v51 = vpop.f32.mrb[17].mxu1 }
0x12b2   :  { %v2377_v52 = vmax.f32 %v2374_v50, 0.0 }
0x12b3   :  { %5363 = dma.done.wait [#allocation5 + $0x1], 2048 }
0x12b4   :  { %5364 = vsyncadd [#allocation5 + $0x1], 4294965248  ;;  %4551 = vmatprep.subr.bf16.mxu0 %v5391_v0  ;;  %3728 = vmatprep.mubr.msk.f32.mxu0 %vm5392_vm0, %v5393_v1  ;;  %s6090_s20 = scalar_lea.hbm %s6251_s6, 14336  ;;  %p5168_p9 = scmp.lt.u32.totalorder %s6061_s1, %s6251_s6 }
0x12b5   :  { %p5166_p8 = scmp.ne.s32.totalorder %s6061_s1, %s6090_s20  ;;  %p5169_p11 = scmp.lt.u32.totalorder %s5743_s25, %s6090_s20 }
0x12b6   :  { %p5171_p3 = scmp.lt.u32.totalorder %s6090_s20, %s6061_s1 }
0x12b7   :  { %p5170_p12 = por %p5169_p11, %p5168_p9 }
0x12b9   :  { %p5172_p13 = por %p5171_p3, %p5170_p12 }
0x12bb   :  { %p5173_p10 = pnand %p5172_p13, %p5166_p8 }
0x12bd   :  { %5176 = shalt.err (!%p5173_p10)  }
0x12be   :  { %5188 = shalt.err (!%p5763_p0)  }
0x12bf   :  { %2391 = dma.hbm_to_vmem [thread:$0]  %s6061_s1, 2048, %s5687_s28, [#allocation5]  ;;  %v2995_v24 = vld [vmem:[#allocation12 + $0x5] ss:$0 sm:$0xff] }
0x12c0   :  { %v2392_v58 = vld [vmem:[#allocation3 + $0x80] sm:$0xff]  ;;  %v2393_v61 = vld [vmem:[#allocation3 + $0x88] sm:$0xff]  ;;  %v2394_v53 = vld [vmem:[#allocation3 + $0x90] sm:$0xff] }
0x12c1   :  { %v4552_v54 = vpack.c.bf16 %v2393_v61, %v2392_v58  ;;  %v2395_v55 = vld [vmem:[#allocation3 + $0x98] sm:$0xff]  ;;  %v2396_v3 = vld [vmem:[#allocation3 + $0xa0] sm:$0xff]  ;;  %v2397_v57 = vld [vmem:[#allocation3 + $0xa8] sm:$0xff] }
0x12c2   :  { %v4555_v56 = vpack.c.bf16 %v2395_v55, %v2394_v53  ;;  %v4558_v59 = vpack.c.bf16 %v2397_v57, %v2396_v3  ;;  %v2398_v60 = vld [vmem:[#allocation3 + $0xb0] sm:$0xff]  ;;  %v2399_v62 = vld [vmem:[#allocation3 + $0xb8] sm:$0xff]  ;;  %v2400_v14 = vld [vmem:[#allocation3 + $0xc0] sm:$0xff] }
0x12c3   :  { %4553 = vmatpush3.bf16.msra.mxu0 %v4552_v54  ;;  %v4561_v11 = vpack.c.bf16 %v2399_v62, %v2398_v60  ;;  %v2401_v63 = vld [vmem:[#allocation3 + $0xc8] sm:$0xff]  ;;  %v2402_v5 = vld [vmem:[#allocation3 + $0xd0] sm:$0xff]  ;;  %v2403_v6 = vld [vmem:[#allocation3 + $0xd8] sm:$0xff] }
0x12c4   :  { %4554 = vmatprep.subr.bf16.mxu0 %v5391_v0  ;;  %v4564_v4 = vpack.c.bf16 %v2401_v63, %v2400_v14  ;;  %v4567_v7 = vpack.c.bf16 %v2403_v6, %v2402_v5  ;;  %v2404_v8 = vld [vmem:[#allocation3 + $0xe0] sm:$0xff]  ;;  %v2405_v9 = vld [vmem:[#allocation3 + $0xe8] sm:$0xff]  ;;  %v2406_v12 = vld [vmem:[#allocation3 + $0xf0] sm:$0xff] }
0x12c5   :  { %v4570_v10 = vpack.c.bf16 %v2405_v9, %v2404_v8  ;;  %v2407_v13 = vld [vmem:[#allocation3 + $0xf8] sm:$0xff] }
0x12c6   :  { %v4573_v15 = vpack.c.bf16 %v2407_v13, %v2406_v12 }
0x12c7   :  { %4556 = vmatpush3.bf16.msra.mxu0 %v4555_v56 }
0x12c8   :  { %4557 = vmatprep.subr.bf16.mxu0 %v5391_v0 }
0x12cb   :  { %4559 = vmatpush3.bf16.msra.mxu0 %v4558_v59 }
0x12cc   :  { %4560 = vmatprep.subr.bf16.mxu0 %v5391_v0 }
0x12cf   :  { %4562 = vmatpush3.bf16.msra.mxu0 %v4561_v11 }
0x12d0   :  { %4563 = vmatprep.subr.bf16.mxu0 %v5391_v0 }
0x12d3   :  { %4565 = vmatpush3.bf16.msra.mxu0 %v4564_v4 }
0x12d4   :  { %4566 = vmatprep.subr.bf16.mxu0 %v5391_v0 }
0x12d7   :  { %4568 = vmatpush3.bf16.msra.mxu0 %v4567_v7 }
0x12d8   :  { %4569 = vmatprep.subr.bf16.mxu0 %v5391_v0 }
0x12db   :  { %4571 = vmatpush3.bf16.msra.mxu0 %v4570_v10 }
0x12dc   :  { %4572 = vmatprep.subr.bf16.mxu0 %v5391_v0 }
0x12df   :  { %4574 = vmatpush3.bf16.msra.mxu0 %v4573_v15 }
0x12e2   :  { %3729 = vmatmul.mubr.f32.vlgmr.msra.gmra.mrb[18].mxu0 %v2377_v52 }
0x13b5   :  { %v2482_v27 = vpop.f32.mrb[18].mxu0 }
0x13b6   :  { %v2483_v16 = vadd.f32 %v2995_v24, %v2482_v27  ;;  %v3730_v17 = vpop.f32.mrb[19].mxu0 }
0x13b8   :  { %v2486_v18 = vmax.f32 %v2483_v16, 0.0 }
0x13b9   :  { %5365 = dma.done.wait [#allocation5], 2048 }
0x13ba   :  { %5366 = vsyncadd [#allocation5], 4294965248  ;;  %4575 = vmatprep.subr.bf16.mxu1 %v5391_v0  ;;  %3763 = vmatprep.mubr.msk.f32.mxu1 %vm5392_vm0, %v5393_v1  ;;  %s6119_s3 = scalar_lea.hbm %s6251_s6, 16384  ;;  %p5193_p4 = scmp.lt.u32.totalorder %s6090_s20, %s6251_s6 }
0x13bb   :  { %p5191_p1 = scmp.ne.s32.totalorder %s6090_s20, %s6119_s3  ;;  %p5194_p6 = scmp.lt.u32.totalorder %s5743_s25, %s6119_s3 }
0x13bc   :  { %p5196_p7 = scmp.lt.u32.totalorder %s6119_s3, %s6090_s20 }
0x13bd   :  { %p5195_p5 = por %p5194_p6, %p5193_p4 }
0x13bf   :  { %p5197_p8 = por %p5196_p7, %p5195_p5 }
0x13c1   :  { %p5198_p9 = pnand %p5197_p8, %p5191_p1 }
0x13c3   :  { %5201 = shalt.err (!%p5198_p9)  }
0x13c4   :  { %5213 = shalt.err (!%p5953_p2)  }
0x13c5   :  { %2500 = dma.hbm_to_vmem [thread:$0]  %s6090_s20, 2048, %s5929_s22, [#allocation5 + $0x1]  ;;  %v2996_v43 = vld [vmem:[#allocation12 + $0x6] ss:$0 sm:$0xff] }
0x13c6   :  { %v2501_v19 = vld [vmem:[#allocation3] sm:$0xff]  ;;  %v2502_v46 = vld [vmem:[#allocation3 + $0x8] sm:$0xff]  ;;  %v2503_v49 = vld [vmem:[#allocation3 + $0x10] sm:$0xff] }
0x13c7   :  { %v4576_v20 = vpack.c.bf16 %v2502_v46, %v2501_v19  ;;  %v2504_v21 = vld [vmem:[#allocation3 + $0x18] sm:$0xff]  ;;  %v2505_v23 = vld [vmem:[#allocation3 + $0x20] sm:$0xff]  ;;  %v2506_v25 = vld [vmem:[#allocation3 + $0x28] sm:$0xff] }
0x13c8   :  { %v4579_v22 = vpack.c.bf16 %v2504_v21, %v2503_v49  ;;  %v4582_v26 = vpack.c.bf16 %v2506_v25, %v2505_v23  ;;  %v2507_v28 = vld [vmem:[#allocation3 + $0x30] sm:$0xff]  ;;  %v2508_v39 = vld [vmem:[#allocation3 + $0x38] sm:$0xff]  ;;  %v2509_v33 = vld [vmem:[#allocation3 + $0x40] sm:$0xff] }
0x13c9   :  { %4577 = vmatpush3.bf16.msra.mxu1 %v4576_v20  ;;  %v4585_v42 = vpack.c.bf16 %v2508_v39, %v2507_v28  ;;  %v2510_v35 = vld [vmem:[#allocation3 + $0x48] sm:$0xff]  ;;  %v2511_v30 = vld [vmem:[#allocation3 + $0x50] sm:$0xff]  ;;  %v2512_v31 = vld [vmem:[#allocation3 + $0x58] sm:$0xff] }
0x13ca   :  { %4578 = vmatprep.subr.bf16.mxu1 %v5391_v0  ;;  %v4588_v29 = vpack.c.bf16 %v2510_v35, %v2509_v33  ;;  %v4591_v32 = vpack.c.bf16 %v2512_v31, %v2511_v30  ;;  %v2513_v34 = vld [vmem:[#allocation3 + $0x60] sm:$0xff]  ;;  %v2514_v36 = vld [vmem:[#allocation3 + $0x68] sm:$0xff]  ;;  %v2515_v38 = vld [vmem:[#allocation3 + $0x70] sm:$0xff] }
0x13cb   :  { %v4594_v37 = vpack.c.bf16 %v2514_v36, %v2513_v34  ;;  %v2516_v40 = vld [vmem:[#allocation3 + $0x78] sm:$0xff] }
0x13cc   :  { %v4597_v41 = vpack.c.bf16 %v2516_v40, %v2515_v38 }
0x13cd   :  { %4580 = vmatpush3.bf16.msra.mxu1 %v4579_v22 }
0x13ce   :  { %4581 = vmatprep.subr.bf16.mxu1 %v5391_v0 }
0x13d1   :  { %4583 = vmatpush3.bf16.msra.mxu1 %v4582_v26 }
0x13d2   :  { %4584 = vmatprep.subr.bf16.mxu1 %v5391_v0 }
0x13d5   :  { %4586 = vmatpush3.bf16.msra.mxu1 %v4585_v42 }
0x13d6   :  { %4587 = vmatprep.subr.bf16.mxu1 %v5391_v0 }
0x13d9   :  { %4589 = vmatpush3.bf16.msra.mxu1 %v4588_v29 }
0x13da   :  { %4590 = vmatprep.subr.bf16.mxu1 %v5391_v0 }
0x13dd   :  { %4592 = vmatpush3.bf16.msra.mxu1 %v4591_v32 }
0x13de   :  { %4593 = vmatprep.subr.bf16.mxu1 %v5391_v0 }
0x13e1   :  { %4595 = vmatpush3.bf16.msra.mxu1 %v4594_v37 }
0x13e2   :  { %4596 = vmatprep.subr.bf16.mxu1 %v5391_v0 }
0x13e5   :  { %4598 = vmatpush3.bf16.msra.mxu1 %v4597_v41 }
0x13e8   :  { %3764 = vmatmul.mubr.f32.vlgmr.msra.gmra.mrb[18].mxu1 %v2486_v18 }
0x14bb   :  { %v2591_v2 = vpop.f32.mrb[18].mxu1 }
0x14bc   :  { %v2592_v44 = vadd.f32 %v2996_v43, %v2591_v2  ;;  %v3765_v45 = vpop.f32.mrb[19].mxu1 }
0x14be   :  { %v2595_v47 = vmax.f32 %v2592_v44, 0.0 }
0x14bf   :  { %5367 = dma.done.wait [#allocation5 + $0x1], 2048 }
0x14c0   :  { %5368 = vsyncadd [#allocation5 + $0x1], 4294965248  ;;  %4599 = vmatprep.subr.bf16.mxu0 %v5391_v0  ;;  %3798 = vmatprep.mubr.msk.f32.mxu0 %vm5392_vm0, %v5393_v1  ;;  %s6148_s30 = scalar_lea.hbm %s6251_s6, 18432  ;;  %p5218_p12 = scmp.lt.u32.totalorder %s6119_s3, %s6251_s6 }
0x14c1   :  { %p5216_p11 = scmp.ne.s32.totalorder %s6119_s3, %s6148_s30  ;;  %p5219_p3 = scmp.lt.u32.totalorder %s5743_s25, %s6148_s30 }
0x14c2   :  { %p5221_p10 = scmp.lt.u32.totalorder %s6148_s30, %s6119_s3 }
0x14c3   :  { %p5220_p13 = por %p5219_p3, %p5218_p12 }
0x14c5   :  { %p5222_p1 = por %p5221_p10, %p5220_p13 }
0x14c7   :  { %p5223_p4 = pnand %p5222_p1, %p5216_p11 }
0x14c9   :  { %5226 = shalt.err (!%p5223_p4)  }
0x14ca   :  { %5238 = shalt.err (!%p5763_p0)  }
0x14cb   :  { %2609 = dma.hbm_to_vmem [thread:$0]  %s6119_s3, 2048, %s5687_s28, [#allocation5]  ;;  %v2997_v10 = vld [vmem:[#allocation12 + $0x7] ss:$0 sm:$0xff] }
0x14cc   :  { %v2610_v48 = vld [vmem:[#allocation3 + $0x80] sm:$0xff]  ;;  %v2611_v50 = vld [vmem:[#allocation3 + $0x88] sm:$0xff]  ;;  %v2612_v51 = vld [vmem:[#allocation3 + $0x90] sm:$0xff] }
0x14cd   :  { %v4600_v52 = vpack.c.bf16 %v2611_v50, %v2610_v48  ;;  %v2613_v58 = vld [vmem:[#allocation3 + $0x98] sm:$0xff]  ;;  %v2614_v53 = vld [vmem:[#allocation3 + $0xa0] sm:$0xff]  ;;  %v2615_v54 = vld [vmem:[#allocation3 + $0xa8] sm:$0xff] }
0x14ce   :  { %v4603_v61 = vpack.c.bf16 %v2613_v58, %v2612_v51  ;;  %v4606_v55 = vpack.c.bf16 %v2615_v54, %v2614_v53  ;;  %v2616_v56 = vld [vmem:[#allocation3 + $0xb0] sm:$0xff]  ;;  %v2617_v3 = vld [vmem:[#allocation3 + $0xb8] sm:$0xff]  ;;  %v2618_v59 = vld [vmem:[#allocation3 + $0xc0] sm:$0xff] }
0x14cf   :  { %4601 = vmatpush3.bf16.msra.mxu0 %v4600_v52  ;;  %v4609_v57 = vpack.c.bf16 %v2617_v3, %v2616_v56  ;;  %v2619_v60 = vld [vmem:[#allocation3 + $0xc8] sm:$0xff]  ;;  %v2620_v11 = vld [vmem:[#allocation3 + $0xd0] sm:$0xff]  ;;  %v2621_v14 = vld [vmem:[#allocation3 + $0xd8] sm:$0xff] }
0x14d0   :  { %4602 = vmatprep.subr.bf16.mxu0 %v5391_v0  ;;  %v4612_v62 = vpack.c.bf16 %v2619_v60, %v2618_v59  ;;  %v4615_v63 = vpack.c.bf16 %v2621_v14, %v2620_v11  ;;  %v2622_v4 = vld [vmem:[#allocation3 + $0xe0] sm:$0xff]  ;;  %v2623_v5 = vld [vmem:[#allocation3 + $0xe8] sm:$0xff]  ;;  %v2624_v7 = vld [vmem:[#allocation3 + $0xf0] sm:$0xff] }
0x14d1   :  { %v4618_v6 = vpack.c.bf16 %v2623_v5, %v2622_v4  ;;  %v2625_v8 = vld [vmem:[#allocation3 + $0xf8] sm:$0xff] }
0x14d2   :  { %v4621_v9 = vpack.c.bf16 %v2625_v8, %v2624_v7 }
0x14d3   :  { %4604 = vmatpush3.bf16.msra.mxu0 %v4603_v61 }
0x14d4   :  { %4605 = vmatprep.subr.bf16.mxu0 %v5391_v0 }
0x14d7   :  { %4607 = vmatpush3.bf16.msra.mxu0 %v4606_v55 }
0x14d8   :  { %4608 = vmatprep.subr.bf16.mxu0 %v5391_v0 }
0x14db   :  { %4610 = vmatpush3.bf16.msra.mxu0 %v4609_v57 }
0x14dc   :  { %4611 = vmatprep.subr.bf16.mxu0 %v5391_v0 }
0x14df   :  { %4613 = vmatpush3.bf16.msra.mxu0 %v4612_v62 }
0x14e0   :  { %4614 = vmatprep.subr.bf16.mxu0 %v5391_v0 }
0x14e3   :  { %4616 = vmatpush3.bf16.msra.mxu0 %v4615_v63 }
0x14e4   :  { %4617 = vmatprep.subr.bf16.mxu0 %v5391_v0 }
0x14e7   :  { %4619 = vmatpush3.bf16.msra.mxu0 %v4618_v6 }
0x14e8   :  { %4620 = vmatprep.subr.bf16.mxu0 %v5391_v0 }
0x14eb   :  { %4622 = vmatpush3.bf16.msra.mxu0 %v4621_v9 }
0x14ee   :  { %3799 = vmatmul.mubr.f32.vlgmr.msra.gmra.mrb[20].mxu0 %v2595_v47 }
0x15c1   :  { %v2700_v12 = vpop.f32.mrb[20].mxu0 }
0x15c2   :  { %v2701_v13 = vadd.f32 %v2997_v10, %v2700_v12  ;;  %v3800_v15 = vpop.f32.mrb[21].mxu0 }
0x15c4   :  { %v2704_v24 = vmax.f32 %v2701_v13, 0.0 }
0x15c5   :  { %5369 = dma.done.wait [#allocation5], 2048 }
0x15c6   :  { %5370 = vsyncadd [#allocation5], 4294965248  ;;  %4623 = vmatprep.subr.bf16.mxu1 %v5391_v0  ;;  %3833 = vmatprep.mubr.msk.f32.mxu1 %vm5392_vm0, %v5393_v1  ;;  %p5241_p0 = scmp.ne.s32.totalorder %s6148_s30, %s5743_s25  ;;  %p5243_p6 = scmp.lt.u32.totalorder %s6148_s30, %s6251_s6 }
0x15c7   :  { %p5244_p5 = scmp.lt.u32.totalorder %s5743_s25, %s5743_s25 }
0x15c9   :  { %p5245_p7 = por %p5244_p5, %p5243_p6 }
0x15cb   :  { %p5247_p8 = por %p5245_p7, %p5219_p3 }
0x15cd   :  { %p5248_p9 = pnand %p5247_p8, %p5241_p0 }
0x15cf   :  { %5251 = shalt.err (!%p5248_p9)  }
0x15d0   :  { %5263 = shalt.err (!%p5953_p2)  }
0x15d1   :  { %2718 = dma.hbm_to_vmem [thread:$0]  %s6148_s30, 2048, %s5929_s22, [#allocation5 + $0x1]  ;;  %v2998_v37 = vld [vmem:[#allocation12 + $0x8] ss:$0 sm:$0xff] }
0x15d2   :  { %v2719_v27 = vld [vmem:[#allocation3] sm:$0xff]  ;;  %v2720_v16 = vld [vmem:[#allocation3 + $0x8] sm:$0xff]  ;;  %v2721_v17 = vld [vmem:[#allocation3 + $0x10] sm:$0xff] }
0x15d3   :  { %v4624_v18 = vpack.c.bf16 %v2720_v16, %v2719_v27  ;;  %v2722_v19 = vld [vmem:[#allocation3 + $0x18] sm:$0xff]  ;;  %v2723_v49 = vld [vmem:[#allocation3 + $0x20] sm:$0xff]  ;;  %v2724_v20 = vld [vmem:[#allocation3 + $0x28] sm:$0xff] }
0x15d4   :  { %v4627_v46 = vpack.c.bf16 %v2722_v19, %v2721_v17  ;;  %v4630_v21 = vpack.c.bf16 %v2724_v20, %v2723_v49  ;;  %v2725_v22 = vld [vmem:[#allocation3 + $0x30] sm:$0xff]  ;;  %v2726_v23 = vld [vmem:[#allocation3 + $0x38] sm:$0xff]  ;;  %v2727_v26 = vld [vmem:[#allocation3 + $0x40] sm:$0xff] }
0x15d5   :  { %4625 = vmatpush3.bf16.msra.mxu1 %v4624_v18  ;;  %v4633_v25 = vpack.c.bf16 %v2726_v23, %v2725_v22  ;;  %v2728_v28 = vld [vmem:[#allocation3 + $0x48] sm:$0xff]  ;;  %v2729_v42 = vld [vmem:[#allocation3 + $0x50] sm:$0xff]  ;;  %v2730_v33 = vld [vmem:[#allocation3 + $0x58] sm:$0xff] }
0x15d6   :  { %4626 = vmatprep.subr.bf16.mxu1 %v5391_v0  ;;  %v4636_v39 = vpack.c.bf16 %v2728_v28, %v2727_v26  ;;  %v4639_v35 = vpack.c.bf16 %v2730_v33, %v2729_v42  ;;  %v2731_v29 = vld [vmem:[#allocation3 + $0x60] sm:$0xff]  ;;  %v2732_v30 = vld [vmem:[#allocation3 + $0x68] sm:$0xff]  ;;  %v2733_v32 = vld [vmem:[#allocation3 + $0x70] sm:$0xff] }
0x15d7   :  { %v4642_v31 = vpack.c.bf16 %v2732_v30, %v2731_v29  ;;  %v2734_v34 = vld [vmem:[#allocation3 + $0x78] sm:$0xff] }
0x15d8   :  { %v4645_v36 = vpack.c.bf16 %v2734_v34, %v2733_v32 }
0x15d9   :  { %4628 = vmatpush3.bf16.msra.mxu1 %v4627_v46 }
0x15da   :  { %4629 = vmatprep.subr.bf16.mxu1 %v5391_v0 }
0x15dd   :  { %4631 = vmatpush3.bf16.msra.mxu1 %v4630_v21 }
0x15de   :  { %4632 = vmatprep.subr.bf16.mxu1 %v5391_v0 }
0x15e1   :  { %4634 = vmatpush3.bf16.msra.mxu1 %v4633_v25 }
0x15e2   :  { %4635 = vmatprep.subr.bf16.mxu1 %v5391_v0 }
0x15e5   :  { %4637 = vmatpush3.bf16.msra.mxu1 %v4636_v39 }
0x15e6   :  { %4638 = vmatprep.subr.bf16.mxu1 %v5391_v0 }
0x15e9   :  { %4640 = vmatpush3.bf16.msra.mxu1 %v4639_v35 }
0x15ea   :  { %4641 = vmatprep.subr.bf16.mxu1 %v5391_v0 }
0x15ed   :  { %4643 = vmatpush3.bf16.msra.mxu1 %v4642_v31 }
0x15ee   :  { %4644 = vmatprep.subr.bf16.mxu1 %v5391_v0 }
0x15f1   :  { %4646 = vmatpush3.bf16.msra.mxu1 %v4645_v36 }
0x15f4   :  { %3834 = vmatmul.mubr.f32.vlgmr.msra.gmra.mrb[20].mxu1 %v2704_v24 }
0x16c7   :  { %v2809_v38 = vpop.f32.mrb[20].mxu1 }
0x16c8   :  { %v2810_v40 = vadd.f32 %v2998_v37, %v2809_v38  ;;  %v3835_v41 = vpop.f32.mrb[21].mxu1 }
0x16ca   :  { %v2813_v43 = vmax.f32 %v2810_v40, 0.0 }
0x16cb   :  { %5371 = dma.done.wait [#allocation5 + $0x1], 2048 }
0x16cc   :  { %5372 = vsyncadd [#allocation5 + $0x1], 4294965248  ;;  %4647 = vmatprep.subr.bf16.mxu0 %v5391_v0  ;;  %3868 = vmatprep.mubr.msk.f32.mxu0 %vm5392_vm0, %v5393_v1  ;;  %v2816_v2 = vld [vmem:[#allocation3 + $0x80] sm:$0xff]  ;;  %v2817_v44 = vld [vmem:[#allocation3 + $0x88] sm:$0xff]  ;;  %s5398_s6 = smov [#allocation21]  }
0x16cd   :  { %v2818_v45 = vld [vmem:[#allocation3 + $0x90] sm:$0xff]  ;;  %v4648_v47 = vpack.c.bf16 %v2817_v44, %v2816_v2  ;;  %v2819_v48 = vld [vmem:[#allocation3 + $0x98] sm:$0xff]  ;;  %v2820_v51 = vld [vmem:[#allocation3 + $0xa0] sm:$0xff]  ;;  %s2927_s25 = sshll.u32 %s5398_s6, 4  ;;  %s2928_s25 = int_to_ptr.vmem [resolvable:$true] %s2927_s25 }
0x16ce   :  { %v4651_v50 = vpack.c.bf16 %v2819_v48, %v2818_v45  ;;  %v2821_v52 = vld [vmem:[#allocation3 + $0xa8] sm:$0xff]  ;;  %v2822_v61 = vld [vmem:[#allocation3 + $0xb0] sm:$0xff]  ;;  %v2823_v53 = vld [vmem:[#allocation3 + $0xb8] sm:$0xff]  ;;  %s5265_s22 = scalar_lea.vmem %s2928_s25, 128  ;;  %p5270_p11 = scmp.lt.s32.totalorder %s2928_s25, %s2928_s25 }
0x16cf   :  { %4649 = vmatpush3.bf16.msra.mxu0 %v4648_v47  ;;  %v4654_v58 = vpack.c.bf16 %v2821_v52, %v2820_v51  ;;  %v4657_v54 = vpack.c.bf16 %v2823_v53, %v2822_v61  ;;  %v2824_v1 = vld [vmem:[#allocation3 + $0xc0] sm:$0xff]  ;;  %v2825_v55 = vld [vmem:[#allocation3 + $0xc8] sm:$0xff]  ;;  %v2826_v3 = vld [vmem:[#allocation3 + $0xd0] sm:$0xff]  ;;  %p5266_p2 = scmp.ne.s32.totalorder %s2928_s25, %s5265_s22  ;;  %p5271_p12 = scmp.lt.s32.totalorder %s5265_s22, %s5265_s22 }
0x16d0   :  { %4650 = vmatprep.subr.bf16.mxu0 %v5391_v0  ;;  %v4660_v56 = vpack.c.bf16 %v2825_v55, %v2824_v1  ;;  %v2827_v57 = vld [vmem:[#allocation3 + $0xd8] sm:$0xff]  ;;  %v2828_v60 = vld [vmem:[#allocation3 + $0xe0] sm:$0xff]  ;;  %v2829_v62 = vld [vmem:[#allocation3 + $0xe8] sm:$0xff] }
0x16d1   :  { %v4663_v59 = vpack.c.bf16 %v2827_v57, %v2826_v3  ;;  %v4666_v11 = vpack.c.bf16 %v2829_v62, %v2828_v60  ;;  %v2830_v14 = vld [vmem:[#allocation3 + $0xf0] sm:$0xff]  ;;  %v2831_v63 = vld [vmem:[#allocation3 + $0xf8] sm:$0xff]  ;;  %p5272_p3 = por %p5271_p12, %p5270_p11 }
0x16d2   :  { %v4669_v4 = vpack.c.bf16 %v2831_v63, %v2830_v14 }
0x16d3   :  { %4652 = vmatpush3.bf16.msra.mxu0 %v4651_v50  ;;  %p5273_p13 = pnand %p5272_p3, %p5266_p2 }
0x16d4   :  { %4653 = vmatprep.subr.bf16.mxu0 %v5391_v0 }
0x16d7   :  { %4655 = vmatpush3.bf16.msra.mxu0 %v4654_v58 }
0x16d8   :  { %4656 = vmatprep.subr.bf16.mxu0 %v5391_v0 }
0x16db   :  { %4658 = vmatpush3.bf16.msra.mxu0 %v4657_v54 }
0x16dc   :  { %4659 = vmatprep.subr.bf16.mxu0 %v5391_v0 }
0x16df   :  { %4661 = vmatpush3.bf16.msra.mxu0 %v4660_v56 }
0x16e0   :  { %4662 = vmatprep.subr.bf16.mxu0 %v5391_v0 }
0x16e3   :  { %4664 = vmatpush3.bf16.msra.mxu0 %v4663_v59 }
0x16e4   :  { %4665 = vmatprep.subr.bf16.mxu0 %v5391_v0 }
0x16e7   :  { %4667 = vmatpush3.bf16.msra.mxu0 %v4666_v11 }
0x16e8   :  { %4668 = vmatprep.subr.bf16.mxu0 %v5391_v0 }
0x16eb   :  { %4670 = vmatpush3.bf16.msra.mxu0 %v4669_v4 }
0x16ee   :  { %3869 = vmatmul.mubr.f32.vlgmr.msra.gmra.mrb[22].mxu0 %v2813_v43 }
0x16ef   :  { %5276 = shalt.err (!%p5273_p13)
}
0x16f0   :  { %s5277_s24 = scalar_lea.hbm %s6258_s13, 128 }
0x16f1   :  { %p5278_p10 = scmp.ne.s32.totalorder %s6258_s13, %s5277_s24  ;;  %p5281_p1 = scmp.lt.u32.totalorder %s5277_s24, %s6258_s13 }
0x16f3   :  { %p5283_p4 = pnand %p5281_p1, %p5278_p10 }
0x16f5   :  { %5286 = shalt.err (!%p5283_p4)
}
0x16f6   :  { %2930 = dma.vmem_to_hbm [thread:$0]  %s2928_s25, 128, %s6258_s13, [#allocation22]  }
0x16f7   :  { %s5399_s23 = smov [#allocation23]  }
0x16f8   :  { %s2937_s20 = sshll.u32 %s5399_s23, 4  ;;  %s2938_s20 = int_to_ptr.vmem [resolvable:$true] %s2937_s20 }
0x16f9   :  { %s5287_s18 = scalar_lea.vmem %s2938_s20, 128  ;;  %p5292_p6 = scmp.lt.s32.totalorder %s2938_s20, %s2938_s20 }
0x16fa   :  { %p5288_p0 = scmp.ne.s32.totalorder %s2938_s20, %s5287_s18  ;;  %p5293_p5 = scmp.lt.s32.totalorder %s5287_s18, %s5287_s18 }
0x16fc   :  { %p5294_p7 = por %p5293_p5, %p5292_p6 }
0x16fe   :  { %p5295_p8 = pnand %p5294_p7, %p5288_p0 }
0x1700   :  { %5298 = shalt.err (!%p5295_p8)
}
0x1701   :  { %s5299_s17 = scalar_lea.hbm %s6259_s14, 128 }
0x1702   :  { %p5300_p9 = scmp.ne.s32.totalorder %s6259_s14, %s5299_s17  ;;  %p5303_p2 = scmp.lt.u32.totalorder %s5299_s17, %s6259_s14 }
0x1704   :  { %p5305_p11 = pnand %p5303_p2, %p5300_p9 }
0x1706   :  { %5308 = shalt.err (!%p5305_p11)
}
0x1707   :  { %2940 = dma.vmem_to_hbm [thread:$0]  %s2938_s20, 128, %s6259_s14, [#allocation22]   ;;  %v2999_v0 = vld [vmem:[#allocation12 + $0x9] ss:$0 sm:$0xff] }
0x1708   :  { %s5400_s30 = smov [#allocation20]  }
0x1709   :  { %s2917_s0 = sshll.u32 %s5400_s30, 4  ;;  %s2918_s0 = int_to_ptr.vmem [resolvable:$true] %s2917_s0 }
0x170a   :  { %s5309_s15 = scalar_lea.vmem %s2918_s0, 128  ;;  %p5314_p3 = scmp.lt.s32.totalorder %s2918_s0, %s2918_s0 }
0x170b   :  { %p5310_p12 = scmp.ne.s32.totalorder %s2918_s0, %s5309_s15  ;;  %p5315_p13 = scmp.lt.s32.totalorder %s5309_s15, %s5309_s15 }
0x170d   :  { %p5316_p10 = por %p5315_p13, %p5314_p3 }
0x170f   :  { %p5317_p1 = pnand %p5316_p10, %p5310_p12 }
0x17c1   :  { %v2906_v5 = vpop.f32.mrb[22].mxu0 }
0x17c2   :  { %v2907_v6 = vadd.f32 %v2999_v0, %v2906_v5  ;;  %v3870_v7 = vpop.f32.mrb[23].mxu0 }
0x17c4   :  { %2910 = vst [vmem:[#allocation20] sm:$0xff] %v2907_v6 }
0x17c5   :  { %5320 = shalt.err (!%p5317_p1)
}
0x17c6   :  { %s5321_s6 = scalar_lea.hbm %s6257_s12, 128 }
0x17c7   :  { %p5322_p4 = scmp.ne.s32.totalorder %s6257_s12, %s5321_s6  ;;  %p5325_p0 = scmp.lt.u32.totalorder %s5321_s6, %s6257_s12 }
0x17c9   :  { %p5327_p6 = pnand %p5325_p0, %p5322_p4 }
0x17cb   :  { %5330 = shalt.err (!%p5327_p6)
}
0x17cc   :  { %2920 = dma.vmem_to_hbm [thread:$0]  %s2918_s0, 128, %s6257_s12, [#allocation8]  }
0x17cd   :  { %5373 = dma.done.wait [#allocation8], 128  }
0x17ce   :  { %5374 = vsyncadd [#allocation8], 4294967168 }
0x17cf   :  { %5375 = dma.done.wait [#allocation22], 256  }
0x17d0   :  { %5376 = vsyncadd [#allocation22], 4294967040 }
0x17d1   :  { %2950 = vsyncpa [#allocation7], 1 }
0x17d2   :  { %2951 = vsyncpa [#allocation10], 1 }
0x17d3   :  { %2952 = vsyncpa [#allocation13], 1 }
0x17d4   :  { %2953 = vsyncpa [#allocation16], 1 }
0x17d5   :  { %2954 = vsyncpa [#allocation19], 1 }
0x17d6   :  { %2955 = vsyncpa [#allocation8], 1 }
0x17d7   :  { %2956 = vsyncpa [#allocation22], 1 }
0x17d8   :  { %2957 = vsyncmov [#allocation4] }
0x17db   :  { %s2958_s2 = vpop.sfrf %2957 }
0x17dc   :  { %p3000_p5 = scmp.ne.s32.totalorder %s2958_s2, 0 }
0x17de   :  { %2962 = shalt.err (%p3000_p5)  }
0x17df   :  { %2964 = vsyncmov [#allocation4 + $0x1] }
0x17e2   :  { %s2965_s5 = vpop.sfrf %2964 }
0x17e3   :  { %p3001_p7 = scmp.ne.s32.totalorder %s2965_s5, 0 }
0x17e5   :  { %2969 = shalt.err (%p3001_p7)  }
0x17e6   :  { %2970 = vsyncmov [#allocation5] }
0x17e9   :  { %s2971_s12 = vpop.sfrf %2970 }
0x17ea   :  { %p3002_p8 = scmp.ne.s32.totalorder %s2971_s12, 0 }
0x17ec   :  { %2975 = shalt.err (%p3002_p8)  }
0x17ed   :  { %2977 = vsyncmov [#allocation5 + $0x1] }
0x17f0   :  { %s2978_s1 = vpop.sfrf %2977 }
0x17f1   :  { %p3003_p9 = scmp.ne.s32.totalorder %s2978_s1, 0 }
0x17f3   :  { %2982 = shalt.err (%p3003_p9)  }

</bundles_post_ra>
